<compile_context>
chip_gen: v7x
topology: tpu7x:2x2x1
jax: 0.10.0
libtpu: 0.0.40
codegen_flags: <defaults>
</compile_context>

<pallas_src>
import jax
import jax.numpy as jnp
from jax.experimental import pallas as pl
from jax.experimental.pallas import tpu as pltpu

BN_EPS = 1e-5


def _make_kernel(nb_layers, d_in, w_in_pad, h_pad, compute_dtype):
    count_col = 2 * d_in   # spare zero lane (w_in_pad >= 2*d_in + 1 by construction)

    def kernel(idx_ref, end_row_ref, x_ref, w_ref, bgb_ref, out_ref, msg_acc):
        step = pl.program_id(0)

        @pl.when(step == 0)
        def _init():
            msg_acc[...] = jnp.zeros_like(msg_acc)

        x = x_ref[...]                                 # [N, w_in_pad] f32; x at lanes [0:d) and [d:2d)
        n_nodes = x.shape[0]
        idx = idx_ref[...]                             # [tile_e, 2] i32 (start, end); padded edges = -1
        tile_e = idx.shape[0]
        start_col = idx[:, 0:1]                        # [tile_e, 1]
        end_col = idx[:, 1:2]                          # [tile_e, 1]
        end_row = end_row_ref[0]                       # [1, tile_e] lane-major copy of `end`

        # Fused gather: diff = x[start] - x[end] = (S_start - S_end) @ x  (one MXU dot).
        node_iota_e = jax.lax.broadcasted_iota(jnp.int32, (tile_e, n_nodes), 1)
        sel = ((node_iota_e == start_col).astype(compute_dtype)
               - (node_iota_e == end_col).astype(compute_dtype))
        diff = jnp.dot(sel, x.astype(compute_dtype),
                       preferred_element_type=jnp.float32)          # [tile_e, w_in_pad]

        # Fold the in-degree count into the scatter matmul: write 1.0 into a spare
        # zero lane of diff; the MXU sweeps all lanes anyway, so counts come for free.
        lane_e = jax.lax.broadcasted_iota(jnp.int32, diff.shape, 1)
        diff = jnp.where(lane_e == count_col, 1.0, diff)

        # Node-major one-hot of `end` (node on sublanes, edge on lanes): scatter-add of
        # diff (+ count lane) with one canonical MXU dot, no XLU transpose anywhere.
        node_iota_n = jax.lax.broadcasted_iota(jnp.int32, (n_nodes, tile_e), 0)
        s_end_t = (node_iota_n == end_row).astype(compute_dtype)     # [N, tile_e]
        msg_acc[...] += jnp.dot(s_end_t, diff.astype(compute_dtype),
                                preferred_element_type=jnp.float32)

        @pl.when(step == pl.num_programs(0) - 1)
        def _finalize():
            acc = msg_acc[...]                                       # [N, w_in_pad]
            counts = acc[:, count_col:count_col + 1]                 # [N, 1] in-degrees
            inv_cnt = 1.0 / jnp.maximum(counts, 1.0)                 # zero-degree nodes -> 0 messages
            msgs = acc * inv_cnt
            # Packed node_inputs: lanes [0:d) = x, lanes [d:2d) = messages; lanes >= 2d
            # carry junk (the count lane) that only meets all-zero weight rows.
            lane_n = jax.lax.broadcasted_iota(jnp.int32, x.shape, 1)
            h = jnp.where(lane_n < d_in, x, msgs)
            for l in range(nb_layers):
                rows = w_in_pad if l == 0 else h_pad
                z = (jnp.dot(h, w_ref[l, :rows, :], preferred_element_type=jnp.float32)
                     + bgb_ref[l, 0:1, :])
                # Training-mode BatchNorm (two-pass batch stats) + ReLU, fused affine.
                mean = jnp.mean(z, axis=0, keepdims=True)
                centered = z - mean
                var = jnp.mean(centered * centered, axis=0, keepdims=True)
                scale = bgb_ref[l, 1:2, :] * jax.lax.rsqrt(var + BN_EPS)
                h = jnp.maximum(centered * scale + bgb_ref[l, 2:3, :], 0.0)
            out_ref[...] = h
        # TODO(synk): for very large N, split the finalize into a second pallas_call
        # tiled over nodes (BN stats pass + normalize pass) instead of full-N residency,
        # and on v7x add a leading size-2 "parallel" grid axis so both TensorCores
        # accumulate disjoint edge ranges into partial [N, w_in_pad] slabs.

    return kernel


def edge_conv_forward(x, edge_index, params, *, tile_e=None,
                      compute_dtype=jnp.float32):
    """params: list of (W[in,out], b[out], gamma[out], beta[out]) per layer."""
    x = jnp.asarray(x, jnp.float32)
    n_nodes, d_in = x.shape
    nb_layers = len(params)
    hidden_dim = params[0][0].shape[1]

    # Packed node-input width: [x | messages | count lane], lane-dense.
    w_in_pad = pl.cdiv(2 * d_in + 1, 128) * 128
    h_pad = pl.cdiv(hidden_dim, 128) * 128
    w_rows = max(w_in_pad, h_pad)

    if tile_e is None:
        tile_e = 256
        # Keep the [tile_e, N] selector footprint bounded (~2 MiB) for large graphs.
        while tile_e > 128 and n_nodes * tile_e * 4 > (2 << 20):
            tile_e //= 2

    # x duplicated at lanes [0:d) and [d:2d): the scatter dot then lands messages
    # directly at lanes [d:2d), so the finalize needs no concat / lane roll.
    x_dup = jnp.zeros((n_nodes, w_in_pad), jnp.float32)
    x_dup = x_dup.at[:, :d_in].set(x).at[:, d_in:2 * d_in].set(x)

    # All MLP parameters packed into two stacked arrays (2 DMAs total). Padded output
    # columns get b = gamma = beta = 0, so they stay exactly 0 through BN + ReLU.
    w_stack = jnp.zeros((nb_layers, w_rows, h_pad), jnp.float32)
    bgb_stack = jnp.zeros((nb_layers, 3, h_pad), jnp.float32)
    for l, (w, b, g, bt) in enumerate(params):
        w = jnp.asarray(w, jnp.float32)
        if l == 0:
            w_stack = w_stack.at[0, :d_in, :hidden_dim].set(w[:d_in])
            w_stack = w_stack.at[0, d_in:2 * d_in, :hidden_dim].set(w[d_in:])
        else:
            w_stack = w_stack.at[l, :hidden_dim, :hidden_dim].set(w)
        bgb_stack = bgb_stack.at[l, 0, :hidden_dim].set(jnp.asarray(b, jnp.float32))
        bgb_stack = bgb_stack.at[l, 1, :hidden_dim].set(jnp.asarray(g, jnp.float32))
        bgb_stack = bgb_stack.at[l, 2, :hidden_dim].set(jnp.asarray(bt, jnp.float32))

    # Edge indices padded to a multiple of tile_e with -1 (matches no node -> zero
    # selector rows/columns).  `end` is passed both sublane-major (gather selector)
    # and lane-major (scatter selector) so the kernel never transposes.
    start = jnp.asarray(edge_index[0], jnp.int32)
    end = jnp.asarray(edge_index[1], jnp.int32)
    n_edges = start.shape[0]
    e_padded = pl.cdiv(n_edges, tile_e) * tile_e
    num_tiles = e_padded // tile_e
    start_p = jnp.full((e_padded,), -1, jnp.int32).at[:n_edges].set(start)
    end_p = jnp.full((e_padded,), -1, jnp.int32).at[:n_edges].set(end)
    idx_col = jnp.stack([start_p, end_p], axis=1)            # [E_pad, 2]
    end_row = end_p.reshape(num_tiles, 1, tile_e)            # [tiles, 1, tile_e]
    # TODO(synk): merge idx_col/end_row into one lane-major [tiles, 2, tile_e] block
    # (deriving the sublane-major columns in-kernel) to drop one small DMA per step.

    def build(single_buffer_invariants):
        inv_kw = {}
        if single_buffer_invariants and hasattr(pl, "Buffered"):
            inv_kw = dict(pipeline_mode=pl.Buffered(1))
        n_buf = 1 if inv_kw else 2
        # vmem budget from the actual buffers (f32 bytes), padded to (8,128) tiles.
        resident = 4 * (n_nodes * w_in_pad + nb_layers * w_rows * h_pad
                        + nb_layers * 8 * h_pad + n_nodes * h_pad)
        per_step_idx = 4 * (tile_e * 128 + 8 * tile_e)       # idx blocks after tiling
        scratch = 4 * n_nodes * w_in_pad
        temps = 4 * (3 * tile_e * max(n_nodes, 128) + tile_e * w_in_pad
                     + 4 * n_nodes * max(w_in_pad, h_pad))
        vmem_limit = int(1.5 * (n_buf * resident + 2 * per_step_idx + scratch + temps))
        vmem_limit = min(max(vmem_limit, 16 << 20), 64 << 20)

        return pl.pallas_call(
            _make_kernel(nb_layers, d_in, w_in_pad, h_pad, compute_dtype),
            out_shape=jax.ShapeDtypeStruct((n_nodes, h_pad), jnp.float32),
            grid=(num_tiles,),
            in_specs=[
                pl.BlockSpec((tile_e, 2), lambda e: (e, 0)),
                pl.BlockSpec((1, 1, tile_e), lambda e: (e, 0, 0)),
                pl.BlockSpec((n_nodes, w_in_pad), lambda e: (0, 0), **inv_kw),
                pl.BlockSpec((nb_layers, w_rows, h_pad), lambda e: (0, 0, 0), **inv_kw),
                pl.BlockSpec((nb_layers, 3, h_pad), lambda e: (0, 0, 0), **inv_kw),
            ],
            out_specs=pl.BlockSpec((n_nodes, h_pad), lambda e: (0, 0), **inv_kw),
            scratch_shapes=[
                pltpu.VMEM((n_nodes, w_in_pad), jnp.float32),   # msg-sum (+count) accumulator
            ],
            compiler_params=pltpu.CompilerParams(
                dimension_semantics=("arbitrary",),
                vmem_limit_bytes=vmem_limit),
        )

    try:
        out = build(True)(idx_col, end_row, x_dup, w_stack, bgb_stack)
    except Exception:
        # pipeline_mode=pl.Buffered(1) not supported by this jax/libtpu: fall back to
        # default double-buffering of the grid-invariant blocks (correctness identical).
        out = build(False)(idx_col, end_row, x_dup, w_stack, bgb_stack)

    # Slice away the lane padding; .squeeze() mirrors the torch module (no-op here).
    return jnp.squeeze(out[:, :hidden_dim])


def _reference_forward(x, edge_index, params):
    """Pure-JAX reference (faithful to the PyTorch module) for correctness checks."""
    start, end = edge_index[0], edge_index[1]
    n = x.shape[0]
    diff = x[start] - x[end]
    msg_sum = jax.ops.segment_sum(diff, end, num_segments=n)
    counts = jax.ops.segment_sum(jnp.ones((diff.shape[0],), jnp.float32), end,
                                 num_segments=n)
    messages = msg_sum / jnp.maximum(counts, 1.0)[:, None]
    h = jnp.concatenate([x, messages], axis=1)
    for (w, b, g, bt) in params:
        h = h @ w + b
        mean = jnp.mean(h, axis=0, keepdims=True)
        var = jnp.mean((h - mean) ** 2, axis=0, keepdims=True)
        h = (h - mean) / jnp.sqrt(var + BN_EPS) * g + bt
        h = jnp.maximum(h, 0.0)
    return jnp.squeeze(h)


if __name__ == "__main__":
    # Small deterministic problem: N nodes, input_dim features, E edges (>1 edge tile).
    N, input_dim, hidden_dim, nb_layers, E = 64, 4, 32, 3, 640

    key = jax.random.PRNGKey(0)
    k_x, k_e, k_p = jax.random.split(key, 3)

    x = jax.random.normal(k_x, (N, input_dim), dtype=jnp.float32)
    edge_index = jax.random.randint(k_e, (2, E), 0, N, dtype=jnp.int32)

    # Deterministic parameter init (Linear W/b + BatchNorm gamma/beta per layer).
    params = []
    in_dim = input_dim * 2
    pk = k_p
    for _ in range(nb_layers):
        pk, kw, kb, kg, kbt = jax.random.split(pk, 5)
        w = jax.random.normal(kw, (in_dim, hidden_dim), jnp.float32) * 0.1
        b = jax.random.normal(kb, (hidden_dim,), jnp.float32) * 0.1
        g = 1.0 + 0.1 * jax.random.normal(kg, (hidden_dim,), jnp.float32)
        bt = 0.1 * jax.random.normal(kbt, (hidden_dim,), jnp.float32)
        params.append((w, b, g, bt))
        in_dim = hidden_dim

    ref = jax.block_until_ready(_reference_forward(x, edge_index, params))

    # Exact f32 path.
    out = jax.block_until_ready(edge_conv_forward(x, edge_index, params))
    assert out.shape == (N, hidden_dim), out.shape
    assert jnp.allclose(out, ref, atol=1e-3, rtol=1e-3), \
        f"Pallas output mismatch vs reference (max abs diff {jnp.max(jnp.abs(out - ref))})"

    # Optional bf16 MXU path for the one-hot gather/scatter dots (selectors are
    # bf16-exact; only x rounding changes numerics) - loose sanity bound.
    out_bf16 = jax.block_until_ready(
        edge_conv_forward(x, edge_index, params, compute_dtype=jnp.bfloat16))
    err_bf16 = float(jnp.max(jnp.abs(out_bf16 - ref)))
    assert err_bf16 < 0.25, f"bf16 path drifted too far (max abs diff {err_bf16})"

    print("KERNEL_OK")
</pallas_src>

<mosaic_0001>
module attributes {stable_mosaic.version = 11 : i64} {
  func.func @kernel(%arg0: i32, %arg1: memref<256x2xi32, #tpu.memory_space<vmem>>, %arg2: memref<1x1x256xi32, #tpu.memory_space<vmem>>, %arg3: memref<64x128xf32, #tpu.memory_space<vmem>>, %arg4: memref<3x128x128xf32, #tpu.memory_space<vmem>>, %arg5: memref<3x3x128xf32, #tpu.memory_space<vmem>>, %arg6: memref<64x128xf32, #tpu.memory_space<vmem>>, %arg7: memref<64x128xf32, #tpu.memory_space<vmem>>) attributes {dimension_semantics = [#tpu.dimension_semantics<arbitrary>], iteration_bounds = array<i64: 3>, scalar_prefetch = 0 : i64, scratch_operands = 1 : i64, tpu.core_type = #tpu.core_type<tc>, window_params = [{transform_indices = @transform_0, window_bounds = array<i64: 256, 2>}, {transform_indices = @transform_1, window_bounds = array<i64: 1, 1, 256>}, {pipeline_mode = #tpu.pipeline_mode<synchronous>, transform_indices = @transform_2, window_bounds = array<i64: 64, 128>}, {pipeline_mode = #tpu.pipeline_mode<synchronous>, transform_indices = @transform_3, window_bounds = array<i64: 3, 128, 128>}, {pipeline_mode = #tpu.pipeline_mode<synchronous>, transform_indices = @transform_4, window_bounds = array<i64: 3, 3, 128>}, {pipeline_mode = #tpu.pipeline_mode<synchronous>, transform_indices = @transform_5, window_bounds = array<i64: 64, 128>}]} {
    %c0_i32 = arith.constant 0 : i32
    %0 = arith.cmpi eq, %arg0, %c0_i32 : i32
    %1 = arith.extui %0 : i1 to i32
    %c0_i32_0 = arith.constant 0 : i32
    %2 = arith.cmpi ne, %1, %c0_i32_0 : i32
    scf.if %2 {
      %cst_14 = arith.constant 0.000000e+00 : f32
      %37 = vector.broadcast %cst_14 : f32 to vector<64x128xf32>
      %c0_15 = arith.constant 0 : index
      %c0_16 = arith.constant 0 : index
      %38 = vector.load %arg7[%c0_15, %c0_16] : memref<64x128xf32, #tpu.memory_space<vmem>>, vector<64x128xf32>
      tpu.vector_store %arg7[%c0_15, %c0_16], %37 {strides = array<i32>} : memref<64x128xf32, #tpu.memory_space<vmem>>, vector<64x128xf32>,
    } else {
    }
    %c0 = arith.constant 0 : index
    %c0_1 = arith.constant 0 : index
    %3 = vector.load %arg3[%c0, %c0_1] : memref<64x128xf32, #tpu.memory_space<vmem>>, vector<64x128xf32>
    %c0_2 = arith.constant 0 : index
    %c0_3 = arith.constant 0 : index
    %4 = vector.load %arg1[%c0_2, %c0_3] : memref<256x2xi32, #tpu.memory_space<vmem>>, vector<256x2xi32>
    %5 = vector.extract_strided_slice %4 {offsets = [0, 0], sizes = [256, 1], strides = [1, 1]} : vector<256x2xi32> to vector<256x1xi32>
    %6 = vector.extract_strided_slice %4 {offsets = [0, 1], sizes = [256, 1], strides = [1, 1]} : vector<256x2xi32> to vector<256x1xi32>
    %c0_4 = arith.constant 0 : index
    %c0_5 = arith.constant 0 : index
    %c0_6 = arith.constant 0 : index
    %7 = vector.load %arg2[%c0_4, %c0_5, %c0_6] : memref<1x1x256xi32, #tpu.memory_space<vmem>>, vector<1x1x256xi32>
    %8 = vector.shape_cast %7 : vector<1x1x256xi32> to vector<1x256xi32>
    %9 = tpu.iota {dimensions = array<i32: 1>} : vector<256x64xi32>
    %10 = vector.broadcast %5 : vector<256x1xi32> to vector<256x64xi32>
    %11 = arith.cmpi eq, %9, %10 : vector<256x64xi32>
    %12 = arith.extui %11 : vector<256x64xi1> to vector<256x64xi32>
    %13 = arith.sitofp %12 : vector<256x64xi32> to vector<256x64xf32>
    %14 = vector.broadcast %6 : vector<256x1xi32> to vector<256x64xi32>
    %15 = arith.cmpi eq, %9, %14 : vector<256x64xi32>
    %16 = arith.extui %15 : vector<256x64xi1> to vector<256x64xi32>
    %17 = arith.sitofp %16 : vector<256x64xi32> to vector<256x64xf32>
    %18 = arith.subf %13, %17 : vector<256x64xf32>
    %cst = arith.constant dense<0.000000e+00> : vector<256x128xf32>
    %19 = tpu.matmul %18, %3, %cst {dimension_numbers = #tpu.dot_dimension_numbers<[1], [0], [0], [1], [0, 0, 1, 1], [], []>} : vector<256x64xf32>, vector<64x128xf32>, vector<256x128xf32> -> vector<256x128xf32>
    %20 = tpu.iota {dimensions = array<i32: 1>} : vector<256x128xi32>
    %c8_i32 = arith.constant 8 : i32
    %21 = vector.broadcast %c8_i32 : i32 to vector<256x128xi32>
    %22 = arith.cmpi eq, %20, %21 : vector<256x128xi32>
    %cst_7 = arith.constant 1.000000e+00 : f32
    %23 = vector.broadcast %cst_7 : f32 to vector<256x128xf32>
    %24 = arith.select %22, %23, %19 : vector<256x128xi1>, vector<256x128xf32>
    %25 = tpu.iota {dimensions = array<i32: 0>} : vector<64x256xi32>
    %26 = vector.broadcast %8 : vector<1x256xi32> to vector<64x256xi32>
    %27 = arith.cmpi eq, %25, %26 : vector<64x256xi32>
    %28 = arith.extui %27 : vector<64x256xi1> to vector<64x256xi32>
    %29 = arith.sitofp %28 : vector<64x256xi32> to vector<64x256xf32>
    %c0_8 = arith.constant 0 : index
    %c0_9 = arith.constant 0 : index
    %30 = vector.load %arg7[%c0_8, %c0_9] : memref<64x128xf32, #tpu.memory_space<vmem>>, vector<64x128xf32>
    %cst_10 = arith.constant dense<0.000000e+00> : vector<64x128xf32>
    %31 = tpu.matmul %29, %24, %cst_10 {dimension_numbers = #tpu.dot_dimension_numbers<[1], [0], [0], [1], [0, 0, 1, 1], [], []>} : vector<64x256xf32>, vector<256x128xf32>, vector<64x128xf32> -> vector<64x128xf32>
    %32 = arith.addf %30, %31 : vector<64x128xf32>
    %c0_11 = arith.constant 0 : index
    %c0_12 = arith.constant 0 : index
    %33 = vector.load %arg7[%c0_11, %c0_12] : memref<64x128xf32, #tpu.memory_space<vmem>>, vector<64x128xf32>
    tpu.vector_store %arg7[%c0_11, %c0_12], %32 {strides = array<i32>} : memref<64x128xf32, #tpu.memory_space<vmem>>, vector<64x128xf32>,
    %c2_i32 = arith.constant 2 : i32
    %34 = arith.cmpi eq, %arg0, %c2_i32 : i32
    %35 = arith.extui %34 : i1 to i32
    %c0_i32_13 = arith.constant 0 : i32
    %36 = arith.cmpi ne, %35, %c0_i32_13 : i32
    scf.if %36 {
      %c0_14 = arith.constant 0 : index
      %c0_15 = arith.constant 0 : index
      %37 = vector.load %arg7[%c0_14, %c0_15] : memref<64x128xf32, #tpu.memory_space<vmem>>, vector<64x128xf32>
      %38 = vector.extract_strided_slice %37 {offsets = [0, 8], sizes = [64, 1], strides = [1, 1]} : vector<64x128xf32> to vector<64x1xf32>
      %cst_16 = arith.constant 1.000000e+00 : f32
      %39 = vector.broadcast %cst_16 : f32 to vector<64x1xf32>
      %40 = arith.maximumf %38, %39 : vector<64x1xf32>
      %cst_17 = arith.constant 1.000000e+00 : f32
      %41 = vector.broadcast %cst_17 : f32 to vector<64x1xf32>
      %42 = arith.divf %41, %40 : vector<64x1xf32>
      %43 = vector.broadcast %42 : vector<64x1xf32> to vector<64x128xf32>
      %44 = arith.mulf %37, %43 : vector<64x128xf32>
      %45 = tpu.iota {dimensions = array<i32: 1>} : vector<64x128xi32>
      %c4_i32 = arith.constant 4 : i32
      %46 = vector.broadcast %c4_i32 : i32 to vector<64x128xi32>
      %47 = arith.cmpi slt, %45, %46 : vector<64x128xi32>
      %48 = arith.select %47, %3, %44 : vector<64x128xi1>, vector<64x128xf32>
      %c0_18 = arith.constant 0 : index
      %c0_19 = arith.constant 0 : index
      %c0_20 = arith.constant 0 : index
      %49 = vector.load %arg4[%c0_18, %c0_19, %c0_20] : memref<3x128x128xf32, #tpu.memory_space<vmem>>, vector<1x128x128xf32>
      %50 = vector.shape_cast %49 : vector<1x128x128xf32> to vector<128x128xf32>
      %cst_21 = arith.constant dense<0.000000e+00> : vector<64x128xf32>
      %51 = tpu.matmul %48, %50, %cst_21 {dimension_numbers = #tpu.dot_dimension_numbers<[1], [0], [0], [1], [0, 0, 1, 1], [], []>} : vector<64x128xf32>, vector<128x128xf32>, vector<64x128xf32> -> vector<64x128xf32>
      %c0_22 = arith.constant 0 : index
      %c0_23 = arith.constant 0 : index
      %c0_24 = arith.constant 0 : index
      %52 = vector.load %arg5[%c0_22, %c0_23, %c0_24] : memref<3x3x128xf32, #tpu.memory_space<vmem>>, vector<1x1x128xf32>
      %53 = vector.shape_cast %52 : vector<1x1x128xf32> to vector<1x128xf32>
      %54 = vector.broadcast %53 : vector<1x128xf32> to vector<64x128xf32>
      %55 = arith.addf %51, %54 : vector<64x128xf32>
      %cst_25 = arith.constant dense<0.000000e+00> : vector<128xf32>
      %56 = vector.multi_reduction <add>, %55, %cst_25 [0] : vector<64x128xf32> to vector<128xf32>
      %57 = vector.shape_cast %56 : vector<128xf32> to vector<1x128xf32>
      %cst_26 = arith.constant 6.400000e+01 : f32
      %58 = vector.broadcast %cst_26 : f32 to vector<1x128xf32>
      %59 = arith.divf %57, %58 : vector<1x128xf32>
      %60 = vector.broadcast %59 : vector<1x128xf32> to vector<64x128xf32>
      %61 = arith.subf %55, %60 : vector<64x128xf32>
      %62 = arith.mulf %61, %61 : vector<64x128xf32>
      %cst_27 = arith.constant dense<0.000000e+00> : vector<128xf32>
      %63 = vector.multi_reduction <add>, %62, %cst_27 [0] : vector<64x128xf32> to vector<128xf32>
      %64 = vector.shape_cast %63 : vector<128xf32> to vector<1x128xf32>
      %cst_28 = arith.constant 6.400000e+01 : f32
      %65 = vector.broadcast %cst_28 : f32 to vector<1x128xf32>
      %66 = arith.divf %64, %65 : vector<1x128xf32>
      %c0_29 = arith.constant 0 : index
      %c1 = arith.constant 1 : index
      %c0_30 = arith.constant 0 : index
      %67 = vector.load %arg5[%c0_29, %c1, %c0_30] : memref<3x3x128xf32, #tpu.memory_space<vmem>>, vector<1x1x128xf32>
      %68 = vector.shape_cast %67 : vector<1x1x128xf32> to vector<1x128xf32>
      %cst_31 = arith.constant 9.99999974E-6 : f32
      %69 = vector.broadcast %cst_31 : f32 to vector<1x128xf32>
      %70 = arith.addf %66, %69 : vector<1x128xf32>
      %71 = math.rsqrt %70 : vector<1x128xf32>
      %72 = arith.mulf %68, %71 : vector<1x128xf32>
      %73 = vector.broadcast %72 : vector<1x128xf32> to vector<64x128xf32>
      %74 = arith.mulf %61, %73 : vector<64x128xf32>
      %c0_32 = arith.constant 0 : index
      %c2 = arith.constant 2 : index
      %c0_33 = arith.constant 0 : index
      %75 = vector.load %arg5[%c0_32, %c2, %c0_33] : memref<3x3x128xf32, #tpu.memory_space<vmem>>, vector<1x1x128xf32>
      %76 = vector.shape_cast %75 : vector<1x1x128xf32> to vector<1x128xf32>
      %77 = vector.broadcast %76 : vector<1x128xf32> to vector<64x128xf32>
      %78 = arith.addf %74, %77 : vector<64x128xf32>
      %cst_34 = arith.constant 0.000000e+00 : f32
      %79 = vector.broadcast %cst_34 : f32 to vector<64x128xf32>
      %80 = arith.maximumf %78, %79 : vector<64x128xf32>
      %c1_35 = arith.constant 1 : index
      %c0_36 = arith.constant 0 : index
      %c0_37 = arith.constant 0 : index
      %81 = vector.load %arg4[%c1_35, %c0_36, %c0_37] : memref<3x128x128xf32, #tpu.memory_space<vmem>>, vector<1x128x128xf32>
      %82 = vector.shape_cast %81 : vector<1x128x128xf32> to vector<128x128xf32>
      %cst_38 = arith.constant dense<0.000000e+00> : vector<64x128xf32>
      %83 = tpu.matmul %80, %82, %cst_38 {dimension_numbers = #tpu.dot_dimension_numbers<[1], [0], [0], [1], [0, 0, 1, 1], [], []>} : vector<64x128xf32>, vector<128x128xf32>, vector<64x128xf32> -> vector<64x128xf32>
      %c1_39 = arith.constant 1 : index
      %c0_40 = arith.constant 0 : index
      %c0_41 = arith.constant 0 : index
      %84 = vector.load %arg5[%c1_39, %c0_40, %c0_41] : memref<3x3x128xf32, #tpu.memory_space<vmem>>, vector<1x1x128xf32>
      %85 = vector.shape_cast %84 : vector<1x1x128xf32> to vector<1x128xf32>
      %86 = vector.broadcast %85 : vector<1x128xf32> to vector<64x128xf32>
      %87 = arith.addf %83, %86 : vector<64x128xf32>
      %cst_42 = arith.constant dense<0.000000e+00> : vector<128xf32>
      %88 = vector.multi_reduction <add>, %87, %cst_42 [0] : vector<64x128xf32> to vector<128xf32>
      %89 = vector.shape_cast %88 : vector<128xf32> to vector<1x128xf32>
      %cst_43 = arith.constant 6.400000e+01 : f32
      %90 = vector.broadcast %cst_43 : f32 to vector<1x128xf32>
      %91 = arith.divf %89, %90 : vector<1x128xf32>
      %92 = vector.broadcast %91 : vector<1x128xf32> to vector<64x128xf32>
      %93 = arith.subf %87, %92 : vector<64x128xf32>
      %94 = arith.mulf %93, %93 : vector<64x128xf32>
      %cst_44 = arith.constant dense<0.000000e+00> : vector<128xf32>
      %95 = vector.multi_reduction <add>, %94, %cst_44 [0] : vector<64x128xf32> to vector<128xf32>
      %96 = vector.shape_cast %95 : vector<128xf32> to vector<1x128xf32>
      %cst_45 = arith.constant 6.400000e+01 : f32
      %97 = vector.broadcast %cst_45 : f32 to vector<1x128xf32>
      %98 = arith.divf %96, %97 : vector<1x128xf32>
      %c1_46 = arith.constant 1 : index
      %c1_47 = arith.constant 1 : index
      %c0_48 = arith.constant 0 : index
      %99 = vector.load %arg5[%c1_46, %c1_47, %c0_48] : memref<3x3x128xf32, #tpu.memory_space<vmem>>, vector<1x1x128xf32>
      %100 = vector.shape_cast %99 : vector<1x1x128xf32> to vector<1x128xf32>
      %cst_49 = arith.constant 9.99999974E-6 : f32
      %101 = vector.broadcast %cst_49 : f32 to vector<1x128xf32>
      %102 = arith.addf %98, %101 : vector<1x128xf32>
      %103 = math.rsqrt %102 : vector<1x128xf32>
      %104 = arith.mulf %100, %103 : vector<1x128xf32>
      %105 = vector.broadcast %104 : vector<1x128xf32> to vector<64x128xf32>
      %106 = arith.mulf %93, %105 : vector<64x128xf32>
      %c1_50 = arith.constant 1 : index
      %c2_51 = arith.constant 2 : index
      %c0_52 = arith.constant 0 : index
      %107 = vector.load %arg5[%c1_50, %c2_51, %c0_52] : memref<3x3x128xf32, #tpu.memory_space<vmem>>, vector<1x1x128xf32>
      %108 = vector.shape_cast %107 : vector<1x1x128xf32> to vector<1x128xf32>
      %109 = vector.broadcast %108 : vector<1x128xf32> to vector<64x128xf32>
      %110 = arith.addf %106, %109 : vector<64x128xf32>
      %cst_53 = arith.constant 0.000000e+00 : f32
      %111 = vector.broadcast %cst_53 : f32 to vector<64x128xf32>
      %112 = arith.maximumf %110, %111 : vector<64x128xf32>
      %c2_54 = arith.constant 2 : index
      %c0_55 = arith.constant 0 : index
      %c0_56 = arith.constant 0 : index
      %113 = vector.load %arg4[%c2_54, %c0_55, %c0_56] : memref<3x128x128xf32, #tpu.memory_space<vmem>>, vector<1x128x128xf32>
      %114 = vector.shape_cast %113 : vector<1x128x128xf32> to vector<128x128xf32>
      %cst_57 = arith.constant dense<0.000000e+00> : vector<64x128xf32>
      %115 = tpu.matmul %112, %114, %cst_57 {dimension_numbers = #tpu.dot_dimension_numbers<[1], [0], [0], [1], [0, 0, 1, 1], [], []>} : vector<64x128xf32>, vector<128x128xf32>, vector<64x128xf32> -> vector<64x128xf32>
      %c2_58 = arith.constant 2 : index
      %c0_59 = arith.constant 0 : index
      %c0_60 = arith.constant 0 : index
      %116 = vector.load %arg5[%c2_58, %c0_59, %c0_60] : memref<3x3x128xf32, #tpu.memory_space<vmem>>, vector<1x1x128xf32>
      %117 = vector.shape_cast %116 : vector<1x1x128xf32> to vector<1x128xf32>
      %118 = vector.broadcast %117 : vector<1x128xf32> to vector<64x128xf32>
      %119 = arith.addf %115, %118 : vector<64x128xf32>
      %cst_61 = arith.constant dense<0.000000e+00> : vector<128xf32>
      %120 = vector.multi_reduction <add>, %119, %cst_61 [0] : vector<64x128xf32> to vector<128xf32>
      %121 = vector.shape_cast %120 : vector<128xf32> to vector<1x128xf32>
      %cst_62 = arith.constant 6.400000e+01 : f32
      %122 = vector.broadcast %cst_62 : f32 to vector<1x128xf32>
      %123 = arith.divf %121, %122 : vector<1x128xf32>
      %124 = vector.broadcast %123 : vector<1x128xf32> to vector<64x128xf32>
      %125 = arith.subf %119, %124 : vector<64x128xf32>
      %126 = arith.mulf %125, %125 : vector<64x128xf32>
      %cst_63 = arith.constant dense<0.000000e+00> : vector<128xf32>
      %127 = vector.multi_reduction <add>, %126, %cst_63 [0] : vector<64x128xf32> to vector<128xf32>
      %128 = vector.shape_cast %127 : vector<128xf32> to vector<1x128xf32>
      %cst_64 = arith.constant 6.400000e+01 : f32
      %129 = vector.broadcast %cst_64 : f32 to vector<1x128xf32>
      %130 = arith.divf %128, %129 : vector<1x128xf32>
      %c2_65 = arith.constant 2 : index
      %c1_66 = arith.constant 1 : index
      %c0_67 = arith.constant 0 : index
      %131 = vector.load %arg5[%c2_65, %c1_66, %c0_67] : memref<3x3x128xf32, #tpu.memory_space<vmem>>, vector<1x1x128xf32>
      %132 = vector.shape_cast %131 : vector<1x1x128xf32> to vector<1x128xf32>
      %cst_68 = arith.constant 9.99999974E-6 : f32
      %133 = vector.broadcast %cst_68 : f32 to vector<1x128xf32>
      %134 = arith.addf %130, %133 : vector<1x128xf32>
      %135 = math.rsqrt %134 : vector<1x128xf32>
      %136 = arith.mulf %132, %135 : vector<1x128xf32>
      %137 = vector.broadcast %136 : vector<1x128xf32> to vector<64x128xf32>
      %138 = arith.mulf %125, %137 : vector<64x128xf32>
      %c2_69 = arith.constant 2 : index
      %c2_70 = arith.constant 2 : index
      %c0_71 = arith.constant 0 : index
      %139 = vector.load %arg5[%c2_69, %c2_70, %c0_71] : memref<3x3x128xf32, #tpu.memory_space<vmem>>, vector<1x1x128xf32>
      %140 = vector.shape_cast %139 : vector<1x1x128xf32> to vector<1x128xf32>
      %141 = vector.broadcast %140 : vector<1x128xf32> to vector<64x128xf32>
      %142 = arith.addf %138, %141 : vector<64x128xf32>
      %cst_72 = arith.constant 0.000000e+00 : f32
      %143 = vector.broadcast %cst_72 : f32 to vector<64x128xf32>
      %144 = arith.maximumf %142, %143 : vector<64x128xf32>
      %c0_73 = arith.constant 0 : index
      %c0_74 = arith.constant 0 : index
      %145 = vector.load %arg6[%c0_73, %c0_74] : memref<64x128xf32, #tpu.memory_space<vmem>>, vector<64x128xf32>
      tpu.vector_store %arg6[%c0_73, %c0_74], %144 {strides = array<i32>} : memref<64x128xf32, #tpu.memory_space<vmem>>, vector<64x128xf32>,
    } else {
    }
    return
  }
  func.func @transform_0(%arg0: i32) -> (i32, i32) {
    %c0_i32 = arith.constant 0 : i32
    %c0_i32_0 = arith.constant 0 : i32
    return %arg0, %c0_i32 : i32, i32
  }
  func.func @transform_1(%arg0: i32) -> (i32, i32, i32) {
    %c0_i32 = arith.constant 0 : i32
    %c0_i32_0 = arith.constant 0 : i32
    %c0_i32_1 = arith.constant 0 : i32
    return %arg0, %c0_i32, %c0_i32_0 : i32, i32, i32
  }
  func.func @transform_2(%arg0: i32) -> (i32, i32) {
    %c0_i32 = arith.constant 0 : i32
    %c0_i32_0 = arith.constant 0 : i32
    %c0_i32_1 = arith.constant 0 : i32
    return %c0_i32, %c0_i32_0 : i32, i32
  }
  func.func @transform_3(%arg0: i32) -> (i32, i32, i32) {
    %c0_i32 = arith.constant 0 : i32
    %c0_i32_0 = arith.constant 0 : i32
    %c0_i32_1 = arith.constant 0 : i32
    %c0_i32_2 = arith.constant 0 : i32
    return %c0_i32, %c0_i32_0, %c0_i32_1 : i32, i32, i32
  }
  func.func @transform_4(%arg0: i32) -> (i32, i32, i32) {
    %c0_i32 = arith.constant 0 : i32
    %c0_i32_0 = arith.constant 0 : i32
    %c0_i32_1 = arith.constant 0 : i32
    %c0_i32_2 = arith.constant 0 : i32
    return %c0_i32, %c0_i32_0, %c0_i32_1 : i32, i32, i32
  }
  func.func @transform_5(%arg0: i32) -> (i32, i32) {
    %c0_i32 = arith.constant 0 : i32
    %c0_i32_0 = arith.constant 0 : i32
    %c0_i32_1 = arith.constant 0 : i32
    return %c0_i32, %c0_i32_0 : i32, i32
  }
}

module attributes {stable_mosaic.version = 11 : i64} {
  func.func @kernel(%arg0: i32, %arg1: memref<256x2xi32, #tpu.memory_space<vmem>>, %arg2: memref<1x1x256xi32, #tpu.memory_space<vmem>>, %arg3: memref<64x128xf32, #tpu.memory_space<vmem>>, %arg4: memref<3x128x128xf32, #tpu.memory_space<vmem>>, %arg5: memref<3x3x128xf32, #tpu.memory_space<vmem>>, %arg6: memref<64x128xf32, #tpu.memory_space<vmem>>, %arg7: memref<64x128xf32, #tpu.memory_space<vmem>>) attributes {dimension_semantics = [#tpu.dimension_semantics<arbitrary>], iteration_bounds = array<i64: 3>, scalar_prefetch = 0 : i64, scratch_operands = 1 : i64, tpu.core_type = #tpu.core_type<tc>, window_params = [{transform_indices = @transform_0, window_bounds = array<i64: 256, 2>}, {transform_indices = @transform_1, window_bounds = array<i64: 1, 1, 256>}, {pipeline_mode = #tpu.pipeline_mode<synchronous>, transform_indices = @transform_2, window_bounds = array<i64: 64, 128>}, {pipeline_mode = #tpu.pipeline_mode<synchronous>, transform_indices = @transform_3, window_bounds = array<i64: 3, 128, 128>}, {pipeline_mode = #tpu.pipeline_mode<synchronous>, transform_indices = @transform_4, window_bounds = array<i64: 3, 3, 128>}, {pipeline_mode = #tpu.pipeline_mode<synchronous>, transform_indices = @transform_5, window_bounds = array<i64: 64, 128>}]} {
    %c0_i32 = arith.constant 0 : i32
    %0 = arith.cmpi eq, %arg0, %c0_i32 : i32
    %1 = arith.extui %0 : i1 to i32
    %c0_i32_0 = arith.constant 0 : i32
    %2 = arith.cmpi ne, %1, %c0_i32_0 : i32
    scf.if %2 {
      %cst_14 = arith.constant 0.000000e+00 : f32
      %37 = vector.broadcast %cst_14 : f32 to vector<64x128xf32>
      %c0_15 = arith.constant 0 : index
      %c0_16 = arith.constant 0 : index
      %38 = vector.load %arg7[%c0_15, %c0_16] : memref<64x128xf32, #tpu.memory_space<vmem>>, vector<64x128xf32>
      tpu.vector_store %arg7[%c0_15, %c0_16], %37 {strides = array<i32>} : memref<64x128xf32, #tpu.memory_space<vmem>>, vector<64x128xf32>,
    } else {
    }
    %c0 = arith.constant 0 : index
    %c0_1 = arith.constant 0 : index
    %3 = vector.load %arg3[%c0, %c0_1] : memref<64x128xf32, #tpu.memory_space<vmem>>, vector<64x128xf32>
    %c0_2 = arith.constant 0 : index
    %c0_3 = arith.constant 0 : index
    %4 = vector.load %arg1[%c0_2, %c0_3] : memref<256x2xi32, #tpu.memory_space<vmem>>, vector<256x2xi32>
    %5 = vector.extract_strided_slice %4 {offsets = [0, 0], sizes = [256, 1], strides = [1, 1]} : vector<256x2xi32> to vector<256x1xi32>
    %6 = vector.extract_strided_slice %4 {offsets = [0, 1], sizes = [256, 1], strides = [1, 1]} : vector<256x2xi32> to vector<256x1xi32>
    %c0_4 = arith.constant 0 : index
    %c0_5 = arith.constant 0 : index
    %c0_6 = arith.constant 0 : index
    %7 = vector.load %arg2[%c0_4, %c0_5, %c0_6] : memref<1x1x256xi32, #tpu.memory_space<vmem>>, vector<1x1x256xi32>
    %8 = vector.shape_cast %7 : vector<1x1x256xi32> to vector<1x256xi32>
    %9 = tpu.iota {dimensions = array<i32: 1>} : vector<256x64xi32>
    %10 = vector.broadcast %5 : vector<256x1xi32> to vector<256x64xi32>
    %11 = arith.cmpi eq, %9, %10 : vector<256x64xi32>
    %12 = arith.extui %11 : vector<256x64xi1> to vector<256x64xi32>
    %13 = arith.sitofp %12 : vector<256x64xi32> to vector<256x64xf32>
    %14 = vector.broadcast %6 : vector<256x1xi32> to vector<256x64xi32>
    %15 = arith.cmpi eq, %9, %14 : vector<256x64xi32>
    %16 = arith.extui %15 : vector<256x64xi1> to vector<256x64xi32>
    %17 = arith.sitofp %16 : vector<256x64xi32> to vector<256x64xf32>
    %18 = arith.subf %13, %17 : vector<256x64xf32>
    %cst = arith.constant dense<0.000000e+00> : vector<256x128xf32>
    %19 = tpu.matmul %18, %3, %cst {dimension_numbers = #tpu.dot_dimension_numbers<[1], [0], [0], [1], [0, 0, 1, 1], [], []>} : vector<256x64xf32>, vector<64x128xf32>, vector<256x128xf32> -> vector<256x128xf32>
    %20 = tpu.iota {dimensions = array<i32: 1>} : vector<256x128xi32>
    %c8_i32 = arith.constant 8 : i32
    %21 = vector.broadcast %c8_i32 : i32 to vector<256x128xi32>
    %22 = arith.cmpi eq, %20, %21 : vector<256x128xi32>
    %cst_7 = arith.constant 1.000000e+00 : f32
    %23 = vector.broadcast %cst_7 : f32 to vector<256x128xf32>
    %24 = arith.select %22, %23, %19 : vector<256x128xi1>, vector<256x128xf32>
    %25 = tpu.iota {dimensions = array<i32: 0>} : vector<64x256xi32>
    %26 = vector.broadcast %8 : vector<1x256xi32> to vector<64x256xi32>
    %27 = arith.cmpi eq, %25, %26 : vector<64x256xi32>
    %28 = arith.extui %27 : vector<64x256xi1> to vector<64x256xi32>
    %29 = arith.sitofp %28 : vector<64x256xi32> to vector<64x256xf32>
    %c0_8 = arith.constant 0 : index
    %c0_9 = arith.constant 0 : index
    %30 = vector.load %arg7[%c0_8, %c0_9] : memref<64x128xf32, #tpu.memory_space<vmem>>, vector<64x128xf32>
    %cst_10 = arith.constant dense<0.000000e+00> : vector<64x128xf32>
    %31 = tpu.matmul %29, %24, %cst_10 {dimension_numbers = #tpu.dot_dimension_numbers<[1], [0], [0], [1], [0, 0, 1, 1], [], []>} : vector<64x256xf32>, vector<256x128xf32>, vector<64x128xf32> -> vector<64x128xf32>
    %32 = arith.addf %30, %31 : vector<64x128xf32>
    %c0_11 = arith.constant 0 : index
    %c0_12 = arith.constant 0 : index
    %33 = vector.load %arg7[%c0_11, %c0_12] : memref<64x128xf32, #tpu.memory_space<vmem>>, vector<64x128xf32>
    tpu.vector_store %arg7[%c0_11, %c0_12], %32 {strides = array<i32>} : memref<64x128xf32, #tpu.memory_space<vmem>>, vector<64x128xf32>,
    %c2_i32 = arith.constant 2 : i32
    %34 = arith.cmpi eq, %arg0, %c2_i32 : i32
    %35 = arith.extui %34 : i1 to i32
    %c0_i32_13 = arith.constant 0 : i32
    %36 = arith.cmpi ne, %35, %c0_i32_13 : i32
    scf.if %36 {
      %c0_14 = arith.constant 0 : index
      %c0_15 = arith.constant 0 : index
      %37 = vector.load %arg7[%c0_14, %c0_15] : memref<64x128xf32, #tpu.memory_space<vmem>>, vector<64x128xf32>
      %38 = vector.extract_strided_slice %37 {offsets = [0, 8], sizes = [64, 1], strides = [1, 1]} : vector<64x128xf32> to vector<64x1xf32>
      %cst_16 = arith.constant 1.000000e+00 : f32
      %39 = vector.broadcast %cst_16 : f32 to vector<64x1xf32>
      %40 = arith.maximumf %38, %39 : vector<64x1xf32>
      %cst_17 = arith.constant 1.000000e+00 : f32
      %41 = vector.broadcast %cst_17 : f32 to vector<64x1xf32>
      %42 = arith.divf %41, %40 : vector<64x1xf32>
      %43 = vector.broadcast %42 : vector<64x1xf32> to vector<64x128xf32>
      %44 = arith.mulf %37, %43 : vector<64x128xf32>
      %45 = tpu.iota {dimensions = array<i32: 1>} : vector<64x128xi32>
      %c4_i32 = arith.constant 4 : i32
      %46 = vector.broadcast %c4_i32 : i32 to vector<64x128xi32>
      %47 = arith.cmpi slt, %45, %46 : vector<64x128xi32>
      %48 = arith.select %47, %3, %44 : vector<64x128xi1>, vector<64x128xf32>
      %c0_18 = arith.constant 0 : index
      %c0_19 = arith.constant 0 : index
      %c0_20 = arith.constant 0 : index
      %49 = vector.load %arg4[%c0_18, %c0_19, %c0_20] : memref<3x128x128xf32, #tpu.memory_space<vmem>>, vector<1x128x128xf32>
      %50 = vector.shape_cast %49 : vector<1x128x128xf32> to vector<128x128xf32>
      %cst_21 = arith.constant dense<0.000000e+00> : vector<64x128xf32>
      %51 = tpu.matmul %48, %50, %cst_21 {dimension_numbers = #tpu.dot_dimension_numbers<[1], [0], [0], [1], [0, 0, 1, 1], [], []>} : vector<64x128xf32>, vector<128x128xf32>, vector<64x128xf32> -> vector<64x128xf32>
      %c0_22 = arith.constant 0 : index
      %c0_23 = arith.constant 0 : index
      %c0_24 = arith.constant 0 : index
      %52 = vector.load %arg5[%c0_22, %c0_23, %c0_24] : memref<3x3x128xf32, #tpu.memory_space<vmem>>, vector<1x1x128xf32>
      %53 = vector.shape_cast %52 : vector<1x1x128xf32> to vector<1x128xf32>
      %54 = vector.broadcast %53 : vector<1x128xf32> to vector<64x128xf32>
      %55 = arith.addf %51, %54 : vector<64x128xf32>
      %cst_25 = arith.constant dense<0.000000e+00> : vector<128xf32>
      %56 = vector.multi_reduction <add>, %55, %cst_25 [0] : vector<64x128xf32> to vector<128xf32>
      %57 = vector.shape_cast %56 : vector<128xf32> to vector<1x128xf32>
      %cst_26 = arith.constant 6.400000e+01 : f32
      %58 = vector.broadcast %cst_26 : f32 to vector<1x128xf32>
      %59 = arith.divf %57, %58 : vector<1x128xf32>
      %60 = vector.broadcast %59 : vector<1x128xf32> to vector<64x128xf32>
      %61 = arith.subf %55, %60 : vector<64x128xf32>
      %62 = arith.mulf %61, %61 : vector<64x128xf32>
      %cst_27 = arith.constant dense<0.000000e+00> : vector<128xf32>
      %63 = vector.multi_reduction <add>, %62, %cst_27 [0] : vector<64x128xf32> to vector<128xf32>
      %64 = vector.shape_cast %63 : vector<128xf32> to vector<1x128xf32>
      %cst_28 = arith.constant 6.400000e+01 : f32
      %65 = vector.broadcast %cst_28 : f32 to vector<1x128xf32>
      %66 = arith.divf %64, %65 : vector<1x128xf32>
      %c0_29 = arith.constant 0 : index
      %c1 = arith.constant 1 : index
      %c0_30 = arith.constant 0 : index
      %67 = vector.load %arg5[%c0_29, %c1, %c0_30] : memref<3x3x128xf32, #tpu.memory_space<vmem>>, vector<1x1x128xf32>
      %68 = vector.shape_cast %67 : vector<1x1x128xf32> to vector<1x128xf32>
      %cst_31 = arith.constant 9.99999974E-6 : f32
      %69 = vector.broadcast %cst_31 : f32 to vector<1x128xf32>
      %70 = arith.addf %66, %69 : vector<1x128xf32>
      %71 = math.rsqrt %70 : vector<1x128xf32>
      %72 = arith.mulf %68, %71 : vector<1x128xf32>
      %73 = vector.broadcast %72 : vector<1x128xf32> to vector<64x128xf32>
      %74 = arith.mulf %61, %73 : vector<64x128xf32>
      %c0_32 = arith.constant 0 : index
      %c2 = arith.constant 2 : index
      %c0_33 = arith.constant 0 : index
      %75 = vector.load %arg5[%c0_32, %c2, %c0_33] : memref<3x3x128xf32, #tpu.memory_space<vmem>>, vector<1x1x128xf32>
      %76 = vector.shape_cast %75 : vector<1x1x128xf32> to vector<1x128xf32>
      %77 = vector.broadcast %76 : vector<1x128xf32> to vector<64x128xf32>
      %78 = arith.addf %74, %77 : vector<64x128xf32>
      %cst_34 = arith.constant 0.000000e+00 : f32
      %79 = vector.broadcast %cst_34 : f32 to vector<64x128xf32>
      %80 = arith.maximumf %78, %79 : vector<64x128xf32>
      %c1_35 = arith.constant 1 : index
      %c0_36 = arith.constant 0 : index
      %c0_37 = arith.constant 0 : index
      %81 = vector.load %arg4[%c1_35, %c0_36, %c0_37] : memref<3x128x128xf32, #tpu.memory_space<vmem>>, vector<1x128x128xf32>
      %82 = vector.shape_cast %81 : vector<1x128x128xf32> to vector<128x128xf32>
      %cst_38 = arith.constant dense<0.000000e+00> : vector<64x128xf32>
      %83 = tpu.matmul %80, %82, %cst_38 {dimension_numbers = #tpu.dot_dimension_numbers<[1], [0], [0], [1], [0, 0, 1, 1], [], []>} : vector<64x128xf32>, vector<128x128xf32>, vector<64x128xf32> -> vector<64x128xf32>
      %c1_39 = arith.constant 1 : index
      %c0_40 = arith.constant 0 : index
      %c0_41 = arith.constant 0 : index
      %84 = vector.load %arg5[%c1_39, %c0_40, %c0_41] : memref<3x3x128xf32, #tpu.memory_space<vmem>>, vector<1x1x128xf32>
      %85 = vector.shape_cast %84 : vector<1x1x128xf32> to vector<1x128xf32>
      %86 = vector.broadcast %85 : vector<1x128xf32> to vector<64x128xf32>
      %87 = arith.addf %83, %86 : vector<64x128xf32>
      %cst_42 = arith.constant dense<0.000000e+00> : vector<128xf32>
      %88 = vector.multi_reduction <add>, %87, %cst_42 [0] : vector<64x128xf32> to vector<128xf32>
      %89 = vector.shape_cast %88 : vector<128xf32> to vector<1x128xf32>
      %cst_43 = arith.constant 6.400000e+01 : f32
      %90 = vector.broadcast %cst_43 : f32 to vector<1x128xf32>
      %91 = arith.divf %89, %90 : vector<1x128xf32>
      %92 = vector.broadcast %91 : vector<1x128xf32> to vector<64x128xf32>
      %93 = arith.subf %87, %92 : vector<64x128xf32>
      %94 = arith.mulf %93, %93 : vector<64x128xf32>
      %cst_44 = arith.constant dense<0.000000e+00> : vector<128xf32>
      %95 = vector.multi_reduction <add>, %94, %cst_44 [0] : vector<64x128xf32> to vector<128xf32>
      %96 = vector.shape_cast %95 : vector<128xf32> to vector<1x128xf32>
      %cst_45 = arith.constant 6.400000e+01 : f32
      %97 = vector.broadcast %cst_45 : f32 to vector<1x128xf32>
      %98 = arith.divf %96, %97 : vector<1x128xf32>
      %c1_46 = arith.constant 1 : index
      %c1_47 = arith.constant 1 : index
      %c0_48 = arith.constant 0 : index
      %99 = vector.load %arg5[%c1_46, %c1_47, %c0_48] : memref<3x3x128xf32, #tpu.memory_space<vmem>>, vector<1x1x128xf32>
      %100 = vector.shape_cast %99 : vector<1x1x128xf32> to vector<1x128xf32>
      %cst_49 = arith.constant 9.99999974E-6 : f32
      %101 = vector.broadcast %cst_49 : f32 to vector<1x128xf32>
      %102 = arith.addf %98, %101 : vector<1x128xf32>
      %103 = math.rsqrt %102 : vector<1x128xf32>
      %104 = arith.mulf %100, %103 : vector<1x128xf32>
      %105 = vector.broadcast %104 : vector<1x128xf32> to vector<64x128xf32>
      %106 = arith.mulf %93, %105 : vector<64x128xf32>
      %c1_50 = arith.constant 1 : index
      %c2_51 = arith.constant 2 : index
      %c0_52 = arith.constant 0 : index
      %107 = vector.load %arg5[%c1_50, %c2_51, %c0_52] : memref<3x3x128xf32, #tpu.memory_space<vmem>>, vector<1x1x128xf32>
      %108 = vector.shape_cast %107 : vector<1x1x128xf32> to vector<1x128xf32>
      %109 = vector.broadcast %108 : vector<1x128xf32> to vector<64x128xf32>
      %110 = arith.addf %106, %109 : vector<64x128xf32>
      %cst_53 = arith.constant 0.000000e+00 : f32
      %111 = vector.broadcast %cst_53 : f32 to vector<64x128xf32>
      %112 = arith.maximumf %110, %111 : vector<64x128xf32>
      %c2_54 = arith.constant 2 : index
      %c0_55 = arith.constant 0 : index
      %c0_56 = arith.constant 0 : index
      %113 = vector.load %arg4[%c2_54, %c0_55, %c0_56] : memref<3x128x128xf32, #tpu.memory_space<vmem>>, vector<1x128x128xf32>
      %114 = vector.shape_cast %113 : vector<1x128x128xf32> to vector<128x128xf32>
      %cst_57 = arith.constant dense<0.000000e+00> : vector<64x128xf32>
      %115 = tpu.matmul %112, %114, %cst_57 {dimension_numbers = #tpu.dot_dimension_numbers<[1], [0], [0], [1], [0, 0, 1, 1], [], []>} : vector<64x128xf32>, vector<128x128xf32>, vector<64x128xf32> -> vector<64x128xf32>
      %c2_58 = arith.constant 2 : index
      %c0_59 = arith.constant 0 : index
      %c0_60 = arith.constant 0 : index
      %116 = vector.load %arg5[%c2_58, %c0_59, %c0_60] : memref<3x3x128xf32, #tpu.memory_space<vmem>>, vector<1x1x128xf32>
      %117 = vector.shape_cast %116 : vector<1x1x128xf32> to vector<1x128xf32>
      %118 = vector.broadcast %117 : vector<1x128xf32> to vector<64x128xf32>
      %119 = arith.addf %115, %118 : vector<64x128xf32>
      %cst_61 = arith.constant dense<0.000000e+00> : vector<128xf32>
      %120 = vector.multi_reduction <add>, %119, %cst_61 [0] : vector<64x128xf32> to vector<128xf32>
      %121 = vector.shape_cast %120 : vector<128xf32> to vector<1x128xf32>
      %cst_62 = arith.constant 6.400000e+01 : f32
      %122 = vector.broadcast %cst_62 : f32 to vector<1x128xf32>
      %123 = arith.divf %121, %122 : vector<1x128xf32>
      %124 = vector.broadcast %123 : vector<1x128xf32> to vector<64x128xf32>
      %125 = arith.subf %119, %124 : vector<64x128xf32>
      %126 = arith.mulf %125, %125 : vector<64x128xf32>
      %cst_63 = arith.constant dense<0.000000e+00> : vector<128xf32>
      %127 = vector.multi_reduction <add>, %126, %cst_63 [0] : vector<64x128xf32> to vector<128xf32>
      %128 = vector.shape_cast %127 : vector<128xf32> to vector<1x128xf32>
      %cst_64 = arith.constant 6.400000e+01 : f32
      %129 = vector.broadcast %cst_64 : f32 to vector<1x128xf32>
      %130 = arith.divf %128, %129 : vector<1x128xf32>
      %c2_65 = arith.constant 2 : index
      %c1_66 = arith.constant 1 : index
      %c0_67 = arith.constant 0 : index
      %131 = vector.load %arg5[%c2_65, %c1_66, %c0_67] : memref<3x3x128xf32, #tpu.memory_space<vmem>>, vector<1x1x128xf32>
      %132 = vector.shape_cast %131 : vector<1x1x128xf32> to vector<1x128xf32>
      %cst_68 = arith.constant 9.99999974E-6 : f32
      %133 = vector.broadcast %cst_68 : f32 to vector<1x128xf32>
      %134 = arith.addf %130, %133 : vector<1x128xf32>
      %135 = math.rsqrt %134 : vector<1x128xf32>
      %136 = arith.mulf %132, %135 : vector<1x128xf32>
      %137 = vector.broadcast %136 : vector<1x128xf32> to vector<64x128xf32>
      %138 = arith.mulf %125, %137 : vector<64x128xf32>
      %c2_69 = arith.constant 2 : index
      %c2_70 = arith.constant 2 : index
      %c0_71 = arith.constant 0 : index
      %139 = vector.load %arg5[%c2_69, %c2_70, %c0_71] : memref<3x3x128xf32, #tpu.memory_space<vmem>>, vector<1x1x128xf32>
      %140 = vector.shape_cast %139 : vector<1x1x128xf32> to vector<1x128xf32>
      %141 = vector.broadcast %140 : vector<1x128xf32> to vector<64x128xf32>
      %142 = arith.addf %138, %141 : vector<64x128xf32>
      %cst_72 = arith.constant 0.000000e+00 : f32
      %143 = vector.broadcast %cst_72 : f32 to vector<64x128xf32>
      %144 = arith.maximumf %142, %143 : vector<64x128xf32>
      %c0_73 = arith.constant 0 : index
      %c0_74 = arith.constant 0 : index
      %145 = vector.load %arg6[%c0_73, %c0_74] : memref<64x128xf32, #tpu.memory_space<vmem>>, vector<64x128xf32>
      tpu.vector_store %arg6[%c0_73, %c0_74], %144 {strides = array<i32>} : memref<64x128xf32, #tpu.memory_space<vmem>>, vector<64x128xf32>,
    } else {
    }
    return
  }
  func.func @transform_0(%arg0: i32) -> (i32, i32) {
    %c0_i32 = arith.constant 0 : i32
    %c0_i32_0 = arith.constant 0 : i32
    return %arg0, %c0_i32 : i32, i32
  }
  func.func @transform_1(%arg0: i32) -> (i32, i32, i32) {
    %c0_i32 = arith.constant 0 : i32
    %c0_i32_0 = arith.constant 0 : i32
    %c0_i32_1 = arith.constant 0 : i32
    return %arg0, %c0_i32, %c0_i32_0 : i32, i32, i32
  }
  func.func @transform_2(%arg0: i32) -> (i32, i32) {
    %c0_i32 = arith.constant 0 : i32
    %c0_i32_0 = arith.constant 0 : i32
    %c0_i32_1 = arith.constant 0 : i32
    return %c0_i32, %c0_i32_0 : i32, i32
  }
  func.func @transform_3(%arg0: i32) -> (i32, i32, i32) {
    %c0_i32 = arith.constant 0 : i32
    %c0_i32_0 = arith.constant 0 : i32
    %c0_i32_1 = arith.constant 0 : i32
    %c0_i32_2 = arith.constant 0 : i32
    return %c0_i32, %c0_i32_0, %c0_i32_1 : i32, i32, i32
  }
  func.func @transform_4(%arg0: i32) -> (i32, i32, i32) {
    %c0_i32 = arith.constant 0 : i32
    %c0_i32_0 = arith.constant 0 : i32
    %c0_i32_1 = arith.constant 0 : i32
    %c0_i32_2 = arith.constant 0 : i32
    return %c0_i32, %c0_i32_0, %c0_i32_1 : i32, i32, i32
  }
  func.func @transform_5(%arg0: i32) -> (i32, i32) {
    %c0_i32 = arith.constant 0 : i32
    %c0_i32_0 = arith.constant 0 : i32
    %c0_i32_1 = arith.constant 0 : i32
    return %c0_i32, %c0_i32_0 : i32, i32
  }
}

</mosaic_0001>

<bundles_post_ra>
// kernel: tpu_custom_call.1
= control target key start
LH: loop header
LB: loop body
LE: loop exit
PB: predicated region body
PF: predicated region fallthrough
CT: control target
= control target key end

     0   :  { %10 = vsyncpa [#allocation4], 0  ;;  %s2875_s18 = smov 0   ;;  %s3598_s0 = inlined_call_operand.vmem [shape: s32[768,2], index: 0, kind: input, shape index: {}]   ;;  %s3599_s1 = inlined_call_operand.vmem [shape: s32[3,1,256], index: 1, kind: input, shape index: {}]   ;;  %s3600_s2 = inlined_call_operand.vmem [shape: f32[64,128], index: 2, kind: input, shape index: {}]   ;;  %s3601_s3 = inlined_call_operand.vmem [shape: f32[3,128,128], index: 3, kind: input, shape index: {}]   ;;  %s3602_s4 = inlined_call_operand.vmem [shape: f32[3,3,128], index: 4, kind: input, shape index: {}]   ;;  %s3603_s5 = inlined_call_operand.hbm [shape: f32[64,128], index: 5, kind: output, shape index: {}]  }
   0x1 LB: > { %s2881_s19 = sadd.s32 4294967295, %s2834_s18   ;;  %p2040_p0 = scmp.ge.s32.totalorder %s2834_s18, 1  ;;  %s2834_s18 = sphi %s2875_s18, %s16_s18  }
   0x2   : > { %p193_p1 = scmp.lt.s32.totalorder %s2834_s18, 4 }
   0x4   : > { %p194_p2 = pnand %p2040_p0, %p193_p1 }
   0x5   : > { %s2041_s20 = sshll.u32 (!%p194_p2), %s2881_s19, 5  ;;  %p226_p3 = scmp.lt.s32.totalorder (!%p194_p2), %s2881_s19, 2 }
   0x6   : > { %197 = sbr.rel (%p194_p2) target bundleno = 1820 (0x71c), region = 40  ;;  %p221_p4 = scmp.lt.s32.totalorder (!%p194_p2), %s2041_s20, 95 }
   0x7   : > { %p2044_p5 = scmp.ne.s32.totalorder (!%p194_p2), %s2881_s19, 0 }
   0xd   : > { %s227_s21 = scalar_select %p226_p3, %s2881_s19, 2 }
   0xe   : > { %s3605_s20 = smov (!%p221_p4, %s2041_s20), 95  ;;  %233 = sbr.rel (%p2044_p5) target bundleno = 21 (0x15), region = 44 }
   0xf   : > { %s2043_s22 = sshll.u32 %s227_s21, 1  ;;  %s2042_s23 = sshll.u32 %s3605_s20, 3  ;;  %v2836_v0 = vmov (!%p2044_p5), 0.0  }
  0x10   : > { %s2891_s26 = scalar_lea.vmem %s3599_s1, %s2043_s22  ;;  %s2896_s29 = scalar_lea.vmem %s3598_s0, %s2042_s23  ;;  %234 = vst [vmem:[#allocation2] sm:$0xff] (!%p2044_p5), %v2836_v0  ;;  %235 = vst [vmem:[#allocation2 + $0x8] sm:$0xff] (!%p2044_p5), %v2836_v0 }
  0x11   : > { %236 = vst [vmem:[#allocation2 + $0x10] sm:$0xff] (!%p2044_p5), %v2836_v0  ;;  %237 = vst [vmem:[#allocation2 + $0x18] sm:$0xff] (!%p2044_p5), %v2836_v0 }
  0x12   : > { %238 = vst [vmem:[#allocation2 + $0x20] sm:$0xff] (!%p2044_p5), %v2836_v0  ;;  %239 = vst [vmem:[#allocation2 + $0x28] sm:$0xff] (!%p2044_p5), %v2836_v0 }
  0x13   : > { %240 = vst [vmem:[#allocation2 + $0x30] sm:$0xff] (!%p2044_p5), %v2836_v0  ;;  %241 = vst [vmem:[#allocation2 + $0x38] sm:$0xff] (!%p2044_p5), %v2836_v0 }
  0x15 PF: > { %v251_v1 = vld [vmem:[%s2896_s29 + $0x8] sm:$0xff]  ;;  %v250_v2 = vld [vmem:[%s2896_s29] sm:$0xff]  ;;  %v2837_v3 = vmov 0   ;;  %v2838_v4 = vmov 1   ;;  %v252_v5 = vld [vmem:[%s2896_s29 + $0x10] sm:$0xff]  ;;  %v283_v47 = vlaneseq  ;;  %vm701_vm4 = vcmask 523264  }
  0x16   : > { %2771 = vset.pattern.permute.xlu1 %v2837_v3  ;;  %2769 = vset.pattern.permute.xlu0 %v2837_v3  ;;  %v2905_v6 = vld [vmem:[%s3600_s2] sm:$0xff]  ;;  %v2910_v7 = vld [vmem:[%s3600_s2 + $0x8] sm:$0xff]  ;;  %v2917_v9 = vld [vmem:[%s3600_s2 + $0x10] sm:$0xff]  ;;  %v2839_v53 = vmov 0.0   ;;  %p2173_p6 = scmp.ne.s32.totalorder %s2881_s19, 2 }
  0x17   : > { %289 = vperm.xlu1 %2771, %v251_v1   ;;  %286 = vperm.xlu0 %2769, %v250_v2   ;;  %v2586_v8 = vpack.c.bf16 %v2910_v7, %v2905_v6  ;;  %v2922_v10 = vld [vmem:[%s3600_s2 + $0x18] sm:$0xff]  ;;  %v2930_v13 = vld [vmem:[%s3600_s2 + $0x20] sm:$0xff]  ;;  %v2935_v14 = vld [vmem:[%s3600_s2 + $0x28] sm:$0xff]  ;;  %v2980_v48 = vand.u32 127, %v283_v47 }
  0x18   : > { %v253_v11 = vld [vmem:[%s2896_s29 + $0x18] sm:$0xff]  ;;  %v2590_v12 = vpack.c.bf16 %v2922_v10, %v2917_v9  ;;  %v2594_v15 = vpack.c.bf16 %v2935_v14, %v2930_v13  ;;  %v254_v16 = vld [vmem:[%s2896_s29 + $0x20] sm:$0xff]  ;;  %v2943_v17 = vld [vmem:[%s3600_s2 + $0x30] sm:$0xff] }
  0x19   : > { %2587 = vmatprep.subr.bf16.mxu0 %v2586_v8  ;;  %v2948_v18 = vld [vmem:[%s3600_s2 + $0x38] sm:$0xff]  ;;  %v255_v20 = vld [vmem:[%s2896_s29 + $0x28] sm:$0xff]  ;;  %v256_v21 = vld [vmem:[%s2896_s29 + $0x30] sm:$0xff] }
  0x1a   : > { %2589 = vmatpush3.bf16.msra.mxu0 %v2586_v8  ;;  %v2598_v19 = vpack.c.bf16 %v2948_v18, %v2943_v17  ;;  %v257_v22 = vld [vmem:[%s2896_s29 + $0x38] sm:$0xff]  ;;  %v258_v23 = vld [vmem:[%s2896_s29 + $0x40] sm:$0xff]  ;;  %v259_v24 = vld [vmem:[%s2896_s29 + $0x48] sm:$0xff] }
  0x1b   : > { %2772 = vset.pattern.permute.xlu1 %v2838_v4  ;;  %2770 = vset.pattern.permute.xlu0 %v2838_v4  ;;  %v260_v25 = vld [vmem:[%s2896_s29 + $0x50] sm:$0xff]  ;;  %v261_v26 = vld [vmem:[%s2896_s29 + $0x58] sm:$0xff]  ;;  %v262_v27 = vld [vmem:[%s2896_s29 + $0x60] sm:$0xff] }
  0x1c   : > { %481 = vperm.xlu1 %2772, %v251_v1   ;;  %478 = vperm.xlu0 %2770, %v250_v2   ;;  %v263_v28 = vld [vmem:[%s2896_s29 + $0x68] sm:$0xff]  ;;  %v264_v29 = vld [vmem:[%s2896_s29 + $0x70] sm:$0xff]  ;;  %v265_v30 = vld [vmem:[%s2896_s29 + $0x78] sm:$0xff] }
  0x1d   : > { %2591 = vmatprep.subr.bf16.mxu0 %v2590_v12  ;;  %v266_v31 = vld [vmem:[%s2896_s29 + $0x80] sm:$0xff]  ;;  %v267_v32 = vld [vmem:[%s2896_s29 + $0x88] sm:$0xff]  ;;  %v268_v33 = vld [vmem:[%s2896_s29 + $0x90] sm:$0xff] }
  0x1e   : > { %2593 = vmatpush3.bf16.msra.mxu0 %v2590_v12  ;;  %v269_v34 = vld [vmem:[%s2896_s29 + $0x98] sm:$0xff]  ;;  %v270_v35 = vld [vmem:[%s2896_s29 + $0xa0] sm:$0xff]  ;;  %v271_v36 = vld [vmem:[%s2896_s29 + $0xa8] sm:$0xff] }
  0x1f   : > { %2595 = vmatprep.subr.bf16.mxu0 %v2594_v15  ;;  %v272_v37 = vld [vmem:[%s2896_s29 + $0xb0] sm:$0xff]  ;;  %v273_v38 = vld [vmem:[%s2896_s29 + $0xb8] sm:$0xff]  ;;  %v274_v39 = vld [vmem:[%s2896_s29 + $0xc0] sm:$0xff] }
  0x20   : > { %2773 = vset.pattern.permute.xlu1 %v2837_v3  ;;  %484 = vperm.xlu0 %2770, %v252_v5   ;;  %v275_v40 = vld [vmem:[%s2896_s29 + $0xc8] sm:$0xff]  ;;  %v276_v41 = vld [vmem:[%s2896_s29 + $0xd0] sm:$0xff]  ;;  %v277_v42 = vld [vmem:[%s2896_s29 + $0xd8] sm:$0xff] }
  0x21   : > { %292 = vperm.xlu1 %2773, %v252_v5   ;;  %v278_v43 = vld [vmem:[%s2896_s29 + $0xe0] sm:$0xff]  ;;  %v279_v44 = vld [vmem:[%s2896_s29 + $0xe8] sm:$0xff]  ;;  %v280_v45 = vld [vmem:[%s2896_s29 + $0xf0] sm:$0xff] }
  0x22   : > { %2597 = vmatpush3.bf16.msra.mxu0 %v2594_v15  ;;  %v281_v46 = vld [vmem:[%s2896_s29 + $0xf8] sm:$0xff] }
  0x23   : > { %2599 = vmatprep.subr.bf16.mxu0 %v2598_v19 }
  0x24   : > { %487 = vperm.xlu0 %2770, %v253_v11  }
  0x25   : > { %295 = vperm.xlu1 %2773, %v253_v11  }
  0x26   : > { %2601 = vmatpush3.bf16.msra.mxu0 %v2598_v19 }
  0x28   : > { %490 = vperm.xlu0 %2770, %v254_v16  }
  0x29   : > { %298 = vperm.xlu1 %2773, %v254_v16  }
  0x2c   : > { %493 = vperm.xlu0 %2770, %v255_v20  }
  0x2d   : > { %301 = vperm.xlu1 %2773, %v255_v20  }
  0x30   : > { %496 = vperm.xlu0 %2770, %v256_v21  }
  0x31   : > { %304 = vperm.xlu1 %2773, %v256_v21  }
  0x34   : > { %499 = vperm.xlu0 %2770, %v257_v22  }
  0x35   : > { %307 = vperm.xlu1 %2773, %v257_v22  }
  0x38   : > { %502 = vperm.xlu0 %2770, %v258_v23  }
  0x39   : > { %310 = vperm.xlu1 %2773, %v258_v23  }
  0x3c   : > { %505 = vperm.xlu0 %2770, %v259_v24  }
  0x3d   : > { %313 = vperm.xlu1 %2773, %v259_v24  }
  0x40   : > { %508 = vperm.xlu0 %2770, %v260_v25  }
  0x41   : > { %316 = vperm.xlu1 %2773, %v260_v25  }
  0x44   : > { %511 = vperm.xlu0 %2770, %v261_v26  }
  0x45   : > { %319 = vperm.xlu1 %2773, %v261_v26  }
  0x48   : > { %514 = vperm.xlu0 %2770, %v262_v27  }
  0x49   : > { %322 = vperm.xlu1 %2773, %v262_v27  }
  0x4c   : > { %517 = vperm.xlu0 %2770, %v263_v28  }
  0x4d   : > { %325 = vperm.xlu1 %2773, %v263_v28  }
  0x50   : > { %520 = vperm.xlu0 %2770, %v264_v29  }
  0x51   : > { %328 = vperm.xlu1 %2773, %v264_v29  }
  0x54   : > { %523 = vperm.xlu0 %2770, %v265_v30  }
  0x55   : > { %331 = vperm.xlu1 %2773, %v265_v30  }
  0x58   : > { %526 = vperm.xlu0 %2770, %v266_v31  }
  0x59   : > { %334 = vperm.xlu1 %2773, %v266_v31  }
  0x5c   : > { %529 = vperm.xlu0 %2770, %v267_v32  }
  0x5d   : > { %337 = vperm.xlu1 %2773, %v267_v32  }
  0x60   : > { %532 = vperm.xlu0 %2770, %v268_v33  }
  0x61   : > { %340 = vperm.xlu1 %2773, %v268_v33  }
  0x64   : > { %535 = vperm.xlu0 %2770, %v269_v34  }
  0x65   : > { %343 = vperm.xlu1 %2773, %v269_v34  }
  0x68   : > { %538 = vperm.xlu0 %2770, %v270_v35  }
  0x69   : > { %346 = vperm.xlu1 %2773, %v270_v35  }
  0x6c   : > { %541 = vperm.xlu0 %2770, %v271_v36  }
  0x6d   : > { %349 = vperm.xlu1 %2773, %v271_v36  }
  0x70   : > { %544 = vperm.xlu0 %2770, %v272_v37  }
  0x71   : > { %352 = vperm.xlu1 %2773, %v272_v37  }
  0x74   : > { %547 = vperm.xlu0 %2770, %v273_v38  }
  0x75   : > { %355 = vperm.xlu1 %2773, %v273_v38  }
  0x78   : > { %550 = vperm.xlu0 %2770, %v274_v39  }
  0x79   : > { %358 = vperm.xlu1 %2773, %v274_v39  }
  0x7c   : > { %553 = vperm.xlu0 %2770, %v275_v40  }
  0x7d   : > { %361 = vperm.xlu1 %2773, %v275_v40  }
  0x80   : > { %556 = vperm.xlu0 %2770, %v276_v41  }
  0x81   : > { %364 = vperm.xlu1 %2773, %v276_v41  }
  0x84   : > { %559 = vperm.xlu0 %2770, %v277_v42  }
  0x85   : > { %367 = vperm.xlu1 %2773, %v277_v42  }
  0x88   : > { %562 = vperm.xlu0 %2770, %v278_v43  }
  0x89   : > { %370 = vperm.xlu1 %2773, %v278_v43  }
  0x8c   : > { %565 = vperm.xlu0 %2770, %v279_v44  }
  0x8d   : > { %373 = vperm.xlu1 %2773, %v279_v44  }
  0x90   : > { %568 = vperm.xlu0 %2770, %v280_v45  }
  0x91   : > { %376 = vperm.xlu1 %2773, %v280_v45  }
  0x94   : > { %571 = vperm.xlu0 %2770, %v281_v46  }
  0x95   : > { %379 = vperm.xlu1 %2773, %v281_v46  }
  0x96   : > { %v290_v49 = vpop.permute.xlu1 %289  ;;  %v287_v50 = vpop.permute.xlu0 %286 }
  0x97   : > { %vm382_vm0 = vcmp.eq.s32.totalorder %v2980_v48, %v290_v49  ;;  %vm381_vm1 = vcmp.eq.s32.totalorder %v2980_v48, %v287_v50 }
  0x98   : > { %v2046_v54 = vsel %vm382_vm0, 1.0, %v2839_v53  ;;  %v2045_v55 = vsel %vm381_vm1, 1.0, %v2839_v53 }
  0x9b   : > { %v482_v51 = vpop.permute.xlu1 %481  ;;  %v479_v52 = vpop.permute.xlu0 %478 }
  0x9c   : > { %vm574_vm2 = vcmp.eq.s32.totalorder %v2980_v48, %v482_v51  ;;  %vm573_vm3 = vcmp.eq.s32.totalorder %v2980_v48, %v479_v52 }
  0x9d   : > { %v2078_v56 = vsel %vm574_vm2, 1.0, %v2839_v53  ;;  %v2077_v57 = vsel %vm573_vm3, 1.0, %v2839_v53 }
  0x9e   : > { %v670_v58 = vsub.f32 %v2046_v54, %v2078_v56  ;;  %v669_v59 = vsub.f32 %v2045_v55, %v2077_v57 }
  0x9f   : > { %v485_v60 = vpop.permute.xlu0 %484 }
  0xa0   : > { %vm575_vm5 = vcmp.eq.s32.totalorder %v2980_v48, %v485_v60  ;;  %v293_v61 = vpop.permute.xlu1 %292  ;;  %2406 = vmatprep.mubr.msk.f32.mxu0 %vm701_vm4, %v669_v59 }
  0xa1   : > { %v2079_v62 = vsel %vm575_vm5, 1.0, %v2839_v53  ;;  %vm383_vm6 = vcmp.eq.s32.totalorder %v2980_v48, %v293_v61  ;;  %2407 = vmatmul.mubr.msk.f32.vlgmr.msra.gmra.mrb[0].mxu0 %vm701_vm4, %v670_v58 }
  0xa2   : > { %v2047_v63 = vsel %vm383_vm6, 1.0, %v2839_v53 }
  0xa3   : > { %v671_v0 = vsub.f32 %v2047_v63, %v2079_v62  ;;  %v488_v1 = vpop.permute.xlu0 %487 }
  0xa4   : > { %vm576_vm7 = vcmp.eq.s32.totalorder %v2980_v48, %v488_v1  ;;  %v296_v2 = vpop.permute.xlu1 %295 }
  0xa5   : > { %v2080_v3 = vsel %vm576_vm7, 1.0, %v2839_v53  ;;  %vm384_vm8 = vcmp.eq.s32.totalorder %v2980_v48, %v296_v2  ;;  %2409 = vmatprep.mubr.msk.f32.mxu0 %vm701_vm4, %v671_v0 }
  0xa6   : > { %v2048_v4 = vsel %vm384_vm8, 1.0, %v2839_v53 }
  0xa7   : > { %v672_v5 = vsub.f32 %v2048_v4, %v2080_v3  ;;  %v491_v8 = vpop.permute.xlu0 %490 }
  0xa8   : > { %vm577_vm9 = vcmp.eq.s32.totalorder %v2980_v48, %v491_v8  ;;  %v299_v11 = vpop.permute.xlu1 %298 }
  0xa9   : > { %v2081_v12 = vsel %vm577_vm9, 1.0, %v2839_v53  ;;  %vm385_vm10 = vcmp.eq.s32.totalorder %v2980_v48, %v299_v11  ;;  %2410 = vmatmul.mubr.msk.f32.gmra.mrb[2].mxu0 %vm701_vm4, %v672_v5 }
  0xaa   : > { %v2049_v15 = vsel %vm385_vm10, 1.0, %v2839_v53 }
  0xab   : > { %v673_v16 = vsub.f32 %v2049_v15, %v2081_v12  ;;  %v494_v19 = vpop.permute.xlu0 %493 }
  0xac   : > { %vm578_vm11 = vcmp.eq.s32.totalorder %v2980_v48, %v494_v19  ;;  %v302_v20 = vpop.permute.xlu1 %301 }
  0xad   : > { %v2082_v21 = vsel %vm578_vm11, 1.0, %v2839_v53  ;;  %vm386_vm12 = vcmp.eq.s32.totalorder %v2980_v48, %v302_v20  ;;  %2412 = vmatprep.mubr.msk.f32.mxu0 %vm701_vm4, %v673_v16 }
  0xae   : > { %v2050_v22 = vsel %vm386_vm12, 1.0, %v2839_v53 }
  0xaf   : > { %v674_v23 = vsub.f32 %v2050_v22, %v2082_v21  ;;  %v497_v24 = vpop.permute.xlu0 %496 }
  0xb0   : > { %vm579_vm13 = vcmp.eq.s32.totalorder %v2980_v48, %v497_v24  ;;  %v305_v25 = vpop.permute.xlu1 %304 }
  0xb1   : > { %v2083_v26 = vsel %vm579_vm13, 1.0, %v2839_v53  ;;  %vm387_vm14 = vcmp.eq.s32.totalorder %v2980_v48, %v305_v25  ;;  %2413 = vmatmul.mubr.msk.f32.gmra.mrb[4].mxu0 %vm701_vm4, %v674_v23 }
  0xb2   : > { %v2051_v27 = vsel %vm387_vm14, 1.0, %v2839_v53 }
  0xb3   : > { %v675_v28 = vsub.f32 %v2051_v27, %v2083_v26  ;;  %v500_v29 = vpop.permute.xlu0 %499 }
  0xb4   : > { %vm580_vm15 = vcmp.eq.s32.totalorder %v2980_v48, %v500_v29  ;;  %v308_v30 = vpop.permute.xlu1 %307 }
  0xb5   : > { %v2084_v31 = vsel %vm580_vm15, 1.0, %v2839_v53  ;;  %vm388_vm0 = vcmp.eq.s32.totalorder %v2980_v48, %v308_v30  ;;  %2415 = vmatprep.mubr.msk.f32.mxu0 %vm701_vm4, %v675_v28 }
  0xb6   : > { %v2052_v32 = vsel %vm388_vm0, 1.0, %v2839_v53 }
  0xb7   : > { %v676_v33 = vsub.f32 %v2052_v32, %v2084_v31  ;;  %v503_v34 = vpop.permute.xlu0 %502 }
  0xb8   : > { %vm581_vm1 = vcmp.eq.s32.totalorder %v2980_v48, %v503_v34  ;;  %v311_v35 = vpop.permute.xlu1 %310 }
  0xb9   : > { %v2085_v36 = vsel %vm581_vm1, 1.0, %v2839_v53  ;;  %vm389_vm2 = vcmp.eq.s32.totalorder %v2980_v48, %v311_v35  ;;  %2416 = vmatmul.mubr.msk.f32.gmra.mrb[6].mxu0 %vm701_vm4, %v676_v33 }
  0xba   : > { %v2053_v37 = vsel %vm389_vm2, 1.0, %v2839_v53 }
  0xbb   : > { %v677_v38 = vsub.f32 %v2053_v37, %v2085_v36  ;;  %v506_v39 = vpop.permute.xlu0 %505 }
  0xbc   : > { %vm582_vm3 = vcmp.eq.s32.totalorder %v2980_v48, %v506_v39  ;;  %v314_v40 = vpop.permute.xlu1 %313 }
  0xbd   : > { %v2086_v41 = vsel %vm582_vm3, 1.0, %v2839_v53  ;;  %vm390_vm5 = vcmp.eq.s32.totalorder %v2980_v48, %v314_v40  ;;  %2418 = vmatprep.mubr.msk.f32.mxu0 %vm701_vm4, %v677_v38 }
  0xbe   : > { %v2054_v42 = vsel %vm390_vm5, 1.0, %v2839_v53 }
  0xbf   : > { %v678_v43 = vsub.f32 %v2054_v42, %v2086_v41  ;;  %v509_v44 = vpop.permute.xlu0 %508 }
  0xc0   : > { %vm583_vm6 = vcmp.eq.s32.totalorder %v2980_v48, %v509_v44  ;;  %v317_v45 = vpop.permute.xlu1 %316 }
  0xc1   : > { %v2087_v46 = vsel %vm583_vm6, 1.0, %v2839_v53  ;;  %vm391_vm7 = vcmp.eq.s32.totalorder %v2980_v48, %v317_v45  ;;  %2419 = vmatmul.mubr.msk.f32.gmra.mrb[8].mxu0 %vm701_vm4, %v678_v43 }
  0xc2   : > { %v2055_v49 = vsel %vm391_vm7, 1.0, %v2839_v53 }
  0xc3   : > { %v679_v50 = vsub.f32 %v2055_v49, %v2087_v46  ;;  %v512_v51 = vpop.permute.xlu0 %511 }
  0xc4   : > { %vm584_vm8 = vcmp.eq.s32.totalorder %v2980_v48, %v512_v51  ;;  %v320_v52 = vpop.permute.xlu1 %319 }
  0xc5   : > { %v2088_v54 = vsel %vm584_vm8, 1.0, %v2839_v53  ;;  %vm392_vm9 = vcmp.eq.s32.totalorder %v2980_v48, %v320_v52  ;;  %2421 = vmatprep.mubr.msk.f32.mxu0 %vm701_vm4, %v679_v50 }
  0xc6   : > { %v2056_v55 = vsel %vm392_vm9, 1.0, %v2839_v53 }
  0xc7   : > { %v680_v56 = vsub.f32 %v2056_v55, %v2088_v54  ;;  %v515_v57 = vpop.permute.xlu0 %514 }
  0xc8   : > { %vm585_vm10 = vcmp.eq.s32.totalorder %v2980_v48, %v515_v57  ;;  %v323_v58 = vpop.permute.xlu1 %322 }
  0xc9   : > { %v2089_v59 = vsel %vm585_vm10, 1.0, %v2839_v53  ;;  %vm393_vm11 = vcmp.eq.s32.totalorder %v2980_v48, %v323_v58  ;;  %2422 = vmatmul.mubr.msk.f32.gmra.mrb[10].mxu0 %vm701_vm4, %v680_v56 }
  0xca   : > { %v2057_v60 = vsel %vm393_vm11, 1.0, %v2839_v53 }
  0xcb   : > { %v681_v61 = vsub.f32 %v2057_v60, %v2089_v59  ;;  %v518_v62 = vpop.permute.xlu0 %517 }
  0xcc   : > { %vm586_vm12 = vcmp.eq.s32.totalorder %v2980_v48, %v518_v62  ;;  %v326_v63 = vpop.permute.xlu1 %325 }
  0xcd   : > { %v2090_v0 = vsel %vm586_vm12, 1.0, %v2839_v53  ;;  %vm394_vm13 = vcmp.eq.s32.totalorder %v2980_v48, %v326_v63  ;;  %2424 = vmatprep.mubr.msk.f32.mxu0 %vm701_vm4, %v681_v61 }
  0xce   : > { %v2058_v1 = vsel %vm394_vm13, 1.0, %v2839_v53 }
  0xcf   : > { %v682_v2 = vsub.f32 %v2058_v1, %v2090_v0  ;;  %v521_v3 = vpop.permute.xlu0 %520 }
  0xd0   : > { %vm587_vm14 = vcmp.eq.s32.totalorder %v2980_v48, %v521_v3  ;;  %v329_v4 = vpop.permute.xlu1 %328 }
  0xd1   : > { %v2091_v5 = vsel %vm587_vm14, 1.0, %v2839_v53  ;;  %vm395_vm15 = vcmp.eq.s32.totalorder %v2980_v48, %v329_v4  ;;  %2425 = vmatmul.mubr.msk.f32.gmra.mrb[12].mxu0 %vm701_vm4, %v682_v2 }
  0xd2   : > { %v2059_v8 = vsel %vm395_vm15, 1.0, %v2839_v53 }
  0xd3   : > { %v683_v11 = vsub.f32 %v2059_v8, %v2091_v5  ;;  %v524_v12 = vpop.permute.xlu0 %523 }
  0xd4   : > { %vm588_vm0 = vcmp.eq.s32.totalorder %v2980_v48, %v524_v12  ;;  %v332_v15 = vpop.permute.xlu1 %331 }
  0xd5   : > { %v2092_v16 = vsel %vm588_vm0, 1.0, %v2839_v53  ;;  %vm396_vm1 = vcmp.eq.s32.totalorder %v2980_v48, %v332_v15  ;;  %2427 = vmatprep.mubr.msk.f32.mxu0 %vm701_vm4, %v683_v11 }
  0xd6   : > { %v2060_v19 = vsel %vm396_vm1, 1.0, %v2839_v53 }
  0xd7   : > { %v684_v20 = vsub.f32 %v2060_v19, %v2092_v16  ;;  %v527_v21 = vpop.permute.xlu0 %526 }
  0xd8   : > { %vm589_vm2 = vcmp.eq.s32.totalorder %v2980_v48, %v527_v21  ;;  %v335_v22 = vpop.permute.xlu1 %334 }
  0xd9   : > { %v2093_v23 = vsel %vm589_vm2, 1.0, %v2839_v53  ;;  %vm397_vm3 = vcmp.eq.s32.totalorder %v2980_v48, %v335_v22  ;;  %2428 = vmatmul.mubr.msk.f32.gmra.mrb[14].mxu0 %vm701_vm4, %v684_v20 }
  0xda   : > { %v2061_v24 = vsel %vm397_vm3, 1.0, %v2839_v53 }
  0xdb   : > { %v685_v25 = vsub.f32 %v2061_v24, %v2093_v23  ;;  %v530_v26 = vpop.permute.xlu0 %529 }
  0xdc   : > { %vm590_vm5 = vcmp.eq.s32.totalorder %v2980_v48, %v530_v26  ;;  %v338_v27 = vpop.permute.xlu1 %337 }
  0xdd   : > { %v2094_v28 = vsel %vm590_vm5, 1.0, %v2839_v53  ;;  %vm398_vm6 = vcmp.eq.s32.totalorder %v2980_v48, %v338_v27  ;;  %2430 = vmatprep.mubr.msk.f32.mxu0 %vm701_vm4, %v685_v25 }
  0xde   : > { %v2062_v29 = vsel %vm398_vm6, 1.0, %v2839_v53 }
  0xdf   : > { %v686_v30 = vsub.f32 %v2062_v29, %v2094_v28  ;;  %v533_v31 = vpop.permute.xlu0 %532 }
  0xe0   : > { %vm591_vm7 = vcmp.eq.s32.totalorder %v2980_v48, %v533_v31  ;;  %v341_v32 = vpop.permute.xlu1 %340 }
  0xe1   : > { %v2095_v33 = vsel %vm591_vm7, 1.0, %v2839_v53  ;;  %vm399_vm8 = vcmp.eq.s32.totalorder %v2980_v48, %v341_v32  ;;  %2431 = vmatmul.mubr.msk.f32.gmra.mrb[16].mxu0 %vm701_vm4, %v686_v30 }
  0xe2   : > { %v2063_v34 = vsel %vm399_vm8, 1.0, %v2839_v53 }
  0xe3   : > { %v687_v35 = vsub.f32 %v2063_v34, %v2095_v33  ;;  %v536_v36 = vpop.permute.xlu0 %535 }
  0xe4   : > { %vm592_vm9 = vcmp.eq.s32.totalorder %v2980_v48, %v536_v36  ;;  %v344_v37 = vpop.permute.xlu1 %343 }
  0xe5   : > { %v2096_v38 = vsel %vm592_vm9, 1.0, %v2839_v53  ;;  %vm400_vm10 = vcmp.eq.s32.totalorder %v2980_v48, %v344_v37  ;;  %2433 = vmatprep.mubr.msk.f32.mxu0 %vm701_vm4, %v687_v35 }
  0xe6   : > { %v2064_v39 = vsel %vm400_vm10, 1.0, %v2839_v53 }
  0xe7   : > { %v688_v40 = vsub.f32 %v2064_v39, %v2096_v38  ;;  %v539_v41 = vpop.permute.xlu0 %538 }
  0xe8   : > { %vm593_vm11 = vcmp.eq.s32.totalorder %v2980_v48, %v539_v41  ;;  %v347_v42 = vpop.permute.xlu1 %346 }
  0xe9   : > { %v2097_v43 = vsel %vm593_vm11, 1.0, %v2839_v53  ;;  %vm401_vm12 = vcmp.eq.s32.totalorder %v2980_v48, %v347_v42  ;;  %2434 = vmatmul.mubr.msk.f32.gmra.mrb[18].mxu0 %vm701_vm4, %v688_v40 }
  0xea   : > { %v2065_v44 = vsel %vm401_vm12, 1.0, %v2839_v53 }
  0xeb   : > { %v689_v45 = vsub.f32 %v2065_v44, %v2097_v43  ;;  %v542_v46 = vpop.permute.xlu0 %541 }
  0xec   : > { %vm594_vm13 = vcmp.eq.s32.totalorder %v2980_v48, %v542_v46  ;;  %v350_v49 = vpop.permute.xlu1 %349 }
  0xed   : > { %v2098_v50 = vsel %vm594_vm13, 1.0, %v2839_v53  ;;  %vm402_vm14 = vcmp.eq.s32.totalorder %v2980_v48, %v350_v49  ;;  %2436 = vmatprep.mubr.msk.f32.mxu0 %vm701_vm4, %v689_v45 }
  0xee   : > { %v2066_v51 = vsel %vm402_vm14, 1.0, %v2839_v53 }
  0xef   : > { %v690_v52 = vsub.f32 %v2066_v51, %v2098_v50  ;;  %v545_v54 = vpop.permute.xlu0 %544  ;;  %v3143_v50 = vshrl.u32 %v283_v47, 7 }
  0xf0   : > { %vm595_vm15 = vcmp.eq.s32.totalorder %v2980_v48, %v545_v54  ;;  %v353_v55 = vpop.permute.xlu1 %352 }
  0xf1   : > { %v2099_v56 = vsel %vm595_vm15, 1.0, %v2839_v53  ;;  %vm403_vm0 = vcmp.eq.s32.totalorder %v2980_v48, %v353_v55  ;;  %2437 = vmatmul.mubr.msk.f32.gmra.mrb[20].mxu0 %vm701_vm4, %v690_v52  ;;  %v1071_v51 = vsub.s32 1, %v3143_v50  ;;  %v282_v52 = vld [vmem:[%s2891_s26] sm:$0x3]  ;;  %v3148_v54 = vsub.s32 0, %v3143_v50 }
  0xf2   : > { %v2067_v57 = vsel %vm403_vm0, 1.0, %v2839_v53 }
  0xf3   : > { %v691_v58 = vsub.f32 %v2067_v57, %v2099_v56  ;;  %v548_v59 = vpop.permute.xlu0 %547  ;;  %v3150_v55 = vrot.slane %v282_v52, %v1071_v51  ;;  %v3154_v56 = vrot.slane %v282_v52, %v3148_v54  ;;  %v2840_v57 = vmov 1.0  }
  0xf4   : > { %vm596_vm1 = vcmp.eq.s32.totalorder %v2980_v48, %v548_v59  ;;  %v356_v60 = vpop.permute.xlu1 %355  ;;  %v3166_v59 = vadd.s32 8, %v3143_v50 }
  0xf5   : > { %v2100_v61 = vsel %vm596_vm1, 1.0, %v2839_v53  ;;  %vm404_vm2 = vcmp.eq.s32.totalorder %v2980_v48, %v356_v60  ;;  %2439 = vmatprep.mubr.msk.f32.mxu0 %vm701_vm4, %v691_v58 }
  0xf6   : > { %v2068_v62 = vsel %vm404_vm2, 1.0, %v2839_v53 }
  0xf7   : > { %v692_v63 = vsub.f32 %v2068_v62, %v2100_v61  ;;  %v551_v0 = vpop.permute.xlu0 %550  ;;  %v3179_v62 = vadd.s32 16, %v3143_v50 }
  0xf8   : > { %vm597_vm3 = vcmp.eq.s32.totalorder %v2980_v48, %v551_v0  ;;  %v359_v1 = vpop.permute.xlu1 %358 }
  0xf9   : > { %v2101_v2 = vsel %vm597_vm3, 1.0, %v2839_v53  ;;  %vm405_vm5 = vcmp.eq.s32.totalorder %v2980_v48, %v359_v1  ;;  %2440 = vmatmul.mubr.msk.f32.gmra.mrb[22].mxu0 %vm701_vm4, %v692_v63 }
  0xfa   : > { %v2069_v3 = vsel %vm405_vm5, 1.0, %v2839_v53  ;;  %vm1023_vm5 = vcmp.eq.s32.totalorder %v2980_v48, 8 }
  0xfb   : > { %v693_v4 = vsub.f32 %v2069_v3, %v2101_v2  ;;  %v554_v5 = vpop.permute.xlu0 %553  ;;  %v3188_v2 = vadd.s32 24, %v3143_v50 }
  0xfc   : > { %vm598_vm6 = vcmp.eq.s32.totalorder %v2980_v48, %v554_v5  ;;  %v362_v8 = vpop.permute.xlu1 %361  ;;  %v3197_v5 = vadd.s32 32, %v3143_v50 }
  0xfd   : > { %v2102_v11 = vsel %vm598_vm6, 1.0, %v2839_v53  ;;  %vm406_vm7 = vcmp.eq.s32.totalorder %v2980_v48, %v362_v8  ;;  %2442 = vmatprep.mubr.msk.f32.mxu0 %vm701_vm4, %v693_v4  ;;  %vm1074_vm6 = vcmp.eq.s32.totalorder %v3143_v50, %v3150_v55 }
  0xfe   : > { %v2070_v12 = vsel %vm406_vm7, 1.0, %v2839_v53  ;;  %2157 = vmatprep.mubr.msk.f32.mxu1 %vm1074_vm6, %v2840_v57  ;;  %vm1076_vm7 = vcmp.eq.s32.totalorder %v3166_v59, %v3150_v55 }
  0xff   : > { %v694_v15 = vsub.f32 %v2070_v12, %v2102_v11  ;;  %v557_v16 = vpop.permute.xlu0 %556 }
 0x100   : > { %vm599_vm8 = vcmp.eq.s32.totalorder %v2980_v48, %v557_v16  ;;  %v365_v19 = vpop.permute.xlu1 %364 }
 0x101   : > { %v2103_v20 = vsel %vm599_vm8, 1.0, %v2839_v53  ;;  %vm407_vm9 = vcmp.eq.s32.totalorder %v2980_v48, %v365_v19  ;;  %2443 = vmatmul.mubr.msk.f32.gmra.mrb[24].mxu0 %vm701_vm4, %v694_v15  ;;  %vm1075_vm8 = vcmp.eq.s32.totalorder %v3166_v59, %v3154_v56  ;;  %v3206_v15 = vadd.s32 40, %v3143_v50  ;;  %v1121_v59 = vld [vmem:[#allocation2] sm:$0xff] }
 0x102   : > { %v2071_v21 = vsel %vm407_vm9, 1.0, %v2839_v53  ;;  %vm1078_vm9 = vcmp.eq.s32.totalorder %v3179_v62, %v3150_v55 }
 0x103   : > { %v695_v22 = vsub.f32 %v2071_v21, %v2103_v20  ;;  %v560_v23 = vpop.permute.xlu0 %559  ;;  %v3215_v20 = vadd.s32 48, %v3143_v50 }
 0x104   : > { %vm600_vm10 = vcmp.eq.s32.totalorder %v2980_v48, %v560_v23  ;;  %v368_v24 = vpop.permute.xlu1 %367 }
 0x105   : > { %v2104_v25 = vsel %vm600_vm10, 1.0, %v2839_v53  ;;  %vm408_vm11 = vcmp.eq.s32.totalorder %v2980_v48, %v368_v24  ;;  %2445 = vmatprep.mubr.msk.f32.mxu0 %vm701_vm4, %v695_v22  ;;  %vm1077_vm10 = vcmp.eq.s32.totalorder %v3179_v62, %v3154_v56  ;;  %v3224_v24 = vadd.s32 56, %v3143_v50 }
 0x106   : > { %v2072_v26 = vsel %vm408_vm11, 1.0, %v2839_v53  ;;  %vm1080_vm11 = vcmp.eq.s32.totalorder %v3188_v2, %v3150_v55 }
 0x107   : > { %v696_v27 = vsub.f32 %v2072_v26, %v2104_v25  ;;  %v563_v28 = vpop.permute.xlu0 %562  ;;  %vm1087_vm6 = vcmp.eq.s32.totalorder %v3224_v24, %v3154_v56 }
 0x108   : > { %vm601_vm12 = vcmp.eq.s32.totalorder %v2980_v48, %v563_v28  ;;  %v371_v29 = vpop.permute.xlu1 %370 }
 0x109   : > { %v2105_v30 = vsel %vm601_vm12, 1.0, %v2839_v53  ;;  %vm409_vm13 = vcmp.eq.s32.totalorder %v2980_v48, %v371_v29  ;;  %2446 = vmatmul.mubr.msk.f32.gmra.mrb[26].mxu0 %vm701_vm4, %v696_v27  ;;  %vm1079_vm12 = vcmp.eq.s32.totalorder %v3188_v2, %v3154_v56 }
 0x10a   : > { %v2073_v31 = vsel %vm409_vm13, 1.0, %v2839_v53  ;;  %vm1082_vm13 = vcmp.eq.s32.totalorder %v3197_v5, %v3150_v55 }
 0x10b   : > { %v697_v32 = vsub.f32 %v2073_v31, %v2105_v30  ;;  %v566_v33 = vpop.permute.xlu0 %565 }
 0x10c   : > { %vm602_vm14 = vcmp.eq.s32.totalorder %v2980_v48, %v566_v33  ;;  %v374_v34 = vpop.permute.xlu1 %373 }
 0x10d   : > { %v2106_v35 = vsel %vm602_vm14, 1.0, %v2839_v53  ;;  %vm410_vm15 = vcmp.eq.s32.totalorder %v2980_v48, %v374_v34  ;;  %2448 = vmatprep.mubr.msk.f32.mxu0 %vm701_vm4, %v697_v32  ;;  %vm1081_vm14 = vcmp.eq.s32.totalorder %v3197_v5, %v3154_v56 }
 0x10e   : > { %v2074_v36 = vsel %vm410_vm15, 1.0, %v2839_v53  ;;  %vm1084_vm15 = vcmp.eq.s32.totalorder %v3206_v15, %v3150_v55 }
 0x10f   : > { %v698_v37 = vsub.f32 %v2074_v36, %v2106_v35  ;;  %v569_v38 = vpop.permute.xlu0 %568 }
 0x110   : > { %vm603_vm0 = vcmp.eq.s32.totalorder %v2980_v48, %v569_v38  ;;  %v377_v39 = vpop.permute.xlu1 %376 }
 0x111   : > { %v2107_v40 = vsel %vm603_vm0, 1.0, %v2839_v53  ;;  %vm411_vm1 = vcmp.eq.s32.totalorder %v2980_v48, %v377_v39  ;;  %2449 = vmatmul.mubr.msk.f32.gmra.mrb[28].mxu0 %vm701_vm4, %v698_v37  ;;  %vm1083_vm0 = vcmp.eq.s32.totalorder %v3206_v15, %v3154_v56 }
 0x112   : > { %v2075_v41 = vsel %vm411_vm1, 1.0, %v2839_v53  ;;  %vm1086_vm1 = vcmp.eq.s32.totalorder %v3215_v20, %v3150_v55 }
 0x113   : > { %v699_v42 = vsub.f32 %v2075_v41, %v2107_v40  ;;  %v572_v43 = vpop.permute.xlu0 %571 }
 0x114   : > { %vm604_vm2 = vcmp.eq.s32.totalorder %v2980_v48, %v572_v43  ;;  %v380_v44 = vpop.permute.xlu1 %379 }
 0x115   : > { %v2108_v45 = vsel %vm604_vm2, 1.0, %v2839_v53  ;;  %vm412_vm3 = vcmp.eq.s32.totalorder %v2980_v48, %v380_v44  ;;  %2451 = vmatprep.mubr.msk.f32.mxu0 %vm701_vm4, %v699_v42  ;;  %vm1085_vm2 = vcmp.eq.s32.totalorder %v3215_v20, %v3154_v56 }
 0x116   : > { %v2076_v46 = vsel %vm412_vm3, 1.0, %v2839_v53  ;;  %vm1088_vm3 = vcmp.eq.s32.totalorder %v3224_v24, %v3150_v55 }
 0x117   : > { %v700_v49 = vsub.f32 %v2076_v46, %v2108_v45 }
 0x119   : > { %2452 = vmatmul.mubr.msk.f32.gmra.mrb[30].mxu0 %vm701_vm4, %v700_v49  ;;  %vm1073_vm4 = vcmp.eq.s32.totalorder %v3143_v50, %v3154_v56  ;;  %v1124_v56 = vld [vmem:[#allocation2 + $0x18] sm:$0xff] }
 0x174   : > { %v2408_v53 = vpop.f32.mrb[0].mxu0 }
 0x175   : > { %v3163_v47 = vsel %vm1023_vm5, 1.0, %v2408_v53  ;;  %v864_v58 = vpop.f32.mrb[1].mxu0 }
 0x176   : > { %v3170_v60 = vsel %vm1023_vm5, 1.0, %v864_v58 }
 0x177   : > { %v2604_v61 = vpack.c.bf16 %v3163_v47, %v3170_v60 }
 0x17c   : > { %v2411_v63 = vpop.f32.mrb[2].mxu0 }
 0x17d   : > { %v1027_v0 = vsel %vm1023_vm5, 1.0, %v2411_v63  ;;  %v874_v1 = vpop.f32.mrb[3].mxu0 }
 0x17e   : > { %v1026_v3 = vsel %vm1023_vm5, 1.0, %v874_v1 }
 0x17f   : > { %v2608_v4 = vpack.c.bf16 %v1027_v0, %v1026_v3 }
 0x184   : > { %v2414_v8 = vpop.f32.mrb[4].mxu0 }
 0x185   : > { %v1029_v11 = vsel %vm1023_vm5, 1.0, %v2414_v8  ;;  %v884_v12 = vpop.f32.mrb[5].mxu0 }
 0x186   : > { %v1028_v16 = vsel %vm1023_vm5, 1.0, %v884_v12 }
 0x187   : > { %v2612_v19 = vpack.c.bf16 %v1029_v11, %v1028_v16 }
 0x18c   : > { %v2417_v21 = vpop.f32.mrb[6].mxu0 }
 0x18d   : > { %v1031_v22 = vsel %vm1023_vm5, 1.0, %v2417_v21  ;;  %v894_v23 = vpop.f32.mrb[7].mxu0 }
 0x18e   : > { %v1030_v25 = vsel %vm1023_vm5, 1.0, %v894_v23 }
 0x18f   : > { %v2616_v26 = vpack.c.bf16 %v1031_v22, %v1030_v25 }
 0x194   : > { %v2420_v27 = vpop.f32.mrb[8].mxu0 }
 0x195   : > { %v1033_v28 = vsel %vm1023_vm5, 1.0, %v2420_v27  ;;  %v904_v29 = vpop.f32.mrb[9].mxu0 }
 0x196   : > { %v1032_v30 = vsel %vm1023_vm5, 1.0, %v904_v29 }
 0x197   : > { %v2620_v31 = vpack.c.bf16 %v1033_v28, %v1032_v30 }
 0x19c   : > { %v2423_v32 = vpop.f32.mrb[10].mxu0 }
 0x19d   : > { %v1035_v33 = vsel %vm1023_vm5, 1.0, %v2423_v32  ;;  %v914_v34 = vpop.f32.mrb[11].mxu0 }
 0x19e   : > { %v1034_v35 = vsel %vm1023_vm5, 1.0, %v914_v34 }
 0x19f   : > { %v2624_v36 = vpack.c.bf16 %v1035_v33, %v1034_v35 }
 0x1a4   : > { %v2426_v37 = vpop.f32.mrb[12].mxu0 }
 0x1a5   : > { %v1037_v38 = vsel %vm1023_vm5, 1.0, %v2426_v37  ;;  %v924_v39 = vpop.f32.mrb[13].mxu0 }
 0x1a6   : > { %v1036_v40 = vsel %vm1023_vm5, 1.0, %v924_v39 }
 0x1a7   : > { %v2628_v41 = vpack.c.bf16 %v1037_v38, %v1036_v40 }
 0x1ac   : > { %v2429_v42 = vpop.f32.mrb[14].mxu0 }
 0x1ad   : > { %v1039_v43 = vsel %vm1023_vm5, 1.0, %v2429_v42  ;;  %v934_v44 = vpop.f32.mrb[15].mxu0 }
 0x1ae   : > { %v1038_v45 = vsel %vm1023_vm5, 1.0, %v934_v44 }
 0x1af   : > { %v2632_v46 = vpack.c.bf16 %v1039_v43, %v1038_v45 }
 0x1b4   : > { %v2432_v49 = vpop.f32.mrb[16].mxu0 }
 0x1b5   : > { %v1041_v51 = vsel %vm1023_vm5, 1.0, %v2432_v49  ;;  %v944_v52 = vpop.f32.mrb[17].mxu0 }
 0x1b6   : > { %v1040_v53 = vsel %vm1023_vm5, 1.0, %v944_v52 }
 0x1b7   : > { %v2602_v47 = vpack.c.bf16 %v1041_v51, %v1040_v53  ;;  %v1123_v51 = vld [vmem:[#allocation2 + $0x10] sm:$0xff] }
 0x1b9   : > { %2603 = vmatprep.subr.bf16.mxu1 %v2602_v47 }
 0x1ba   : > { %2605 = vmatpush3.bf16.msra.mxu1 %v2604_v61 }
 0x1bc   : > { %v2435_v58 = vpop.f32.mrb[18].mxu0 }
 0x1bd   : > { %v1043_v60 = vsel %vm1023_vm5, 1.0, %v2435_v58  ;;  %v954_v63 = vpop.f32.mrb[19].mxu0 }
 0x1be   : > { %v1042_v0 = vsel %vm1023_vm5, 1.0, %v954_v63  ;;  %v1125_v63 = vld [vmem:[#allocation2 + $0x20] sm:$0xff] }
 0x1bf   : > { %v2606_v1 = vpack.c.bf16 %v1043_v60, %v1042_v0 }
 0x1c1   : > { %2607 = vmatprep.subr.bf16.mxu1 %v2606_v1 }
 0x1c2   : > { %2609 = vmatpush3.bf16.msra.mxu1 %v2608_v4 }
 0x1c4   : > { %v2438_v3 = vpop.f32.mrb[20].mxu0 }
 0x1c5   : > { %v1045_v8 = vsel %vm1023_vm5, 1.0, %v2438_v3  ;;  %v964_v11 = vpop.f32.mrb[21].mxu0 }
 0x1c6   : > { %v1044_v12 = vsel %vm1023_vm5, 1.0, %v964_v11  ;;  %v1126_v11 = vld [vmem:[#allocation2 + $0x28] sm:$0xff] }
 0x1c7   : > { %v2610_v61 = vpack.c.bf16 %v1045_v8, %v1044_v12 }
 0x1c9   : > { %2611 = vmatprep.subr.bf16.mxu1 %v2610_v61 }
 0x1ca   : > { %2613 = vmatpush3.bf16.msra.mxu1 %v2612_v19 }
 0x1cc   : > { %v2441_v16 = vpop.f32.mrb[22].mxu0 }
 0x1cd   : > { %v1047_v21 = vsel %vm1023_vm5, 1.0, %v2441_v16  ;;  %v974_v22 = vpop.f32.mrb[23].mxu0 }
 0x1ce   : > { %v1046_v23 = vsel %vm1023_vm5, 1.0, %v974_v22  ;;  %v1127_v22 = vld [vmem:[#allocation2 + $0x30] sm:$0xff] }
 0x1cf   : > { %v2614_v4 = vpack.c.bf16 %v1047_v21, %v1046_v23 }
 0x1d1   : > { %2615 = vmatprep.subr.bf16.mxu1 %v2614_v4 }
 0x1d2   : > { %2617 = vmatpush3.bf16.msra.mxu1 %v2616_v26 }
 0x1d4   : > { %v2444_v25 = vpop.f32.mrb[24].mxu0 }
 0x1d5   : > { %v1049_v27 = vsel %vm1023_vm5, 1.0, %v2444_v25  ;;  %v984_v28 = vpop.f32.mrb[25].mxu0 }
 0x1d6   : > { %v1048_v29 = vsel %vm1023_vm5, 1.0, %v984_v28  ;;  %v1128_v28 = vld [vmem:[#allocation2 + $0x38] sm:$0xff] }
 0x1d7   : > { %v2618_v19 = vpack.c.bf16 %v1049_v27, %v1048_v29 }
 0x1d9   : > { %2619 = vmatprep.subr.bf16.mxu1 %v2618_v19 }
 0x1da   : > { %2621 = vmatpush3.bf16.msra.mxu1 %v2620_v31 }
 0x1dc   : > { %v2447_v30 = vpop.f32.mrb[26].mxu0 }
 0x1dd   : > { %v1051_v32 = vsel %vm1023_vm5, 1.0, %v2447_v30  ;;  %v994_v33 = vpop.f32.mrb[27].mxu0 }
 0x1de   : > { %v1050_v34 = vsel %vm1023_vm5, 1.0, %v994_v33 }
 0x1df   : > { %v2622_v26 = vpack.c.bf16 %v1051_v32, %v1050_v34 }
 0x1e1   : > { %2623 = vmatprep.subr.bf16.mxu1 %v2622_v26  ;;  %v2841_v26 = vmov (!%p2173_p6), 8  }
 0x1e2   : > { %2625 = vmatpush3.bf16.msra.mxu1 %v2624_v36  ;;  %2775 = vset.pattern.permute.xlu1 (!%p2173_p6), %v2841_v26 }
 0x1e3   : > { %2774 = vset.pattern.permute.xlu0 (!%p2173_p6), %v2841_v26 }
 0x1e4   : > { %v2450_v35 = vpop.f32.mrb[28].mxu0 }
 0x1e5   : > { %v1053_v37 = vsel %vm1023_vm5, 1.0, %v2450_v35  ;;  %v1004_v38 = vpop.f32.mrb[29].mxu0 }
 0x1e6   : > { %v1052_v39 = vsel %vm1023_vm5, 1.0, %v1004_v38 }
 0x1e7   : > { %v2626_v31 = vpack.c.bf16 %v1053_v37, %v1052_v39 }
 0x1e9   : > { %2627 = vmatprep.subr.bf16.mxu1 %v2626_v31 }
 0x1ea   : > { %2629 = vmatpush3.bf16.msra.mxu1 %v2628_v41  ;;  %v1122_v41 = vld [vmem:[#allocation2 + $0x8] sm:$0xff] }
 0x1ec   : > { %v2453_v40 = vpop.f32.mrb[30].mxu0 }
 0x1ed   : > { %v1055_v42 = vsel %vm1023_vm5, 1.0, %v2453_v40  ;;  %v1014_v43 = vpop.f32.mrb[31].mxu0 }
 0x1ee   : > { %v1054_v44 = vsel %vm1023_vm5, 1.0, %v1014_v43  ;;  %v1343_v43 = vld [vmem:[%s3601_s3] sm:$0xff] (!%p2173_p6)  ;;  %vm1334_vm5 = vcmp.lt.s32.totalorder (!%p2173_p6), %v2980_v48, 4 }
 0x1ef   : > { %v2630_v36 = vpack.c.bf16 %v1055_v42, %v1054_v44  ;;  %v1344_v44 = vld [vmem:[%s3601_s3 + $0x8] sm:$0xff] (!%p2173_p6) }
 0x1f1   : > { %2631 = vmatprep.subr.bf16.mxu1 %v2630_v36  ;;  %v1345_v36 = vld [vmem:[%s3601_s3 + $0x10] sm:$0xff] (!%p2173_p6) }
 0x1f2   : > { %2633 = vmatpush3.bf16.msra.mxu1 %v2632_v46 }
 0x1f5   : > { %2158 = vmatmul.mubr.msk.f32.vlgmr.msra.gmra.mrb[0].mxu1 %vm1073_vm4, %v2840_v57 }
 0x1f6   : > { %2159 = vmatprep.mubr.msk.f32.mxu1 %vm1076_vm7, %v2840_v57 }
 0x1f9   : > { %2160 = vmatmul.mubr.msk.f32.gmra.mrb[2].mxu1 %vm1075_vm8, %v2840_v57 }
 0x1fa   : > { %2161 = vmatprep.mubr.msk.f32.mxu1 %vm1078_vm9, %v2840_v57 }
 0x1fd   : > { %2162 = vmatmul.mubr.msk.f32.gmra.mrb[4].mxu1 %vm1077_vm10, %v2840_v57 }
 0x1fe   : > { %2163 = vmatprep.mubr.msk.f32.mxu1 %vm1080_vm11, %v2840_v57 }
 0x201   : > { %2164 = vmatmul.mubr.msk.f32.gmra.mrb[6].mxu1 %vm1079_vm12, %v2840_v57 }
 0x202   : > { %2165 = vmatprep.mubr.msk.f32.mxu1 %vm1082_vm13, %v2840_v57 }
 0x205   : > { %2166 = vmatmul.mubr.msk.f32.gmra.mrb[8].mxu1 %vm1081_vm14, %v2840_v57 }
 0x206   : > { %2167 = vmatprep.mubr.msk.f32.mxu1 %vm1084_vm15, %v2840_v57 }
 0x209   : > { %2168 = vmatmul.mubr.msk.f32.gmra.mrb[10].mxu1 %vm1083_vm0, %v2840_v57 }
 0x20a   : > { %2169 = vmatprep.mubr.msk.f32.mxu1 %vm1086_vm1, %v2840_v57 }
 0x20d   : > { %2170 = vmatmul.mubr.msk.f32.gmra.mrb[12].mxu1 %vm1085_vm2, %v2840_v57 }
 0x20e   : > { %2171 = vmatprep.mubr.msk.f32.mxu1 %vm1088_vm3, %v2840_v57 }
 0x211   : > { %2172 = vmatmul.mubr.msk.f32.gmra.mrb[14].mxu1 %vm1087_vm6, %v2840_v57 }
 0x2c8   : > { %v2294_v50 = vpop.f32.mrb[0].mxu1 }
 0x2c9   : > { %v2295_v62 = vpop.f32.mrb[1].mxu1 }
 0x2ca   : > { %v2296_v2 = vadd.f32 %v2295_v62, %v2294_v50  ;;  %v1346_v50 = vld [vmem:[%s3601_s3 + $0x18] sm:$0xff] (!%p2173_p6) }
 0x2cb   : > { %v2638_v62 = vpack.c.bf16 (!%p2173_p6), %v1346_v50, %v1345_v36 }
 0x2cc   : > { %v1234_v5 = vadd.f32 %v2296_v2, %v1121_v59  ;;  %v2297_v15 = vpop.f32.mrb[2].mxu1  ;;  %v2634_v59 = vpack.c.bf16 (!%p2173_p6), %v1344_v44, %v1343_v43 }
 0x2cd   : > { %v2298_v45 = vpop.f32.mrb[3].mxu1 }
 0x2ce   : > { %1242 = vst [vmem:[#allocation2] sm:$0xff] %v1234_v5  ;;  %v2299_v20 = vadd.f32 %v2298_v45, %v2297_v15  ;;  %v1347_v5 = vld [vmem:[%s3601_s3 + $0x20] sm:$0xff] (!%p2173_p6)  ;;  %v1348_v15 = vld [vmem:[%s3601_s3 + $0x28] sm:$0xff] (!%p2173_p6)  ;;  %2635 = vmatprep.subr.bf16.mxu0 (!%p2173_p6), %v2634_v59 }
 0x2cf   : > { %2637 = vmatpush3.bf16.msra.mxu0 (!%p2173_p6), %v2634_v59  ;;  %v2177_v59 = vld [vmem:[%s3601_s3 + $0x88] sm:$0xff] (!%p2173_p6) }
 0x2d0   : > { %v1235_v46 = vadd.f32 %v2299_v20, %v1122_v41  ;;  %v2300_v49 = vpop.f32.mrb[4].mxu1  ;;  %2639 = vmatprep.subr.bf16.mxu0 (!%p2173_p6), %v2638_v62 }
 0x2d1   : > { %v2301_v55 = vpop.f32.mrb[5].mxu1 }
 0x2d2   : > { %1243 = vst [vmem:[#allocation2 + $0x8] sm:$0xff] %v1235_v46  ;;  %v2302_v52 = vadd.f32 %v2301_v55, %v2300_v49  ;;  %v2642_v46 = vpack.c.bf16 (!%p2173_p6), %v1348_v15, %v1347_v5  ;;  %v1350_v55 = vld [vmem:[%s3601_s3 + $0x38] sm:$0xff] (!%p2173_p6)  ;;  %v2182_v15 = vld [vmem:[%s3601_s3 + $0xb0] sm:$0xff] (!%p2173_p6) }
 0x2d3   : > { %2641 = vmatpush3.bf16.msra.mxu0 (!%p2173_p6), %v2638_v62  ;;  %v2180_v62 = vld [vmem:[%s3601_s3 + $0xa0] sm:$0xff] (!%p2173_p6) }
 0x2d4   : > { %v1236_v53 = vadd.f32 %v2302_v52, %v1123_v51  ;;  %v2303_v47 = vpop.f32.mrb[6].mxu1  ;;  %v1349_v51 = vld [vmem:[%s3601_s3 + $0x30] sm:$0xff] (!%p2173_p6)  ;;  %2643 = vmatprep.subr.bf16.mxu0 (!%p2173_p6), %v2642_v46 }
 0x2d5   : > { %v2304_v57 = vpop.f32.mrb[7].mxu1  ;;  %v3343_v33 = vld [vmem:[#allocation2] sm:$0xff] (!%p2173_p6) }
 0x2d6   : > { %1244 = vst [vmem:[#allocation2 + $0x10] sm:$0xff] %v1236_v53  ;;  %v2305_v24 = vadd.f32 %v2304_v57, %v2303_v47  ;;  %v1262_v37 = vmax.f32 (!%p2173_p6), %v3343_v33, 1.0  ;;  %v2646_v53 = vpack.c.bf16 (!%p2173_p6), %v1350_v55, %v1349_v51  ;;  %v1352_v57 = vld [vmem:[%s3601_s3 + $0x48] sm:$0xff] (!%p2173_p6)  ;;  %v2186_v51 = vld [vmem:[%s3601_s3 + $0xd0] sm:$0xff] (!%p2173_p6)  ;;  %v2187_v55 = vld [vmem:[%s3601_s3 + $0xd8] sm:$0xff] (!%p2173_p6) }
 0x2d7   : > { %2645 = vmatpush3.bf16.msra.mxu0 (!%p2173_p6), %v2642_v46  ;;  %v2185_v46 = vld [vmem:[%s3601_s3 + $0xc8] sm:$0xff] (!%p2173_p6) }
 0x2d8   : > { %v1237_v58 = vadd.f32 %v2305_v24, %v1124_v56  ;;  %v2306_v60 = vpop.f32.mrb[8].mxu1  ;;  %v1351_v56 = vld [vmem:[%s3601_s3 + $0x40] sm:$0xff] (!%p2173_p6)  ;;  %2647 = vmatprep.subr.bf16.mxu0 (!%p2173_p6), %v2646_v53 }
 0x2d9   : > { %v2307_v0 = vpop.f32.mrb[9].mxu1  ;;  %v3350_v39 = vld [vmem:[#allocation2 + $0x8] sm:$0xff] (!%p2173_p6) }
 0x2da   : > { %1245 = vst [vmem:[#allocation2 + $0x18] sm:$0xff] %v1237_v58  ;;  %v2308_v1 = vadd.f32 %v2307_v0, %v2306_v60  ;;  %v1263_v31 = vmax.f32 (!%p2173_p6), %v3350_v39, 1.0  ;;  %v1353_v0 = vld [vmem:[%s3601_s3 + $0x50] sm:$0xff] (!%p2173_p6) }
 0x2db   : > { %2649 = vmatpush3.bf16.msra.mxu0 (!%p2173_p6), %v2646_v53  ;;  %v2188_v53 = vld [vmem:[%s3601_s3 + $0xe0] sm:$0xff] (!%p2173_p6) }
 0x2dc   : > { %v1238_v3 = vadd.f32 %v2308_v1, %v1125_v63  ;;  %v2309_v8 = vpop.f32.mrb[10].mxu1  ;;  %v2650_v63 = vpack.c.bf16 (!%p2173_p6), %v1352_v57, %v1351_v56  ;;  %v1354_v1 = vld [vmem:[%s3601_s3 + $0x58] sm:$0xff] (!%p2173_p6)  ;;  %v2190_v57 = vld [vmem:[%s3601_s3 + $0xf0] sm:$0xff] (!%p2173_p6) }
 0x2dd   : > { %v2310_v12 = vpop.f32.mrb[11].mxu1  ;;  %v3341_v32 = vld [vmem:[#allocation2 + $0x10] sm:$0xff] (!%p2173_p6) }
 0x2de   : > { %1246 = vst [vmem:[#allocation2 + $0x20] sm:$0xff] %v1238_v3  ;;  %v2311_v61 = vadd.f32 %v2310_v12, %v2309_v8  ;;  %v1264_v35 = vmax.f32 (!%p2173_p6), %v3341_v32, 1.0  ;;  %2651 = vmatprep.subr.bf16.mxu0 (!%p2173_p6), %v2650_v63  ;;  %v1355_v12 = vld [vmem:[%s3601_s3 + $0x60] sm:$0xff] (!%p2173_p6) }
 0x2df   : > { %2653 = vmatpush3.bf16.msra.mxu0 (!%p2173_p6), %v2650_v63 }
 0x2e0   : > { %v1239_v16 = vadd.f32 %v2311_v61, %v1126_v11  ;;  %v2312_v21 = vpop.f32.mrb[12].mxu1  ;;  %2776 = vrcp.f32 (!%p2173_p6), %v1264_v35  ;;  %v2654_v11 = vpack.c.bf16 (!%p2173_p6), %v1354_v1, %v1353_v0  ;;  %v1356_v61 = vld [vmem:[%s3601_s3 + $0x68] sm:$0xff] (!%p2173_p6) }
 0x2e1   : > { %v2313_v23 = vpop.f32.mrb[13].mxu1  ;;  %v3345_v34 = vld [vmem:[#allocation2 + $0x18] sm:$0xff] (!%p2173_p6)  ;;  %2778 = vrcp.f32 (!%p2173_p6), %v1262_v37 }
 0x2e2   : > { %1247 = vst [vmem:[#allocation2 + $0x28] sm:$0xff] %v1239_v16  ;;  %v2314_v4 = vadd.f32 %v2313_v23, %v2312_v21  ;;  %v1265_v38 = vmax.f32 (!%p2173_p6), %v3345_v34, 1.0  ;;  %2655 = vmatprep.subr.bf16.mxu0 (!%p2173_p6), %v2654_v11  ;;  %v1357_v23 = vld [vmem:[%s3601_s3 + $0x70] sm:$0xff] (!%p2173_p6) }
 0x2e3   : > { %2657 = vmatpush3.bf16.msra.mxu0 (!%p2173_p6), %v2654_v11 }
 0x2e4   : > { %v1240_v25 = vadd.f32 %v2314_v4, %v1127_v22  ;;  %v2315_v27 = vpop.f32.mrb[14].mxu1  ;;  %1253 = sbr.rel (%p2173_p6) target bundleno = 1794 (0x702), region = 48  ;;  %2780 = vrcp.f32 (!%p2173_p6), %v1265_v38  ;;  %v2658_v22 = vpack.c.bf16 (!%p2173_p6), %v1356_v61, %v1355_v12  ;;  %v1358_v4 = vld [vmem:[%s3601_s3 + $0x78] sm:$0xff] (!%p2173_p6) }
 0x2e5   : > { %v2316_v29 = vpop.f32.mrb[15].mxu1  ;;  %v3355_v42 = vld [vmem:[#allocation2 + $0x20] sm:$0xff] (!%p2173_p6)  ;;  %2782 = vrcp.f32 (!%p2173_p6), %v1263_v31 }
 0x2e6   : > { %1248 = vst [vmem:[#allocation2 + $0x30] sm:$0xff] %v1240_v25  ;;  %v2317_v19 = vadd.f32 %v2316_v29, %v2315_v27  ;;  %v1266_v41 = vmax.f32 (!%p2173_p6), %v3355_v42, 1.0  ;;  %2659 = vmatprep.subr.bf16.mxu0 (!%p2173_p6), %v2658_v22  ;;  %v2662_v25 = vpack.c.bf16 (!%p2173_p6), %v1358_v4, %v1357_v23 }
 0x2e7   : > { %2661 = vmatpush3.bf16.msra.mxu0 (!%p2173_p6), %v2658_v22 }
 0x2e8   : > { %v1241_v30 = vadd.f32 %v2317_v19, %v1128_v28  ;;  %2663 = vmatprep.subr.bf16.mxu0 (!%p2173_p6), %v2662_v25 }
 0x2e9   : > { %v3353_v40 = vld [vmem:[#allocation2 + $0x28] sm:$0xff] (!%p2173_p6) }
 0x2ea   : > { %1249 = vst [vmem:[#allocation2 + $0x38] sm:$0xff] %v1241_v30  ;;  %v1267_v2 = vmax.f32 (!%p2173_p6), %v3353_v40, 1.0  ;;  %v2777_v47 = vpop.eup (!%p2173_p6), %2776 }
 0x2eb   : > { %v2779_v24 = vpop.eup %2778  ;;  %1298 = vperm.xlu1 %2775, %v2777_v47   ;;  %2665 = vmatpush3.bf16.msra.mxu0 %v2662_v25  ;;  %v2189_v47 = vld [vmem:[%s3601_s3 + $0xe8] sm:$0xff] }
 0x2ec   : > { %2784 = vrcp.f32 %v1267_v2  ;;  %1288 = vperm.xlu0 %2774, %v2779_v24   ;;  %v2181_v2 = vld [vmem:[%s3601_s3 + $0xa8] sm:$0xff]  ;;  %v2690_v56 = vpack.c.bf16 %v2189_v47, %v2188_v53  ;;  %v2191_v24 = vld [vmem:[%s3601_s3 + $0xf8] sm:$0xff] }
 0x2ed   : > { %v3379_v20 = vld [vmem:[#allocation2 + $0x30] sm:$0xff]  ;;  %2786 = vrcp.f32 %v1266_v41  ;;  %v2674_v5 = vpack.c.bf16 %v2181_v2, %v2180_v62  ;;  %v2183_v41 = vld [vmem:[%s3601_s3 + $0xb8] sm:$0xff] }
 0x2ee   : > { %v1268_v52 = vmax.f32 %v3379_v20, 1.0  ;;  %v2781_v58 = vpop.eup %2780 }
 0x2ef   : > { %v2783_v60 = vpop.eup %2782  ;;  %1303 = vperm.xlu1 %2775, %v2781_v58   ;;  %v2694_v58 = vpack.c.bf16 %v2191_v24, %v2190_v57 }
 0x2f0   : > { %1293 = vperm.xlu0 %2774, %v2783_v60   ;;  %v2174_v60 = vld [vmem:[%s3602_s4] ss:$0 sm:$0xff] }
 0x2f1   : > { %v3377_v45 = vld [vmem:[#allocation2 + $0x38] sm:$0xff] }
 0x2f2   : > { %v1269_v49 = vmax.f32 %v3377_v45, 1.0 }
 0x2f4   : > { %2788 = vrcp.f32 %v1269_v49 }
 0x2f5   : > { %2790 = vrcp.f32 %v1268_v52  ;;  %v2686_v52 = vpack.c.bf16 %v2187_v55, %v2186_v51 }
 0x2f6   : > { %v2785_v3 = vpop.eup %2784 }
 0x2f7   : > { %v2787_v8 = vpop.eup %2786  ;;  %1313 = vperm.xlu1 %2775, %v2785_v3  }
 0x2f8   : > { %1308 = vperm.xlu0 %2774, %v2787_v8  }
 0x2fe   : > { %v2789_v16 = vpop.eup %2788 }
 0x2ff   : > { %v2791_v21 = vpop.eup %2790  ;;  %1323 = vperm.xlu1 %2775, %v2789_v16  }
 0x300   : > { %1318 = vperm.xlu0 %2774, %v2791_v21  }
 0x36a   : > { %v1299_v27 = vpop.permute.xlu1 %1298 }
 0x36b   : > { %v1289_v28 = vpop.permute.xlu0 %1288  ;;  %v1328_v19 = vmul.f32 %v1299_v27, %v3341_v32 }
 0x36c   : > { %v1326_v29 = vmul.f32 %v1289_v28, %v3343_v33 }
 0x36d   : > { %v1337_v38 = vsel %vm1334_vm5, %v2917_v9, %v1328_v19 }
 0x36e   : > { %v1304_v30 = vpop.permute.xlu1 %1303  ;;  %v1335_v26 = vsel %vm1334_vm5, %v2905_v6, %v1326_v29 }
 0x36f   : > { %2486 = vmatprep.mubr.f32.mxu0 %v1335_v26  ;;  %v1294_v35 = vpop.permute.xlu0 %1293  ;;  %v1329_v31 = vmul.f32 %v1304_v30, %v3345_v34 }
 0x370   : > { %v1327_v37 = vmul.f32 %v1294_v35, %v3350_v39 }
 0x371   : > { %v1338_v39 = vsel %vm1334_vm5, %v2922_v10, %v1329_v31 }
 0x372   : > { %v1336_v32 = vsel %vm1334_vm5, %v2910_v7, %v1327_v37 }
 0x373   : > { %2487 = vmatmul.mubr.f32.vlgmr.msra.gmra.mrb[0].mxu0 %v1336_v32 }
 0x374   : > { %2489 = vmatprep.mubr.f32.mxu0 %v1337_v38 }
 0x376   : > { %v1314_v43 = vpop.permute.xlu1 %1313 }
 0x377   : > { %v1309_v33 = vpop.permute.xlu0 %1308  ;;  %v1331_v6 = vmul.f32 %v1314_v43, %v3353_v40  ;;  %2490 = vmatmul.mubr.f32.gmra.mrb[2].mxu0 %v1338_v39 }
 0x378   : > { %v1330_v44 = vmul.f32 %v1309_v33, %v3355_v42  ;;  %v2176_v42 = vld [vmem:[%s3601_s3 + $0x80] sm:$0xff] }
 0x379   : > { %v1340_v40 = vsel %vm1334_vm5, %v2935_v14, %v1331_v6  ;;  %v2666_v14 = vpack.c.bf16 %v2177_v59, %v2176_v42 }
 0x37a   : > { %v1339_v9 = vsel %vm1334_vm5, %v2930_v13, %v1330_v44 }
 0x37b   : > { %2492 = vmatprep.mubr.f32.mxu0 %v1339_v9  ;;  %2667 = vmatprep.subr.bf16.mxu1 %v2666_v14 }
 0x37c   : > { %2493 = vmatmul.mubr.f32.gmra.mrb[4].mxu0 %v1340_v40  ;;  %2669 = vmatpush3.bf16.msra.mxu1 %v2666_v14 }
 0x37e   : > { %v1324_v34 = vpop.permute.xlu1 %1323 }
 0x37f   : > { %v1319_v36 = vpop.permute.xlu0 %1318  ;;  %v1333_v50 = vmul.f32 %v1324_v34, %v3377_v45  ;;  %v2678_v45 = vpack.c.bf16 %v2183_v41, %v2182_v15 }
 0x380   : > { %v1332_v7 = vmul.f32 %v1319_v36, %v3379_v20  ;;  %v2184_v20 = vld [vmem:[%s3601_s3 + $0xc0] sm:$0xff] }
 0x381   : > { %v1342_v13 = vsel %vm1334_vm5, %v2948_v18, %v1333_v50  ;;  %v2179_v18 = vld [vmem:[%s3601_s3 + $0x98] sm:$0xff]  ;;  %v2682_v49 = vpack.c.bf16 %v2185_v46, %v2184_v20 }
 0x382   : > { %v1341_v10 = vsel %vm1334_vm5, %v2943_v17, %v1332_v7  ;;  %v2178_v17 = vld [vmem:[%s3601_s3 + $0x90] sm:$0xff] }
 0x383   : > { %2495 = vmatprep.mubr.f32.mxu0 %v1341_v10  ;;  %v2670_v48 = vpack.c.bf16 %v2179_v18, %v2178_v17 }
 0x384   : > { %2496 = vmatmul.mubr.f32.gmra.mrb[6].mxu0 %v1342_v13 }
 0x385   : > { %2671 = vmatprep.subr.bf16.mxu1 %v2670_v48 }
 0x386   : > { %2673 = vmatpush3.bf16.msra.mxu1 %v2670_v48 }
 0x387   : > { %2675 = vmatprep.subr.bf16.mxu1 %v2674_v5 }
 0x38a   : > { %2677 = vmatpush3.bf16.msra.mxu1 %v2674_v5 }
 0x38b   : > { %2679 = vmatprep.subr.bf16.mxu1 %v2678_v45 }
 0x38e   : > { %2681 = vmatpush3.bf16.msra.mxu1 %v2678_v45 }
 0x38f   : > { %2683 = vmatprep.subr.bf16.mxu1 %v2682_v49 }
 0x392   : > { %2685 = vmatpush3.bf16.msra.mxu1 %v2682_v49 }
 0x393   : > { %2687 = vmatprep.subr.bf16.mxu1 %v2686_v52 }
 0x396   : > { %2689 = vmatpush3.bf16.msra.mxu1 %v2686_v52 }
 0x397   : > { %2691 = vmatprep.subr.bf16.mxu1 %v2690_v56 }
 0x39a   : > { %2693 = vmatpush3.bf16.msra.mxu1 %v2690_v56 }
 0x39b   : > { %2695 = vmatprep.subr.bf16.mxu1 %v2694_v58 }
 0x39e   : > { %2697 = vmatpush3.bf16.msra.mxu1 %v2694_v58  ;;  %v1514_v58 = vld [vmem:[%s3602_s4 + $0x1] sm:$0x1] }
 0x446   : > { %v2488_v63 = vpop.f32.mrb[0].mxu0 }
 0x447   : > { %v1436_v0 = vadd.f32 %v2488_v63, %v2174_v60  ;;  %v1430_v1 = vpop.f32.mrb[1].mxu0 }
 0x448   : > { %v1431_v3 = vadd.f32 %v2174_v60, %v1430_v1  ;;  %v2175_v1 = vld [vmem:[%s3602_s4 + $0x2] ss:$0 sm:$0xff] }
 0x44a   : > { %v1469_v8 = vadd.f32 %v1436_v0, %v1431_v3  ;;  %v2491_v11 = vpop.f32.mrb[2].mxu0 }
 0x44b   : > { %v1440_v12 = vpop.f32.mrb[3].mxu0  ;;  %v1446_v16 = vadd.f32 %v2491_v11, %v2174_v60 }
 0x44c   : > { %v1441_v61 = vadd.f32 %v2174_v60, %v1440_v12 }
 0x44e   : > { %v1470_v21 = vadd.f32 %v1469_v8, %v1441_v61 }
 0x44f   : > { %v2494_v22 = vpop.f32.mrb[4].mxu0 }
 0x450   : > { %v1450_v23 = vpop.f32.mrb[5].mxu0  ;;  %v1471_v25 = vadd.f32 %v1470_v21, %v1446_v16  ;;  %v1456_v27 = vadd.f32 %v2494_v22, %v2174_v60 }
 0x451   : > { %v1451_v4 = vadd.f32 %v2174_v60, %v1450_v23 }
 0x453   : > { %v1472_v28 = vadd.f32 %v1471_v25, %v1451_v4 }
 0x455   : > { %v1473_v26 = vadd.f32 %v1472_v28, %v1456_v27 }
 0x457   : > { %v2497_v29 = vpop.f32.mrb[6].mxu0 }
 0x458   : > { %v1460_v19 = vpop.f32.mrb[7].mxu0  ;;  %v1466_v35 = vadd.f32 %v2497_v29, %v2174_v60 }
 0x459   : > { %v1461_v30 = vadd.f32 %v2174_v60, %v1460_v19 }
 0x45b   : > { %v1474_v37 = vadd.f32 %v1473_v26, %v1461_v30 }
 0x45d   : > { %v1475_v38 = vadd.f32 %v1474_v37, %v1466_v35 }
 0x45f   : > { %v1476_v31 = vrot.slane %v1475_v38, 4 }
 0x461   : > { %v1477_v43 = vadd.f32 %v1476_v31, %v1475_v38 }
 0x463   : > { %v1478_v32 = vrot.slane %v1477_v43, 2 }
 0x465   : > { %v1479_v33 = vadd.f32 %v1478_v32, %v1477_v43 }
 0x467   : > { %v1480_v44 = vrot.slane %v1479_v33, 1 }
 0x469   : > { %v1481_v6 = vadd.f32 %v1480_v44, %v1479_v33  ;;  %v2197_v44 = vld [vmem:[%s3601_s3 + $0x100] sm:$0xff] }
 0x46b   : > { %v1483_v39 = vmul.f32 0.015625, %v1481_v6  ;;  %v2198_v6 = vld [vmem:[%s3601_s3 + $0x108] sm:$0xff] }
 0x46d   : > { %v1484_v9 = vsub.f32 %v1431_v3, %v1483_v39  ;;  %v1485_v34 = vsub.f32 %v1436_v0, %v1483_v39  ;;  %v1486_v36 = vsub.f32 %v1441_v61, %v1483_v39  ;;  %v1487_v7 = vsub.f32 %v1446_v16, %v1483_v39 }
 0x46e   : > { %v1488_v50 = vsub.f32 %v1451_v4, %v1483_v39  ;;  %v1489_v40 = vsub.f32 %v1456_v27, %v1483_v39  ;;  %v1490_v10 = vsub.f32 %v1461_v30, %v1483_v39  ;;  %v1491_v13 = vsub.f32 %v1466_v35, %v1483_v39 }
 0x46f   : > { %v1492_v42 = vmul.f32 %v1484_v9, %v1484_v9  ;;  %v1493_v59 = vmul.f32 %v1485_v34, %v1485_v34  ;;  %v1494_v14 = vmul.f32 %v1486_v36, %v1486_v36  ;;  %v1495_v18 = vmul.f32 %v1487_v7, %v1487_v7 }
 0x470   : > { %v1496_v62 = vmul.f32 %v1488_v50, %v1488_v50  ;;  %v1497_v5 = vmul.f32 %v1489_v40, %v1489_v40  ;;  %v1498_v41 = vmul.f32 %v1490_v10, %v1490_v10  ;;  %v1499_v20 = vmul.f32 %v1491_v13, %v1491_v13 }
 0x471   : > { %v1500_v17 = vadd.f32 %v1493_v59, %v1492_v42  ;;  %v2698_v39 = vpack.c.bf16 %v2198_v6, %v2197_v44  ;;  %v2205_v59 = vld [vmem:[%s3601_s3 + $0x140] sm:$0xff] }
 0x473   : > { %v1501_v48 = vadd.f32 %v1500_v17, %v1494_v14  ;;  %2699 = vmatprep.subr.bf16.mxu0 %v2698_v39  ;;  %2730 = vmatprep.subr.bf16.mxu1 %v2698_v39  ;;  %v2206_v14 = vld [vmem:[%s3601_s3 + $0x148] sm:$0xff] }
 0x474   : > { %2701 = vmatpush3.bf16.msra.mxu0 %v2698_v39  ;;  %v2714_v17 = vpack.c.bf16 %v2206_v14, %v2205_v59 }
 0x475   : > { %v1502_v2 = vadd.f32 %v1501_v48, %v1495_v18  ;;  %v2207_v18 = vld [vmem:[%s3601_s3 + $0x150] sm:$0xff]  ;;  %v2208_v48 = vld [vmem:[%s3601_s3 + $0x158] sm:$0xff] }
 0x477   : > { %v1503_v15 = vadd.f32 %v1502_v2, %v1496_v62  ;;  %v2718_v62 = vpack.c.bf16 %v2208_v48, %v2207_v18  ;;  %v2209_v2 = vld [vmem:[%s3601_s3 + $0x160] sm:$0xff] }
 0x479   : > { %v1504_v45 = vadd.f32 %v1503_v15, %v1497_v5  ;;  %v2210_v5 = vld [vmem:[%s3601_s3 + $0x168] sm:$0xff] }
 0x47a   : > { %v2722_v15 = vpack.c.bf16 %v2210_v5, %v2209_v2 }
 0x47b   : > { %v1505_v46 = vadd.f32 %v1504_v45, %v1498_v41  ;;  %v2211_v41 = vld [vmem:[%s3601_s3 + $0x170] sm:$0xff]  ;;  %v2212_v45 = vld [vmem:[%s3601_s3 + $0x178] sm:$0xff] }
 0x47d   : > { %v1506_v49 = vadd.f32 %v1505_v46, %v1499_v20  ;;  %v2726_v20 = vpack.c.bf16 %v2212_v45, %v2211_v41  ;;  %v2193_v46 = vld [vmem:[%s3602_s4 + $0x4] ss:$0 sm:$0xff] }
 0x47f   : > { %v1507_v51 = vrot.slane %v1506_v49, 4 }
 0x481   : > { %v1508_v55 = vadd.f32 %v1507_v51, %v1506_v49 }
 0x483   : > { %v1509_v52 = vrot.slane %v1508_v55, 2 }
 0x485   : > { %v1510_v53 = vadd.f32 %v1509_v52, %v1508_v55 }
 0x487   : > { %v1511_v47 = vrot.slane %v1510_v53, 1 }
 0x489   : > { %v1512_v56 = vadd.f32 %v1511_v47, %v1510_v53 }
 0x48b   : > { %v1513_v57 = vmul.f32 0.015625, %v1512_v56 }
 0x48d   : > { %v1515_v24 = vadd.f32 1e-05, %v1513_v57 }
 0x48f   : > { %2792 = vrsqrt.f32 %v1515_v24 }
 0x499   : > { %v2793_v60 = vpop.eup %2792 }
 0x49a   : > { %v1517_v63 = vmul.f32 %v2793_v60, %v1514_v58 }
 0x49c   : > { %v1521_v0 = vrot.slane %v1517_v63, %v3148_v54 }
 0x49e   : > { %v1528_v3 = vmul.f32 %v1521_v0, %v1490_v10  ;;  %v1522_v8 = vmul.f32 %v1521_v0, %v1484_v9  ;;  %v1523_v11 = vmul.f32 %v1521_v0, %v1485_v34  ;;  %v1524_v12 = vmul.f32 %v1521_v0, %v1486_v36  ;;  %v2199_v9 = vld [vmem:[%s3601_s3 + $0x110] sm:$0xff]  ;;  %v2200_v34 = vld [vmem:[%s3601_s3 + $0x118] sm:$0xff] }
 0x49f   : > { %v1525_v61 = vmul.f32 %v1521_v0, %v1487_v7  ;;  %v1526_v16 = vmul.f32 %v1521_v0, %v1488_v50  ;;  %v1527_v21 = vmul.f32 %v1521_v0, %v1489_v40  ;;  %v1529_v22 = vmul.f32 %v1521_v0, %v1491_v13  ;;  %v2201_v7 = vld [vmem:[%s3601_s3 + $0x120] sm:$0xff]  ;;  %v2202_v50 = vld [vmem:[%s3601_s3 + $0x128] sm:$0xff]  ;;  %v2203_v10 = vld [vmem:[%s3601_s3 + $0x130] sm:$0xff] }
 0x4a0   : > { %v1535_v23 = vadd.f32 %v2175_v1, %v1522_v8  ;;  %v1536_v4 = vadd.f32 %v2175_v1, %v1523_v11  ;;  %v1537_v25 = vadd.f32 %v2175_v1, %v1524_v12  ;;  %v1541_v38 = vadd.f32 %v2175_v1, %v1528_v3  ;;  %v2204_v13 = vld [vmem:[%s3601_s3 + $0x138] sm:$0xff] }
 0x4a1   : > { %v1538_v29 = vadd.f32 %v2175_v1, %v1525_v61  ;;  %v1539_v30 = vadd.f32 %v2175_v1, %v1526_v16  ;;  %v1540_v35 = vadd.f32 %v2175_v1, %v1527_v21  ;;  %v1542_v43 = vadd.f32 %v2175_v1, %v1529_v22 }
 0x4a2   : > { %v1543_v27 = vmax.f32 %v1535_v23, 0.0  ;;  %v1544_v28 = vmax.f32 %v1536_v4, 0.0  ;;  %v1545_v19 = vmax.f32 %v1537_v25, 0.0  ;;  %v1549_v32 = vmax.f32 %v1541_v38, 0.0 }
 0x4a3   : > { %v1546_v26 = vmax.f32 %v1538_v29, 0.0  ;;  %v1547_v37 = vmax.f32 %v1539_v30, 0.0  ;;  %v1548_v31 = vmax.f32 %v1540_v35, 0.0  ;;  %v1550_v33 = vmax.f32 %v1542_v43, 0.0 }
 0x4a4   : > { %2530 = vmatprep.mubr.f32.mxu1 %v1543_v27  ;;  %v2702_v36 = vpack.c.bf16 %v2200_v34, %v2199_v9  ;;  %v2706_v40 = vpack.c.bf16 %v2202_v50, %v2201_v7  ;;  %v2710_v42 = vpack.c.bf16 %v2204_v13, %v2203_v10 }
 0x4a5   : > { %2531 = vmatmul.mubr.f32.vlgmr.msra.gmra.mrb[0].mxu1 %v1544_v28 }
 0x4a6   : > { %2533 = vmatprep.mubr.f32.mxu1 %v1545_v19  ;;  %2738 = vmatpush3.bf16.msra.mxu1 %v2698_v39 }
 0x4a7   : > { %2703 = vmatprep.subr.bf16.mxu0 %v2702_v36  ;;  %2731 = vmatprep.subr.bf16.mxu1 %v2702_v36 }
 0x4a8   : > { %2705 = vmatpush3.bf16.msra.mxu0 %v2702_v36 }
 0x4a9   : > { %2534 = vmatmul.mubr.f32.gmra.mrb[2].mxu1 %v1546_v26  ;;  %2707 = vmatprep.subr.bf16.mxu0 %v2706_v40 }
 0x4aa   : > { %2536 = vmatprep.mubr.f32.mxu1 %v1547_v37  ;;  %2739 = vmatpush3.bf16.msra.mxu1 %v2702_v36 }
 0x4ab   : > { %2732 = vmatprep.subr.bf16.mxu1 %v2706_v40 }
 0x4ac   : > { %2709 = vmatpush3.bf16.msra.mxu0 %v2706_v40 }
 0x4ad   : > { %2537 = vmatmul.mubr.f32.gmra.mrb[4].mxu1 %v1548_v31  ;;  %2711 = vmatprep.subr.bf16.mxu0 %v2710_v42 }
 0x4ae   : > { %2539 = vmatprep.mubr.f32.mxu1 %v1549_v32  ;;  %2740 = vmatpush3.bf16.msra.mxu1 %v2706_v40 }
 0x4af   : > { %2733 = vmatprep.subr.bf16.mxu1 %v2710_v42 }
 0x4b0   : > { %2713 = vmatpush3.bf16.msra.mxu0 %v2710_v42 }
 0x4b1   : > { %2540 = vmatmul.mubr.f32.gmra.mrb[6].mxu1 %v1550_v33  ;;  %2715 = vmatprep.subr.bf16.mxu0 %v2714_v17 }
 0x4b2   : > { %2741 = vmatpush3.bf16.msra.mxu1 %v2710_v42 }
 0x4b3   : > { %2734 = vmatprep.subr.bf16.mxu1 %v2714_v17 }
 0x4b4   : > { %2717 = vmatpush3.bf16.msra.mxu0 %v2714_v17 }
 0x4b5   : > { %2719 = vmatprep.subr.bf16.mxu0 %v2718_v62 }
 0x4b6   : > { %2742 = vmatpush3.bf16.msra.mxu1 %v2714_v17 }
 0x4b7   : > { %2735 = vmatprep.subr.bf16.mxu1 %v2718_v62 }
 0x4b8   : > { %2721 = vmatpush3.bf16.msra.mxu0 %v2718_v62 }
 0x4b9   : > { %2723 = vmatprep.subr.bf16.mxu0 %v2722_v15 }
 0x4ba   : > { %2743 = vmatpush3.bf16.msra.mxu1 %v2718_v62 }
 0x4bb   : > { %2736 = vmatprep.subr.bf16.mxu1 %v2722_v15 }
 0x4bc   : > { %2725 = vmatpush3.bf16.msra.mxu0 %v2722_v15 }
 0x4bd   : > { %2727 = vmatprep.subr.bf16.mxu0 %v2726_v20 }
 0x4be   : > { %2744 = vmatpush3.bf16.msra.mxu1 %v2722_v15 }
 0x4bf   : > { %2737 = vmatprep.subr.bf16.mxu1 %v2726_v20 }
 0x4c0   : > { %2729 = vmatpush3.bf16.msra.mxu0 %v2726_v20 }
 0x4c2   : > { %2745 = vmatpush3.bf16.msra.mxu1 %v2726_v20  ;;  %v2194_v20 = vld [vmem:[%s3602_s4 + $0x5] sm:$0x1] }
 0x578   : > { %v2532_v49 = vpop.f32.mrb[0].mxu1 }
 0x579   : > { %v1646_v51 = vadd.f32 %v2532_v49, %v2193_v46  ;;  %v1640_v55 = vpop.f32.mrb[1].mxu1 }
 0x57a   : > { %v1641_v52 = vadd.f32 %v2193_v46, %v1640_v55  ;;  %v2196_v55 = vld [vmem:[%s3602_s4 + $0x6] ss:$0 sm:$0xff] }
 0x57c   : > { %v1679_v53 = vadd.f32 %v1646_v51, %v1641_v52  ;;  %v2535_v47 = vpop.f32.mrb[2].mxu1 }
 0x57d   : > { %v1650_v56 = vpop.f32.mrb[3].mxu1  ;;  %v1656_v24 = vadd.f32 %v2535_v47, %v2193_v46 }
 0x57e   : > { %v1651_v57 = vadd.f32 %v2193_v46, %v1650_v56 }
 0x580   : > { %v1680_v58 = vadd.f32 %v1679_v53, %v1651_v57  ;;  %v2538_v60 = vpop.f32.mrb[4].mxu1 }
 0x581   : > { %v1660_v63 = vpop.f32.mrb[5].mxu1  ;;  %v1666_v3 = vadd.f32 %v2538_v60, %v2193_v46 }
 0x582   : > { %v1661_v0 = vadd.f32 %v2193_v46, %v1660_v63  ;;  %v1681_v1 = vadd.f32 %v1680_v58, %v1656_v24 }
 0x584   : > { %v1682_v8 = vadd.f32 %v1681_v1, %v1661_v0  ;;  %v2541_v11 = vpop.f32.mrb[6].mxu1 }
 0x585   : > { %v1670_v12 = vpop.f32.mrb[7].mxu1  ;;  %v1676_v21 = vadd.f32 %v2541_v11, %v2193_v46 }
 0x586   : > { %v1671_v61 = vadd.f32 %v2193_v46, %v1670_v12  ;;  %v1683_v16 = vadd.f32 %v1682_v8, %v1666_v3 }
 0x588   : > { %v1684_v22 = vadd.f32 %v1683_v16, %v1671_v61 }
 0x58a   : > { %v1685_v23 = vadd.f32 %v1684_v22, %v1676_v21 }
 0x58c   : > { %v1686_v4 = vrot.slane %v1685_v23, 4 }
 0x58e   : > { %v1687_v25 = vadd.f32 %v1686_v4, %v1685_v23 }
 0x590   : > { %v1688_v27 = vrot.slane %v1687_v25, 2 }
 0x592   : > { %v1689_v28 = vadd.f32 %v1688_v27, %v1687_v25 }
 0x594   : > { %v1690_v29 = vrot.slane %v1689_v28, 1 }
 0x596   : > { %v1691_v19 = vadd.f32 %v1690_v29, %v1689_v28  ;;  %v2214_v29 = vld [vmem:[%s3602_s4 + $0x8] ss:$0 sm:$0xff] }
 0x598   : > { %v1692_v30 = vmul.f32 0.015625, %v1691_v19 }
 0x59a   : > { %v1693_v26 = vsub.f32 %v1641_v52, %v1692_v30  ;;  %v1694_v35 = vsub.f32 %v1646_v51, %v1692_v30  ;;  %v1695_v37 = vsub.f32 %v1651_v57, %v1692_v30  ;;  %v1696_v38 = vsub.f32 %v1656_v24, %v1692_v30 }
 0x59b   : > { %v1697_v31 = vsub.f32 %v1661_v0, %v1692_v30  ;;  %v1698_v43 = vsub.f32 %v1666_v3, %v1692_v30  ;;  %v1699_v32 = vsub.f32 %v1671_v61, %v1692_v30  ;;  %v1700_v33 = vsub.f32 %v1676_v21, %v1692_v30 }
 0x59c   : > { %v1701_v44 = vmul.f32 %v1693_v26, %v1693_v26  ;;  %v1702_v6 = vmul.f32 %v1694_v35, %v1694_v35  ;;  %v1703_v39 = vmul.f32 %v1695_v37, %v1695_v37  ;;  %v1704_v34 = vmul.f32 %v1696_v38, %v1696_v38 }
 0x59d   : > { %v1705_v7 = vmul.f32 %v1697_v31, %v1697_v31  ;;  %v1706_v40 = vmul.f32 %v1698_v43, %v1698_v43  ;;  %v1707_v13 = vmul.f32 %v1699_v32, %v1699_v32  ;;  %v1708_v59 = vmul.f32 %v1700_v33, %v1700_v33 }
 0x59e   : > { %v1709_v9 = vadd.f32 %v1702_v6, %v1701_v44 }
 0x5a0   : > { %v1710_v36 = vadd.f32 %v1709_v9, %v1703_v39 }
 0x5a2   : > { %v1711_v50 = vadd.f32 %v1710_v36, %v1704_v34 }
 0x5a4   : > { %v1712_v10 = vadd.f32 %v1711_v50, %v1705_v7 }
 0x5a6   : > { %v1713_v42 = vadd.f32 %v1712_v10, %v1706_v40 }
 0x5a8   : > { %v1714_v14 = vadd.f32 %v1713_v42, %v1707_v13 }
 0x5aa   : > { %v1715_v17 = vadd.f32 %v1714_v14, %v1708_v59 }
 0x5ac   : > { %v1716_v18 = vrot.slane %v1715_v17, 4 }
 0x5ae   : > { %v1717_v48 = vadd.f32 %v1716_v18, %v1715_v17 }
 0x5b0   : > { %v1718_v62 = vrot.slane %v1717_v48, 2 }
 0x5b2   : > { %v1719_v2 = vadd.f32 %v1718_v62, %v1717_v48 }
 0x5b4   : > { %v1720_v5 = vrot.slane %v1719_v2, 1 }
 0x5b6   : > { %v1721_v15 = vadd.f32 %v1720_v5, %v1719_v2 }
 0x5b8   : > { %v1722_v41 = vmul.f32 0.015625, %v1721_v15 }
 0x5ba   : > { %v1724_v45 = vadd.f32 1e-05, %v1722_v41 }
 0x5bc   : > { %2794 = vrsqrt.f32 %v1724_v45 }
 0x5c6   : > { %v2795_v46 = vpop.eup %2794 }
 0x5c7   : > { %v1726_v49 = vmul.f32 %v2795_v46, %v2194_v20 }
 0x5c9   : > { %v1730_v51 = vrot.slane %v1726_v49, %v3148_v54 }
 0x5cb   : > { %v1737_v52 = vmul.f32 %v1730_v51, %v1699_v32  ;;  %v1731_v53 = vmul.f32 %v1730_v51, %v1693_v26  ;;  %v1735_v47 = vmul.f32 %v1730_v51, %v1697_v31  ;;  %v1732_v56 = vmul.f32 %v1730_v51, %v1694_v35 }
 0x5cc   : > { %v1736_v57 = vmul.f32 %v1730_v51, %v1698_v43  ;;  %v1733_v24 = vmul.f32 %v1730_v51, %v1695_v37  ;;  %v1734_v58 = vmul.f32 %v1730_v51, %v1696_v38  ;;  %v1738_v60 = vmul.f32 %v1730_v51, %v1700_v33 }
 0x5cd   : > { %v1744_v63 = vadd.f32 %v2196_v55, %v1731_v53  ;;  %v1748_v0 = vadd.f32 %v2196_v55, %v1735_v47  ;;  %v1745_v1 = vadd.f32 %v2196_v55, %v1732_v56  ;;  %v1750_v3 = vadd.f32 %v2196_v55, %v1737_v52 }
 0x5ce   : > { %v1749_v8 = vadd.f32 %v2196_v55, %v1736_v57  ;;  %v1746_v11 = vadd.f32 %v2196_v55, %v1733_v24  ;;  %v1747_v22 = vadd.f32 %v2196_v55, %v1734_v58  ;;  %v1751_v23 = vadd.f32 %v2196_v55, %v1738_v60 }
 0x5cf   : > { %v1752_v12 = vmax.f32 %v1744_v63, 0.0  ;;  %v1756_v61 = vmax.f32 %v1748_v0, 0.0  ;;  %v1753_v16 = vmax.f32 %v1745_v1, 0.0  ;;  %v1758_v25 = vmax.f32 %v1750_v3, 0.0 }
 0x5d0   : > { %v1757_v21 = vmax.f32 %v1749_v8, 0.0  ;;  %v1754_v4 = vmax.f32 %v1746_v11, 0.0  ;;  %v1755_v27 = vmax.f32 %v1747_v22, 0.0  ;;  %v1759_v28 = vmax.f32 %v1751_v23, 0.0 }
 0x5d1   : > { %2574 = vmatprep.mubr.f32.mxu0 %v1752_v12  ;;  %2580 = vmatprep.mubr.f32.mxu1 %v1756_v61 }
 0x5d2   : > { %2575 = vmatmul.mubr.f32.vlgmr.msra.gmra.mrb[8].mxu0 %v1753_v16  ;;  %2581 = vmatmul.mubr.f32.vlgmr.msra.gmra.mrb[8].mxu1 %v1757_v21 }
 0x5d3   : > { %2577 = vmatprep.mubr.f32.mxu0 %v1754_v4  ;;  %2583 = vmatprep.mubr.f32.mxu1 %v1758_v25 }
 0x5d6   : > { %2578 = vmatmul.mubr.f32.gmra.mrb[10].mxu0 %v1755_v27  ;;  %2584 = vmatmul.mubr.f32.gmra.mrb[10].mxu1 %v1759_v28  ;;  %v2215_v28 = vld [vmem:[%s3602_s4 + $0x9] sm:$0x1] }
 0x6a5   : > { %v2576_v19 = vpop.f32.mrb[8].mxu0  ;;  %v2582_v30 = vpop.f32.mrb[8].mxu1 }
 0x6a6   : > { %v1855_v26 = vadd.f32 %v2576_v19, %v2214_v29  ;;  %v1849_v35 = vpop.f32.mrb[9].mxu0  ;;  %v1869_v37 = vpop.f32.mrb[9].mxu1  ;;  %v1875_v7 = vadd.f32 %v2582_v30, %v2214_v29 }
 0x6a7   : > { %v1850_v38 = vadd.f32 %v2214_v29, %v1849_v35  ;;  %v1870_v34 = vadd.f32 %v2214_v29, %v1869_v37 }
 0x6a9   : > { %v1888_v31 = vadd.f32 %v1855_v26, %v1850_v38  ;;  %v2579_v43 = vpop.f32.mrb[10].mxu0  ;;  %v2585_v32 = vpop.f32.mrb[10].mxu1 }
 0x6aa   : > { %v1859_v33 = vpop.f32.mrb[11].mxu0  ;;  %v1879_v44 = vpop.f32.mrb[11].mxu1  ;;  %v1865_v39 = vadd.f32 %v2579_v43, %v2214_v29  ;;  %v1885_v13 = vadd.f32 %v2585_v32, %v2214_v29 }
 0x6ab   : > { %v1860_v6 = vadd.f32 %v2214_v29, %v1859_v33  ;;  %v1880_v40 = vadd.f32 %v2214_v29, %v1879_v44 }
 0x6ad   : > { %v1889_v9 = vadd.f32 %v1888_v31, %v1860_v6 }
 0x6af   : > { %v1890_v36 = vadd.f32 %v1889_v9, %v1865_v39 }
 0x6b1   : > { %v1891_v50 = vadd.f32 %v1890_v36, %v1870_v34 }
 0x6b3   : > { %v1892_v10 = vadd.f32 %v1891_v50, %v1875_v7 }
 0x6b5   : > { %v1893_v42 = vadd.f32 %v1892_v10, %v1880_v40 }
 0x6b7   : > { %v1894_v59 = vadd.f32 %v1893_v42, %v1885_v13 }
 0x6b9   : > { %v1895_v14 = vrot.slane %v1894_v59, 4 }
 0x6bb   : > { %v1896_v17 = vadd.f32 %v1895_v14, %v1894_v59 }
 0x6bd   : > { %v1897_v18 = vrot.slane %v1896_v17, 2 }
 0x6bf   : > { %v1898_v48 = vadd.f32 %v1897_v18, %v1896_v17 }
 0x6c1   : > { %v1899_v62 = vrot.slane %v1898_v48, 1 }
 0x6c3   : > { %v1900_v2 = vadd.f32 %v1899_v62, %v1898_v48 }
 0x6c5   : > { %v1901_v5 = vmul.f32 0.015625, %v1900_v2 }
 0x6c7   : > { %v1902_v15 = vsub.f32 %v1850_v38, %v1901_v5  ;;  %v1903_v41 = vsub.f32 %v1855_v26, %v1901_v5  ;;  %v1904_v45 = vsub.f32 %v1860_v6, %v1901_v5  ;;  %v1905_v20 = vsub.f32 %v1865_v39, %v1901_v5  ;;  %v2217_v26 = vld [vmem:[%s3602_s4 + $0xa] ss:$0 sm:$0xff] }
 0x6c8   : > { %v1906_v46 = vsub.f32 %v1870_v34, %v1901_v5  ;;  %v1907_v49 = vsub.f32 %v1875_v7, %v1901_v5  ;;  %v1908_v51 = vsub.f32 %v1880_v40, %v1901_v5  ;;  %v1909_v55 = vsub.f32 %v1885_v13, %v1901_v5 }
 0x6c9   : > { %v1910_v52 = vmul.f32 %v1902_v15, %v1902_v15  ;;  %v1911_v53 = vmul.f32 %v1903_v41, %v1903_v41  ;;  %v1912_v47 = vmul.f32 %v1904_v45, %v1904_v45  ;;  %v1913_v57 = vmul.f32 %v1905_v20, %v1905_v20 }
 0x6ca   : > { %v1914_v58 = vmul.f32 %v1906_v46, %v1906_v46  ;;  %v1915_v63 = vmul.f32 %v1907_v49, %v1907_v49  ;;  %v1916_v1 = vmul.f32 %v1908_v51, %v1908_v51  ;;  %v1917_v8 = vmul.f32 %v1909_v55, %v1909_v55 }
 0x6cb   : > { %v1918_v56 = vadd.f32 %v1911_v53, %v1910_v52 }
 0x6cd   : > { %v1919_v24 = vadd.f32 %v1918_v56, %v1912_v47 }
 0x6cf   : > { %v1920_v60 = vadd.f32 %v1919_v24, %v1913_v57 }
 0x6d1   : > { %v1921_v0 = vadd.f32 %v1920_v60, %v1914_v58 }
 0x6d3   : > { %v1922_v3 = vadd.f32 %v1921_v0, %v1915_v63 }
 0x6d5   : > { %v1923_v11 = vadd.f32 %v1922_v3, %v1916_v1 }
 0x6d7   : > { %v1924_v12 = vadd.f32 %v1923_v11, %v1917_v8 }
 0x6d9   : > { %v1925_v61 = vrot.slane %v1924_v12, 4 }
 0x6db   : > { %v1926_v16 = vadd.f32 %v1925_v61, %v1924_v12 }
 0x6dd   : > { %v1927_v21 = vrot.slane %v1926_v16, 2 }
 0x6df   : > { %v1928_v22 = vadd.f32 %v1927_v21, %v1926_v16 }
 0x6e1   : > { %v1929_v23 = vrot.slane %v1928_v22, 1 }
 0x6e3   : > { %v1930_v4 = vadd.f32 %v1929_v23, %v1928_v22 }
 0x6e5   : > { %v1931_v25 = vmul.f32 0.015625, %v1930_v4 }
 0x6e7   : > { %v1933_v27 = vadd.f32 1e-05, %v1931_v25 }
 0x6e9   : > { %2796 = vrsqrt.f32 %v1933_v27 }
 0x6f3   : > { %v2797_v29 = vpop.eup %2796 }
 0x6f4   : > { %v1935_v19 = vmul.f32 %v2797_v29, %v2215_v28 }
 0x6f6   : > { %v1939_v30 = vrot.slane %v1935_v19, %v3148_v54 }
 0x6f8   : > { %v1940_v35 = vmul.f32 %v1939_v30, %v1902_v15  ;;  %v1941_v37 = vmul.f32 %v1939_v30, %v1903_v41  ;;  %v1942_v38 = vmul.f32 %v1939_v30, %v1904_v45  ;;  %v1943_v31 = vmul.f32 %v1939_v30, %v1905_v20 }
 0x6f9   : > { %v1944_v43 = vmul.f32 %v1939_v30, %v1906_v46  ;;  %v1945_v32 = vmul.f32 %v1939_v30, %v1907_v49  ;;  %v1946_v33 = vmul.f32 %v1939_v30, %v1908_v51  ;;  %v1947_v44 = vmul.f32 %v1939_v30, %v1909_v55 }
 0x6fa   : > { %v1953_v6 = vadd.f32 %v2217_v26, %v1940_v35  ;;  %v1954_v39 = vadd.f32 %v2217_v26, %v1941_v37  ;;  %v1955_v9 = vadd.f32 %v2217_v26, %v1942_v38  ;;  %v1956_v34 = vadd.f32 %v2217_v26, %v1943_v31 }
 0x6fb   : > { %v1957_v36 = vadd.f32 %v2217_v26, %v1944_v43  ;;  %v1958_v7 = vadd.f32 %v2217_v26, %v1945_v32  ;;  %v1959_v50 = vadd.f32 %v2217_v26, %v1946_v33  ;;  %v1960_v54 = vadd.f32 %v2217_v26, %v1947_v44 }
 0x6fc   : > { %v1961_v40 = vmax.f32 %v1953_v6, 0.0  ;;  %v1962_v10 = vmax.f32 %v1954_v39, 0.0  ;;  %v1963_v13 = vmax.f32 %v1955_v9, 0.0  ;;  %v1964_v42 = vmax.f32 %v1956_v34, 0.0 }
 0x6fd   : > { %v1965_v59 = vmax.f32 %v1957_v36, 0.0  ;;  %v1966_v14 = vmax.f32 %v1958_v7, 0.0  ;;  %v1967_v17 = vmax.f32 %v1959_v50, 0.0  ;;  %v1968_v18 = vmax.f32 %v1960_v54, 0.0 }
 0x6fe   : > { %1969 = vst [vmem:[#allocation3] sm:$0xff] %v1961_v40  ;;  %1970 = vst [vmem:[#allocation3 + $0x8] sm:$0xff] %v1962_v10 }
 0x6ff   : > { %1971 = vst [vmem:[#allocation3 + $0x10] sm:$0xff] %v1963_v13  ;;  %1972 = vst [vmem:[#allocation3 + $0x18] sm:$0xff] %v1964_v42 }
 0x700   : > { %1973 = vst [vmem:[#allocation3 + $0x20] sm:$0xff] %v1965_v59  ;;  %1974 = vst [vmem:[#allocation3 + $0x28] sm:$0xff] %v1966_v14 }
 0x701   : > { %1975 = vst [vmem:[#allocation3 + $0x30] sm:$0xff] %v1967_v17  ;;  %1976 = vst [vmem:[#allocation3 + $0x38] sm:$0xff] %v1968_v18 }
 0x702 PF: > { %p2750_p7 = scmp.eq.s32.totalorder %s2881_s19, 2  ;;  %s2842_s22 = smov [#allocation3]  }
 0x703   : > { %s1983_s23 = sshll.u32 %s2842_s22, 4  ;;  %s1984_s23 = int_to_ptr.vmem [resolvable:$true] %s1983_s23 }
 0x704   : > { %s2798_s24 = scalar_lea.vmem %s1984_s23, 1024  ;;  %p2805_p11 = scmp.lt.s32.totalorder %s1984_s23, %s1984_s23 }
 0x705   : > { %p2799_p8 = scmp.ne.s32.totalorder %s1984_s23, %s2798_s24  ;;  %p2806_p12 = scmp.lt.s32.totalorder %s2798_s24, %s2798_s24 }
 0x707   : > { %p2800_p9 = pnand %p2799_p8, %p2750_p7  ;;  %p2807_p13 = por %p2806_p12, %p2805_p11 }
 0x709   : > { %p2801_p10 = pneg %p2800_p9 }
 0x70b   : > { %p2808_p0 = pnand %p2807_p13, %p2801_p10 }
 0x70d   : > { %2811 = shalt.err (!%p2808_p0)
}
 0x70e   : > { %s2812_s27 = scalar_lea.hbm %s3603_s5, 1024 }
 0x70f   : > { %p2813_p1 = scmp.ne.s32.totalorder %s3603_s5, %s2812_s27  ;;  %p2818_p4 = scmp.lt.u32.totalorder %s2812_s27, %s3603_s5 }
 0x711   : > { %p2814_p2 = pnand %p2813_p1, %p2750_p7 }
 0x713   : > { %p2815_p3 = pneg %p2814_p2 }
 0x715   : > { %p2820_p5 = pnand %p2818_p4, %p2815_p3 }
 0x717   : > { %2823 = shalt.err (!%p2820_p5)
}
 0x718   : > { %s2843_s7 = smov 128   ;;  %s2844_s8 = smov 8  }
 0x719   : > { %2747 = dma.vmem_to_hbm [thread:$0]  (%p2750_p7), %s1984_s23, 1024, %s3603_s5, [#allocation4], %s2843_s7, %s2843_s7, %s2844_s8  }
 0x71a   : > { %2829 = dma.done.wait (%p2750_p7), [#allocation4], 1024  }
 0x71b   : > { %2831 = vsyncadd (%p2750_p7), [#allocation4], 4294966272 }
 0x71c PF: > { %s16_s18 = sadd.s32 1, %s2834_s18  }
 0x71d   : > { %p13_p6 = scmp.ge.s32.totalorder %s16_s18, 5  }
 0x71f   :  { %15 = sbr.rel (!%p13_p6) target bundleno = 1 (0x1), region = 82 }
 0x726   :  { %1999 = vsyncpa [#allocation4], 1 }
 0x727   :  { %2001 = vsyncpa [#allocation4 + $0x1], 1 }

// kernel: tpu_custom_call.1
= control target key start
LH: loop header
LB: loop body
LE: loop exit
PB: predicated region body
PF: predicated region fallthrough
CT: control target
= control target key end

     0   :  { %10 = vsyncpa [#allocation4], 0  ;;  %s2875_s18 = smov 0   ;;  %s3598_s0 = inlined_call_operand.vmem [shape: s32[768,2], index: 0, kind: input, shape index: {}]   ;;  %s3599_s1 = inlined_call_operand.vmem [shape: s32[3,1,256], index: 1, kind: input, shape index: {}]   ;;  %s3600_s2 = inlined_call_operand.vmem [shape: f32[64,128], index: 2, kind: input, shape index: {}]   ;;  %s3601_s3 = inlined_call_operand.vmem [shape: f32[3,128,128], index: 3, kind: input, shape index: {}]   ;;  %s3602_s4 = inlined_call_operand.vmem [shape: f32[3,3,128], index: 4, kind: input, shape index: {}]   ;;  %s3603_s5 = inlined_call_operand.hbm [shape: f32[64,128], index: 5, kind: output, shape index: {}]  }
   0x1 LB: > { %s2881_s19 = sadd.s32 4294967295, %s2834_s18   ;;  %p2040_p0 = scmp.ge.s32.totalorder %s2834_s18, 1  ;;  %s2834_s18 = sphi %s2875_s18, %s16_s18  }
   0x2   : > { %p193_p1 = scmp.lt.s32.totalorder %s2834_s18, 4 }
   0x4   : > { %p194_p2 = pnand %p2040_p0, %p193_p1 }
   0x5   : > { %s2041_s20 = sshll.u32 (!%p194_p2), %s2881_s19, 5  ;;  %p226_p3 = scmp.lt.s32.totalorder (!%p194_p2), %s2881_s19, 2 }
   0x6   : > { %197 = sbr.rel (%p194_p2) target bundleno = 1820 (0x71c), region = 40  ;;  %p221_p4 = scmp.lt.s32.totalorder (!%p194_p2), %s2041_s20, 95 }
   0x7   : > { %p2044_p5 = scmp.ne.s32.totalorder (!%p194_p2), %s2881_s19, 0 }
   0xd   : > { %s227_s21 = scalar_select %p226_p3, %s2881_s19, 2 }
   0xe   : > { %s3605_s20 = smov (!%p221_p4, %s2041_s20), 95  ;;  %233 = sbr.rel (%p2044_p5) target bundleno = 21 (0x15), region = 44 }
   0xf   : > { %s2043_s22 = sshll.u32 %s227_s21, 1  ;;  %s2042_s23 = sshll.u32 %s3605_s20, 3  ;;  %v2836_v0 = vmov (!%p2044_p5), 0.0  }
  0x10   : > { %s2891_s26 = scalar_lea.vmem %s3599_s1, %s2043_s22  ;;  %s2896_s29 = scalar_lea.vmem %s3598_s0, %s2042_s23  ;;  %234 = vst [vmem:[#allocation2] sm:$0xff] (!%p2044_p5), %v2836_v0  ;;  %235 = vst [vmem:[#allocation2 + $0x8] sm:$0xff] (!%p2044_p5), %v2836_v0 }
  0x11   : > { %236 = vst [vmem:[#allocation2 + $0x10] sm:$0xff] (!%p2044_p5), %v2836_v0  ;;  %237 = vst [vmem:[#allocation2 + $0x18] sm:$0xff] (!%p2044_p5), %v2836_v0 }
  0x12   : > { %238 = vst [vmem:[#allocation2 + $0x20] sm:$0xff] (!%p2044_p5), %v2836_v0  ;;  %239 = vst [vmem:[#allocation2 + $0x28] sm:$0xff] (!%p2044_p5), %v2836_v0 }
  0x13   : > { %240 = vst [vmem:[#allocation2 + $0x30] sm:$0xff] (!%p2044_p5), %v2836_v0  ;;  %241 = vst [vmem:[#allocation2 + $0x38] sm:$0xff] (!%p2044_p5), %v2836_v0 }
  0x15 PF: > { %v251_v1 = vld [vmem:[%s2896_s29 + $0x8] sm:$0xff]  ;;  %v250_v2 = vld [vmem:[%s2896_s29] sm:$0xff]  ;;  %v2837_v3 = vmov 0   ;;  %v2838_v4 = vmov 1   ;;  %v252_v5 = vld [vmem:[%s2896_s29 + $0x10] sm:$0xff]  ;;  %v283_v47 = vlaneseq  ;;  %vm701_vm4 = vcmask 523264  }
  0x16   : > { %2771 = vset.pattern.permute.xlu1 %v2837_v3  ;;  %2769 = vset.pattern.permute.xlu0 %v2837_v3  ;;  %v2905_v6 = vld [vmem:[%s3600_s2] sm:$0xff]  ;;  %v2910_v7 = vld [vmem:[%s3600_s2 + $0x8] sm:$0xff]  ;;  %v2917_v9 = vld [vmem:[%s3600_s2 + $0x10] sm:$0xff]  ;;  %v2839_v53 = vmov 0.0   ;;  %p2173_p6 = scmp.ne.s32.totalorder %s2881_s19, 2 }
  0x17   : > { %289 = vperm.xlu1 %2771, %v251_v1   ;;  %286 = vperm.xlu0 %2769, %v250_v2   ;;  %v2586_v8 = vpack.c.bf16 %v2910_v7, %v2905_v6  ;;  %v2922_v10 = vld [vmem:[%s3600_s2 + $0x18] sm:$0xff]  ;;  %v2930_v13 = vld [vmem:[%s3600_s2 + $0x20] sm:$0xff]  ;;  %v2935_v14 = vld [vmem:[%s3600_s2 + $0x28] sm:$0xff]  ;;  %v2980_v48 = vand.u32 127, %v283_v47 }
  0x18   : > { %v253_v11 = vld [vmem:[%s2896_s29 + $0x18] sm:$0xff]  ;;  %v2590_v12 = vpack.c.bf16 %v2922_v10, %v2917_v9  ;;  %v2594_v15 = vpack.c.bf16 %v2935_v14, %v2930_v13  ;;  %v254_v16 = vld [vmem:[%s2896_s29 + $0x20] sm:$0xff]  ;;  %v2943_v17 = vld [vmem:[%s3600_s2 + $0x30] sm:$0xff] }
  0x19   : > { %2587 = vmatprep.subr.bf16.mxu0 %v2586_v8  ;;  %v2948_v18 = vld [vmem:[%s3600_s2 + $0x38] sm:$0xff]  ;;  %v255_v20 = vld [vmem:[%s2896_s29 + $0x28] sm:$0xff]  ;;  %v256_v21 = vld [vmem:[%s2896_s29 + $0x30] sm:$0xff] }
  0x1a   : > { %2589 = vmatpush3.bf16.msra.mxu0 %v2586_v8  ;;  %v2598_v19 = vpack.c.bf16 %v2948_v18, %v2943_v17  ;;  %v257_v22 = vld [vmem:[%s2896_s29 + $0x38] sm:$0xff]  ;;  %v258_v23 = vld [vmem:[%s2896_s29 + $0x40] sm:$0xff]  ;;  %v259_v24 = vld [vmem:[%s2896_s29 + $0x48] sm:$0xff] }
  0x1b   : > { %2772 = vset.pattern.permute.xlu1 %v2838_v4  ;;  %2770 = vset.pattern.permute.xlu0 %v2838_v4  ;;  %v260_v25 = vld [vmem:[%s2896_s29 + $0x50] sm:$0xff]  ;;  %v261_v26 = vld [vmem:[%s2896_s29 + $0x58] sm:$0xff]  ;;  %v262_v27 = vld [vmem:[%s2896_s29 + $0x60] sm:$0xff] }
  0x1c   : > { %481 = vperm.xlu1 %2772, %v251_v1   ;;  %478 = vperm.xlu0 %2770, %v250_v2   ;;  %v263_v28 = vld [vmem:[%s2896_s29 + $0x68] sm:$0xff]  ;;  %v264_v29 = vld [vmem:[%s2896_s29 + $0x70] sm:$0xff]  ;;  %v265_v30 = vld [vmem:[%s2896_s29 + $0x78] sm:$0xff] }
  0x1d   : > { %2591 = vmatprep.subr.bf16.mxu0 %v2590_v12  ;;  %v266_v31 = vld [vmem:[%s2896_s29 + $0x80] sm:$0xff]  ;;  %v267_v32 = vld [vmem:[%s2896_s29 + $0x88] sm:$0xff]  ;;  %v268_v33 = vld [vmem:[%s2896_s29 + $0x90] sm:$0xff] }
  0x1e   : > { %2593 = vmatpush3.bf16.msra.mxu0 %v2590_v12  ;;  %v269_v34 = vld [vmem:[%s2896_s29 + $0x98] sm:$0xff]  ;;  %v270_v35 = vld [vmem:[%s2896_s29 + $0xa0] sm:$0xff]  ;;  %v271_v36 = vld [vmem:[%s2896_s29 + $0xa8] sm:$0xff] }
  0x1f   : > { %2595 = vmatprep.subr.bf16.mxu0 %v2594_v15  ;;  %v272_v37 = vld [vmem:[%s2896_s29 + $0xb0] sm:$0xff]  ;;  %v273_v38 = vld [vmem:[%s2896_s29 + $0xb8] sm:$0xff]  ;;  %v274_v39 = vld [vmem:[%s2896_s29 + $0xc0] sm:$0xff] }
  0x20   : > { %2773 = vset.pattern.permute.xlu1 %v2837_v3  ;;  %484 = vperm.xlu0 %2770, %v252_v5   ;;  %v275_v40 = vld [vmem:[%s2896_s29 + $0xc8] sm:$0xff]  ;;  %v276_v41 = vld [vmem:[%s2896_s29 + $0xd0] sm:$0xff]  ;;  %v277_v42 = vld [vmem:[%s2896_s29 + $0xd8] sm:$0xff] }
  0x21   : > { %292 = vperm.xlu1 %2773, %v252_v5   ;;  %v278_v43 = vld [vmem:[%s2896_s29 + $0xe0] sm:$0xff]  ;;  %v279_v44 = vld [vmem:[%s2896_s29 + $0xe8] sm:$0xff]  ;;  %v280_v45 = vld [vmem:[%s2896_s29 + $0xf0] sm:$0xff] }
  0x22   : > { %2597 = vmatpush3.bf16.msra.mxu0 %v2594_v15  ;;  %v281_v46 = vld [vmem:[%s2896_s29 + $0xf8] sm:$0xff] }
  0x23   : > { %2599 = vmatprep.subr.bf16.mxu0 %v2598_v19 }
  0x24   : > { %487 = vperm.xlu0 %2770, %v253_v11  }
  0x25   : > { %295 = vperm.xlu1 %2773, %v253_v11  }
  0x26   : > { %2601 = vmatpush3.bf16.msra.mxu0 %v2598_v19 }
  0x28   : > { %490 = vperm.xlu0 %2770, %v254_v16  }
  0x29   : > { %298 = vperm.xlu1 %2773, %v254_v16  }
  0x2c   : > { %493 = vperm.xlu0 %2770, %v255_v20  }
  0x2d   : > { %301 = vperm.xlu1 %2773, %v255_v20  }
  0x30   : > { %496 = vperm.xlu0 %2770, %v256_v21  }
  0x31   : > { %304 = vperm.xlu1 %2773, %v256_v21  }
  0x34   : > { %499 = vperm.xlu0 %2770, %v257_v22  }
  0x35   : > { %307 = vperm.xlu1 %2773, %v257_v22  }
  0x38   : > { %502 = vperm.xlu0 %2770, %v258_v23  }
  0x39   : > { %310 = vperm.xlu1 %2773, %v258_v23  }
  0x3c   : > { %505 = vperm.xlu0 %2770, %v259_v24  }
  0x3d   : > { %313 = vperm.xlu1 %2773, %v259_v24  }
  0x40   : > { %508 = vperm.xlu0 %2770, %v260_v25  }
  0x41   : > { %316 = vperm.xlu1 %2773, %v260_v25  }
  0x44   : > { %511 = vperm.xlu0 %2770, %v261_v26  }
  0x45   : > { %319 = vperm.xlu1 %2773, %v261_v26  }
  0x48   : > { %514 = vperm.xlu0 %2770, %v262_v27  }
  0x49   : > { %322 = vperm.xlu1 %2773, %v262_v27  }
  0x4c   : > { %517 = vperm.xlu0 %2770, %v263_v28  }
  0x4d   : > { %325 = vperm.xlu1 %2773, %v263_v28  }
  0x50   : > { %520 = vperm.xlu0 %2770, %v264_v29  }
  0x51   : > { %328 = vperm.xlu1 %2773, %v264_v29  }
  0x54   : > { %523 = vperm.xlu0 %2770, %v265_v30  }
  0x55   : > { %331 = vperm.xlu1 %2773, %v265_v30  }
  0x58   : > { %526 = vperm.xlu0 %2770, %v266_v31  }
  0x59   : > { %334 = vperm.xlu1 %2773, %v266_v31  }
  0x5c   : > { %529 = vperm.xlu0 %2770, %v267_v32  }
  0x5d   : > { %337 = vperm.xlu1 %2773, %v267_v32  }
  0x60   : > { %532 = vperm.xlu0 %2770, %v268_v33  }
  0x61   : > { %340 = vperm.xlu1 %2773, %v268_v33  }
  0x64   : > { %535 = vperm.xlu0 %2770, %v269_v34  }
  0x65   : > { %343 = vperm.xlu1 %2773, %v269_v34  }
  0x68   : > { %538 = vperm.xlu0 %2770, %v270_v35  }
  0x69   : > { %346 = vperm.xlu1 %2773, %v270_v35  }
  0x6c   : > { %541 = vperm.xlu0 %2770, %v271_v36  }
  0x6d   : > { %349 = vperm.xlu1 %2773, %v271_v36  }
  0x70   : > { %544 = vperm.xlu0 %2770, %v272_v37  }
  0x71   : > { %352 = vperm.xlu1 %2773, %v272_v37  }
  0x74   : > { %547 = vperm.xlu0 %2770, %v273_v38  }
  0x75   : > { %355 = vperm.xlu1 %2773, %v273_v38  }
  0x78   : > { %550 = vperm.xlu0 %2770, %v274_v39  }
  0x79   : > { %358 = vperm.xlu1 %2773, %v274_v39  }
  0x7c   : > { %553 = vperm.xlu0 %2770, %v275_v40  }
  0x7d   : > { %361 = vperm.xlu1 %2773, %v275_v40  }
  0x80   : > { %556 = vperm.xlu0 %2770, %v276_v41  }
  0x81   : > { %364 = vperm.xlu1 %2773, %v276_v41  }
  0x84   : > { %559 = vperm.xlu0 %2770, %v277_v42  }
  0x85   : > { %367 = vperm.xlu1 %2773, %v277_v42  }
  0x88   : > { %562 = vperm.xlu0 %2770, %v278_v43  }
  0x89   : > { %370 = vperm.xlu1 %2773, %v278_v43  }
  0x8c   : > { %565 = vperm.xlu0 %2770, %v279_v44  }
  0x8d   : > { %373 = vperm.xlu1 %2773, %v279_v44  }
  0x90   : > { %568 = vperm.xlu0 %2770, %v280_v45  }
  0x91   : > { %376 = vperm.xlu1 %2773, %v280_v45  }
  0x94   : > { %571 = vperm.xlu0 %2770, %v281_v46  }
  0x95   : > { %379 = vperm.xlu1 %2773, %v281_v46  }
  0x96   : > { %v290_v49 = vpop.permute.xlu1 %289  ;;  %v287_v50 = vpop.permute.xlu0 %286 }
  0x97   : > { %vm382_vm0 = vcmp.eq.s32.totalorder %v2980_v48, %v290_v49  ;;  %vm381_vm1 = vcmp.eq.s32.totalorder %v2980_v48, %v287_v50 }
  0x98   : > { %v2046_v54 = vsel %vm382_vm0, 1.0, %v2839_v53  ;;  %v2045_v55 = vsel %vm381_vm1, 1.0, %v2839_v53 }
  0x9b   : > { %v482_v51 = vpop.permute.xlu1 %481  ;;  %v479_v52 = vpop.permute.xlu0 %478 }
  0x9c   : > { %vm574_vm2 = vcmp.eq.s32.totalorder %v2980_v48, %v482_v51  ;;  %vm573_vm3 = vcmp.eq.s32.totalorder %v2980_v48, %v479_v52 }
  0x9d   : > { %v2078_v56 = vsel %vm574_vm2, 1.0, %v2839_v53  ;;  %v2077_v57 = vsel %vm573_vm3, 1.0, %v2839_v53 }
  0x9e   : > { %v670_v58 = vsub.f32 %v2046_v54, %v2078_v56  ;;  %v669_v59 = vsub.f32 %v2045_v55, %v2077_v57 }
  0x9f   : > { %v485_v60 = vpop.permute.xlu0 %484 }
  0xa0   : > { %vm575_vm5 = vcmp.eq.s32.totalorder %v2980_v48, %v485_v60  ;;  %v293_v61 = vpop.permute.xlu1 %292  ;;  %2406 = vmatprep.mubr.msk.f32.mxu0 %vm701_vm4, %v669_v59 }
  0xa1   : > { %v2079_v62 = vsel %vm575_vm5, 1.0, %v2839_v53  ;;  %vm383_vm6 = vcmp.eq.s32.totalorder %v2980_v48, %v293_v61  ;;  %2407 = vmatmul.mubr.msk.f32.vlgmr.msra.gmra.mrb[0].mxu0 %vm701_vm4, %v670_v58 }
  0xa2   : > { %v2047_v63 = vsel %vm383_vm6, 1.0, %v2839_v53 }
  0xa3   : > { %v671_v0 = vsub.f32 %v2047_v63, %v2079_v62  ;;  %v488_v1 = vpop.permute.xlu0 %487 }
  0xa4   : > { %vm576_vm7 = vcmp.eq.s32.totalorder %v2980_v48, %v488_v1  ;;  %v296_v2 = vpop.permute.xlu1 %295 }
  0xa5   : > { %v2080_v3 = vsel %vm576_vm7, 1.0, %v2839_v53  ;;  %vm384_vm8 = vcmp.eq.s32.totalorder %v2980_v48, %v296_v2  ;;  %2409 = vmatprep.mubr.msk.f32.mxu0 %vm701_vm4, %v671_v0 }
  0xa6   : > { %v2048_v4 = vsel %vm384_vm8, 1.0, %v2839_v53 }
  0xa7   : > { %v672_v5 = vsub.f32 %v2048_v4, %v2080_v3  ;;  %v491_v8 = vpop.permute.xlu0 %490 }
  0xa8   : > { %vm577_vm9 = vcmp.eq.s32.totalorder %v2980_v48, %v491_v8  ;;  %v299_v11 = vpop.permute.xlu1 %298 }
  0xa9   : > { %v2081_v12 = vsel %vm577_vm9, 1.0, %v2839_v53  ;;  %vm385_vm10 = vcmp.eq.s32.totalorder %v2980_v48, %v299_v11  ;;  %2410 = vmatmul.mubr.msk.f32.gmra.mrb[2].mxu0 %vm701_vm4, %v672_v5 }
  0xaa   : > { %v2049_v15 = vsel %vm385_vm10, 1.0, %v2839_v53 }
  0xab   : > { %v673_v16 = vsub.f32 %v2049_v15, %v2081_v12  ;;  %v494_v19 = vpop.permute.xlu0 %493 }
  0xac   : > { %vm578_vm11 = vcmp.eq.s32.totalorder %v2980_v48, %v494_v19  ;;  %v302_v20 = vpop.permute.xlu1 %301 }
  0xad   : > { %v2082_v21 = vsel %vm578_vm11, 1.0, %v2839_v53  ;;  %vm386_vm12 = vcmp.eq.s32.totalorder %v2980_v48, %v302_v20  ;;  %2412 = vmatprep.mubr.msk.f32.mxu0 %vm701_vm4, %v673_v16 }
  0xae   : > { %v2050_v22 = vsel %vm386_vm12, 1.0, %v2839_v53 }
  0xaf   : > { %v674_v23 = vsub.f32 %v2050_v22, %v2082_v21  ;;  %v497_v24 = vpop.permute.xlu0 %496 }
  0xb0   : > { %vm579_vm13 = vcmp.eq.s32.totalorder %v2980_v48, %v497_v24  ;;  %v305_v25 = vpop.permute.xlu1 %304 }
  0xb1   : > { %v2083_v26 = vsel %vm579_vm13, 1.0, %v2839_v53  ;;  %vm387_vm14 = vcmp.eq.s32.totalorder %v2980_v48, %v305_v25  ;;  %2413 = vmatmul.mubr.msk.f32.gmra.mrb[4].mxu0 %vm701_vm4, %v674_v23 }
  0xb2   : > { %v2051_v27 = vsel %vm387_vm14, 1.0, %v2839_v53 }
  0xb3   : > { %v675_v28 = vsub.f32 %v2051_v27, %v2083_v26  ;;  %v500_v29 = vpop.permute.xlu0 %499 }
  0xb4   : > { %vm580_vm15 = vcmp.eq.s32.totalorder %v2980_v48, %v500_v29  ;;  %v308_v30 = vpop.permute.xlu1 %307 }
  0xb5   : > { %v2084_v31 = vsel %vm580_vm15, 1.0, %v2839_v53  ;;  %vm388_vm0 = vcmp.eq.s32.totalorder %v2980_v48, %v308_v30  ;;  %2415 = vmatprep.mubr.msk.f32.mxu0 %vm701_vm4, %v675_v28 }
  0xb6   : > { %v2052_v32 = vsel %vm388_vm0, 1.0, %v2839_v53 }
  0xb7   : > { %v676_v33 = vsub.f32 %v2052_v32, %v2084_v31  ;;  %v503_v34 = vpop.permute.xlu0 %502 }
  0xb8   : > { %vm581_vm1 = vcmp.eq.s32.totalorder %v2980_v48, %v503_v34  ;;  %v311_v35 = vpop.permute.xlu1 %310 }
  0xb9   : > { %v2085_v36 = vsel %vm581_vm1, 1.0, %v2839_v53  ;;  %vm389_vm2 = vcmp.eq.s32.totalorder %v2980_v48, %v311_v35  ;;  %2416 = vmatmul.mubr.msk.f32.gmra.mrb[6].mxu0 %vm701_vm4, %v676_v33 }
  0xba   : > { %v2053_v37 = vsel %vm389_vm2, 1.0, %v2839_v53 }
  0xbb   : > { %v677_v38 = vsub.f32 %v2053_v37, %v2085_v36  ;;  %v506_v39 = vpop.permute.xlu0 %505 }
  0xbc   : > { %vm582_vm3 = vcmp.eq.s32.totalorder %v2980_v48, %v506_v39  ;;  %v314_v40 = vpop.permute.xlu1 %313 }
  0xbd   : > { %v2086_v41 = vsel %vm582_vm3, 1.0, %v2839_v53  ;;  %vm390_vm5 = vcmp.eq.s32.totalorder %v2980_v48, %v314_v40  ;;  %2418 = vmatprep.mubr.msk.f32.mxu0 %vm701_vm4, %v677_v38 }
  0xbe   : > { %v2054_v42 = vsel %vm390_vm5, 1.0, %v2839_v53 }
  0xbf   : > { %v678_v43 = vsub.f32 %v2054_v42, %v2086_v41  ;;  %v509_v44 = vpop.permute.xlu0 %508 }
  0xc0   : > { %vm583_vm6 = vcmp.eq.s32.totalorder %v2980_v48, %v509_v44  ;;  %v317_v45 = vpop.permute.xlu1 %316 }
  0xc1   : > { %v2087_v46 = vsel %vm583_vm6, 1.0, %v2839_v53  ;;  %vm391_vm7 = vcmp.eq.s32.totalorder %v2980_v48, %v317_v45  ;;  %2419 = vmatmul.mubr.msk.f32.gmra.mrb[8].mxu0 %vm701_vm4, %v678_v43 }
  0xc2   : > { %v2055_v49 = vsel %vm391_vm7, 1.0, %v2839_v53 }
  0xc3   : > { %v679_v50 = vsub.f32 %v2055_v49, %v2087_v46  ;;  %v512_v51 = vpop.permute.xlu0 %511 }
  0xc4   : > { %vm584_vm8 = vcmp.eq.s32.totalorder %v2980_v48, %v512_v51  ;;  %v320_v52 = vpop.permute.xlu1 %319 }
  0xc5   : > { %v2088_v54 = vsel %vm584_vm8, 1.0, %v2839_v53  ;;  %vm392_vm9 = vcmp.eq.s32.totalorder %v2980_v48, %v320_v52  ;;  %2421 = vmatprep.mubr.msk.f32.mxu0 %vm701_vm4, %v679_v50 }
  0xc6   : > { %v2056_v55 = vsel %vm392_vm9, 1.0, %v2839_v53 }
  0xc7   : > { %v680_v56 = vsub.f32 %v2056_v55, %v2088_v54  ;;  %v515_v57 = vpop.permute.xlu0 %514 }
  0xc8   : > { %vm585_vm10 = vcmp.eq.s32.totalorder %v2980_v48, %v515_v57  ;;  %v323_v58 = vpop.permute.xlu1 %322 }
  0xc9   : > { %v2089_v59 = vsel %vm585_vm10, 1.0, %v2839_v53  ;;  %vm393_vm11 = vcmp.eq.s32.totalorder %v2980_v48, %v323_v58  ;;  %2422 = vmatmul.mubr.msk.f32.gmra.mrb[10].mxu0 %vm701_vm4, %v680_v56 }
  0xca   : > { %v2057_v60 = vsel %vm393_vm11, 1.0, %v2839_v53 }
  0xcb   : > { %v681_v61 = vsub.f32 %v2057_v60, %v2089_v59  ;;  %v518_v62 = vpop.permute.xlu0 %517 }
  0xcc   : > { %vm586_vm12 = vcmp.eq.s32.totalorder %v2980_v48, %v518_v62  ;;  %v326_v63 = vpop.permute.xlu1 %325 }
  0xcd   : > { %v2090_v0 = vsel %vm586_vm12, 1.0, %v2839_v53  ;;  %vm394_vm13 = vcmp.eq.s32.totalorder %v2980_v48, %v326_v63  ;;  %2424 = vmatprep.mubr.msk.f32.mxu0 %vm701_vm4, %v681_v61 }
  0xce   : > { %v2058_v1 = vsel %vm394_vm13, 1.0, %v2839_v53 }
  0xcf   : > { %v682_v2 = vsub.f32 %v2058_v1, %v2090_v0  ;;  %v521_v3 = vpop.permute.xlu0 %520 }
  0xd0   : > { %vm587_vm14 = vcmp.eq.s32.totalorder %v2980_v48, %v521_v3  ;;  %v329_v4 = vpop.permute.xlu1 %328 }
  0xd1   : > { %v2091_v5 = vsel %vm587_vm14, 1.0, %v2839_v53  ;;  %vm395_vm15 = vcmp.eq.s32.totalorder %v2980_v48, %v329_v4  ;;  %2425 = vmatmul.mubr.msk.f32.gmra.mrb[12].mxu0 %vm701_vm4, %v682_v2 }
  0xd2   : > { %v2059_v8 = vsel %vm395_vm15, 1.0, %v2839_v53 }
  0xd3   : > { %v683_v11 = vsub.f32 %v2059_v8, %v2091_v5  ;;  %v524_v12 = vpop.permute.xlu0 %523 }
  0xd4   : > { %vm588_vm0 = vcmp.eq.s32.totalorder %v2980_v48, %v524_v12  ;;  %v332_v15 = vpop.permute.xlu1 %331 }
  0xd5   : > { %v2092_v16 = vsel %vm588_vm0, 1.0, %v2839_v53  ;;  %vm396_vm1 = vcmp.eq.s32.totalorder %v2980_v48, %v332_v15  ;;  %2427 = vmatprep.mubr.msk.f32.mxu0 %vm701_vm4, %v683_v11 }
  0xd6   : > { %v2060_v19 = vsel %vm396_vm1, 1.0, %v2839_v53 }
  0xd7   : > { %v684_v20 = vsub.f32 %v2060_v19, %v2092_v16  ;;  %v527_v21 = vpop.permute.xlu0 %526 }
  0xd8   : > { %vm589_vm2 = vcmp.eq.s32.totalorder %v2980_v48, %v527_v21  ;;  %v335_v22 = vpop.permute.xlu1 %334 }
  0xd9   : > { %v2093_v23 = vsel %vm589_vm2, 1.0, %v2839_v53  ;;  %vm397_vm3 = vcmp.eq.s32.totalorder %v2980_v48, %v335_v22  ;;  %2428 = vmatmul.mubr.msk.f32.gmra.mrb[14].mxu0 %vm701_vm4, %v684_v20 }
  0xda   : > { %v2061_v24 = vsel %vm397_vm3, 1.0, %v2839_v53 }
  0xdb   : > { %v685_v25 = vsub.f32 %v2061_v24, %v2093_v23  ;;  %v530_v26 = vpop.permute.xlu0 %529 }
  0xdc   : > { %vm590_vm5 = vcmp.eq.s32.totalorder %v2980_v48, %v530_v26  ;;  %v338_v27 = vpop.permute.xlu1 %337 }
  0xdd   : > { %v2094_v28 = vsel %vm590_vm5, 1.0, %v2839_v53  ;;  %vm398_vm6 = vcmp.eq.s32.totalorder %v2980_v48, %v338_v27  ;;  %2430 = vmatprep.mubr.msk.f32.mxu0 %vm701_vm4, %v685_v25 }
  0xde   : > { %v2062_v29 = vsel %vm398_vm6, 1.0, %v2839_v53 }
  0xdf   : > { %v686_v30 = vsub.f32 %v2062_v29, %v2094_v28  ;;  %v533_v31 = vpop.permute.xlu0 %532 }
  0xe0   : > { %vm591_vm7 = vcmp.eq.s32.totalorder %v2980_v48, %v533_v31  ;;  %v341_v32 = vpop.permute.xlu1 %340 }
  0xe1   : > { %v2095_v33 = vsel %vm591_vm7, 1.0, %v2839_v53  ;;  %vm399_vm8 = vcmp.eq.s32.totalorder %v2980_v48, %v341_v32  ;;  %2431 = vmatmul.mubr.msk.f32.gmra.mrb[16].mxu0 %vm701_vm4, %v686_v30 }
  0xe2   : > { %v2063_v34 = vsel %vm399_vm8, 1.0, %v2839_v53 }
  0xe3   : > { %v687_v35 = vsub.f32 %v2063_v34, %v2095_v33  ;;  %v536_v36 = vpop.permute.xlu0 %535 }
  0xe4   : > { %vm592_vm9 = vcmp.eq.s32.totalorder %v2980_v48, %v536_v36  ;;  %v344_v37 = vpop.permute.xlu1 %343 }
  0xe5   : > { %v2096_v38 = vsel %vm592_vm9, 1.0, %v2839_v53  ;;  %vm400_vm10 = vcmp.eq.s32.totalorder %v2980_v48, %v344_v37  ;;  %2433 = vmatprep.mubr.msk.f32.mxu0 %vm701_vm4, %v687_v35 }
  0xe6   : > { %v2064_v39 = vsel %vm400_vm10, 1.0, %v2839_v53 }
  0xe7   : > { %v688_v40 = vsub.f32 %v2064_v39, %v2096_v38  ;;  %v539_v41 = vpop.permute.xlu0 %538 }
  0xe8   : > { %vm593_vm11 = vcmp.eq.s32.totalorder %v2980_v48, %v539_v41  ;;  %v347_v42 = vpop.permute.xlu1 %346 }
  0xe9   : > { %v2097_v43 = vsel %vm593_vm11, 1.0, %v2839_v53  ;;  %vm401_vm12 = vcmp.eq.s32.totalorder %v2980_v48, %v347_v42  ;;  %2434 = vmatmul.mubr.msk.f32.gmra.mrb[18].mxu0 %vm701_vm4, %v688_v40 }
  0xea   : > { %v2065_v44 = vsel %vm401_vm12, 1.0, %v2839_v53 }
  0xeb   : > { %v689_v45 = vsub.f32 %v2065_v44, %v2097_v43  ;;  %v542_v46 = vpop.permute.xlu0 %541 }
  0xec   : > { %vm594_vm13 = vcmp.eq.s32.totalorder %v2980_v48, %v542_v46  ;;  %v350_v49 = vpop.permute.xlu1 %349 }
  0xed   : > { %v2098_v50 = vsel %vm594_vm13, 1.0, %v2839_v53  ;;  %vm402_vm14 = vcmp.eq.s32.totalorder %v2980_v48, %v350_v49  ;;  %2436 = vmatprep.mubr.msk.f32.mxu0 %vm701_vm4, %v689_v45 }
  0xee   : > { %v2066_v51 = vsel %vm402_vm14, 1.0, %v2839_v53 }
  0xef   : > { %v690_v52 = vsub.f32 %v2066_v51, %v2098_v50  ;;  %v545_v54 = vpop.permute.xlu0 %544  ;;  %v3143_v50 = vshrl.u32 %v283_v47, 7 }
  0xf0   : > { %vm595_vm15 = vcmp.eq.s32.totalorder %v2980_v48, %v545_v54  ;;  %v353_v55 = vpop.permute.xlu1 %352 }
  0xf1   : > { %v2099_v56 = vsel %vm595_vm15, 1.0, %v2839_v53  ;;  %vm403_vm0 = vcmp.eq.s32.totalorder %v2980_v48, %v353_v55  ;;  %2437 = vmatmul.mubr.msk.f32.gmra.mrb[20].mxu0 %vm701_vm4, %v690_v52  ;;  %v1071_v51 = vsub.s32 1, %v3143_v50  ;;  %v282_v52 = vld [vmem:[%s2891_s26] sm:$0x3]  ;;  %v3148_v54 = vsub.s32 0, %v3143_v50 }
  0xf2   : > { %v2067_v57 = vsel %vm403_vm0, 1.0, %v2839_v53 }
  0xf3   : > { %v691_v58 = vsub.f32 %v2067_v57, %v2099_v56  ;;  %v548_v59 = vpop.permute.xlu0 %547  ;;  %v3150_v55 = vrot.slane %v282_v52, %v1071_v51  ;;  %v3154_v56 = vrot.slane %v282_v52, %v3148_v54  ;;  %v2840_v57 = vmov 1.0  }
  0xf4   : > { %vm596_vm1 = vcmp.eq.s32.totalorder %v2980_v48, %v548_v59  ;;  %v356_v60 = vpop.permute.xlu1 %355  ;;  %v3166_v59 = vadd.s32 8, %v3143_v50 }
  0xf5   : > { %v2100_v61 = vsel %vm596_vm1, 1.0, %v2839_v53  ;;  %vm404_vm2 = vcmp.eq.s32.totalorder %v2980_v48, %v356_v60  ;;  %2439 = vmatprep.mubr.msk.f32.mxu0 %vm701_vm4, %v691_v58 }
  0xf6   : > { %v2068_v62 = vsel %vm404_vm2, 1.0, %v2839_v53 }
  0xf7   : > { %v692_v63 = vsub.f32 %v2068_v62, %v2100_v61  ;;  %v551_v0 = vpop.permute.xlu0 %550  ;;  %v3179_v62 = vadd.s32 16, %v3143_v50 }
  0xf8   : > { %vm597_vm3 = vcmp.eq.s32.totalorder %v2980_v48, %v551_v0  ;;  %v359_v1 = vpop.permute.xlu1 %358 }
  0xf9   : > { %v2101_v2 = vsel %vm597_vm3, 1.0, %v2839_v53  ;;  %vm405_vm5 = vcmp.eq.s32.totalorder %v2980_v48, %v359_v1  ;;  %2440 = vmatmul.mubr.msk.f32.gmra.mrb[22].mxu0 %vm701_vm4, %v692_v63 }
  0xfa   : > { %v2069_v3 = vsel %vm405_vm5, 1.0, %v2839_v53  ;;  %vm1023_vm5 = vcmp.eq.s32.totalorder %v2980_v48, 8 }
  0xfb   : > { %v693_v4 = vsub.f32 %v2069_v3, %v2101_v2  ;;  %v554_v5 = vpop.permute.xlu0 %553  ;;  %v3188_v2 = vadd.s32 24, %v3143_v50 }
  0xfc   : > { %vm598_vm6 = vcmp.eq.s32.totalorder %v2980_v48, %v554_v5  ;;  %v362_v8 = vpop.permute.xlu1 %361  ;;  %v3197_v5 = vadd.s32 32, %v3143_v50 }
  0xfd   : > { %v2102_v11 = vsel %vm598_vm6, 1.0, %v2839_v53  ;;  %vm406_vm7 = vcmp.eq.s32.totalorder %v2980_v48, %v362_v8  ;;  %2442 = vmatprep.mubr.msk.f32.mxu0 %vm701_vm4, %v693_v4  ;;  %vm1074_vm6 = vcmp.eq.s32.totalorder %v3143_v50, %v3150_v55 }
  0xfe   : > { %v2070_v12 = vsel %vm406_vm7, 1.0, %v2839_v53  ;;  %2157 = vmatprep.mubr.msk.f32.mxu1 %vm1074_vm6, %v2840_v57  ;;  %vm1076_vm7 = vcmp.eq.s32.totalorder %v3166_v59, %v3150_v55 }
  0xff   : > { %v694_v15 = vsub.f32 %v2070_v12, %v2102_v11  ;;  %v557_v16 = vpop.permute.xlu0 %556 }
 0x100   : > { %vm599_vm8 = vcmp.eq.s32.totalorder %v2980_v48, %v557_v16  ;;  %v365_v19 = vpop.permute.xlu1 %364 }
 0x101   : > { %v2103_v20 = vsel %vm599_vm8, 1.0, %v2839_v53  ;;  %vm407_vm9 = vcmp.eq.s32.totalorder %v2980_v48, %v365_v19  ;;  %2443 = vmatmul.mubr.msk.f32.gmra.mrb[24].mxu0 %vm701_vm4, %v694_v15  ;;  %vm1075_vm8 = vcmp.eq.s32.totalorder %v3166_v59, %v3154_v56  ;;  %v3206_v15 = vadd.s32 40, %v3143_v50  ;;  %v1121_v59 = vld [vmem:[#allocation2] sm:$0xff] }
 0x102   : > { %v2071_v21 = vsel %vm407_vm9, 1.0, %v2839_v53  ;;  %vm1078_vm9 = vcmp.eq.s32.totalorder %v3179_v62, %v3150_v55 }
 0x103   : > { %v695_v22 = vsub.f32 %v2071_v21, %v2103_v20  ;;  %v560_v23 = vpop.permute.xlu0 %559  ;;  %v3215_v20 = vadd.s32 48, %v3143_v50 }
 0x104   : > { %vm600_vm10 = vcmp.eq.s32.totalorder %v2980_v48, %v560_v23  ;;  %v368_v24 = vpop.permute.xlu1 %367 }
 0x105   : > { %v2104_v25 = vsel %vm600_vm10, 1.0, %v2839_v53  ;;  %vm408_vm11 = vcmp.eq.s32.totalorder %v2980_v48, %v368_v24  ;;  %2445 = vmatprep.mubr.msk.f32.mxu0 %vm701_vm4, %v695_v22  ;;  %vm1077_vm10 = vcmp.eq.s32.totalorder %v3179_v62, %v3154_v56  ;;  %v3224_v24 = vadd.s32 56, %v3143_v50 }
 0x106   : > { %v2072_v26 = vsel %vm408_vm11, 1.0, %v2839_v53  ;;  %vm1080_vm11 = vcmp.eq.s32.totalorder %v3188_v2, %v3150_v55 }
 0x107   : > { %v696_v27 = vsub.f32 %v2072_v26, %v2104_v25  ;;  %v563_v28 = vpop.permute.xlu0 %562  ;;  %vm1087_vm6 = vcmp.eq.s32.totalorder %v3224_v24, %v3154_v56 }
 0x108   : > { %vm601_vm12 = vcmp.eq.s32.totalorder %v2980_v48, %v563_v28  ;;  %v371_v29 = vpop.permute.xlu1 %370 }
 0x109   : > { %v2105_v30 = vsel %vm601_vm12, 1.0, %v2839_v53  ;;  %vm409_vm13 = vcmp.eq.s32.totalorder %v2980_v48, %v371_v29  ;;  %2446 = vmatmul.mubr.msk.f32.gmra.mrb[26].mxu0 %vm701_vm4, %v696_v27  ;;  %vm1079_vm12 = vcmp.eq.s32.totalorder %v3188_v2, %v3154_v56 }
 0x10a   : > { %v2073_v31 = vsel %vm409_vm13, 1.0, %v2839_v53  ;;  %vm1082_vm13 = vcmp.eq.s32.totalorder %v3197_v5, %v3150_v55 }
 0x10b   : > { %v697_v32 = vsub.f32 %v2073_v31, %v2105_v30  ;;  %v566_v33 = vpop.permute.xlu0 %565 }
 0x10c   : > { %vm602_vm14 = vcmp.eq.s32.totalorder %v2980_v48, %v566_v33  ;;  %v374_v34 = vpop.permute.xlu1 %373 }
 0x10d   : > { %v2106_v35 = vsel %vm602_vm14, 1.0, %v2839_v53  ;;  %vm410_vm15 = vcmp.eq.s32.totalorder %v2980_v48, %v374_v34  ;;  %2448 = vmatprep.mubr.msk.f32.mxu0 %vm701_vm4, %v697_v32  ;;  %vm1081_vm14 = vcmp.eq.s32.totalorder %v3197_v5, %v3154_v56 }
 0x10e   : > { %v2074_v36 = vsel %vm410_vm15, 1.0, %v2839_v53  ;;  %vm1084_vm15 = vcmp.eq.s32.totalorder %v3206_v15, %v3150_v55 }
 0x10f   : > { %v698_v37 = vsub.f32 %v2074_v36, %v2106_v35  ;;  %v569_v38 = vpop.permute.xlu0 %568 }
 0x110   : > { %vm603_vm0 = vcmp.eq.s32.totalorder %v2980_v48, %v569_v38  ;;  %v377_v39 = vpop.permute.xlu1 %376 }
 0x111   : > { %v2107_v40 = vsel %vm603_vm0, 1.0, %v2839_v53  ;;  %vm411_vm1 = vcmp.eq.s32.totalorder %v2980_v48, %v377_v39  ;;  %2449 = vmatmul.mubr.msk.f32.gmra.mrb[28].mxu0 %vm701_vm4, %v698_v37  ;;  %vm1083_vm0 = vcmp.eq.s32.totalorder %v3206_v15, %v3154_v56 }
 0x112   : > { %v2075_v41 = vsel %vm411_vm1, 1.0, %v2839_v53  ;;  %vm1086_vm1 = vcmp.eq.s32.totalorder %v3215_v20, %v3150_v55 }
 0x113   : > { %v699_v42 = vsub.f32 %v2075_v41, %v2107_v40  ;;  %v572_v43 = vpop.permute.xlu0 %571 }
 0x114   : > { %vm604_vm2 = vcmp.eq.s32.totalorder %v2980_v48, %v572_v43  ;;  %v380_v44 = vpop.permute.xlu1 %379 }
 0x115   : > { %v2108_v45 = vsel %vm604_vm2, 1.0, %v2839_v53  ;;  %vm412_vm3 = vcmp.eq.s32.totalorder %v2980_v48, %v380_v44  ;;  %2451 = vmatprep.mubr.msk.f32.mxu0 %vm701_vm4, %v699_v42  ;;  %vm1085_vm2 = vcmp.eq.s32.totalorder %v3215_v20, %v3154_v56 }
 0x116   : > { %v2076_v46 = vsel %vm412_vm3, 1.0, %v2839_v53  ;;  %vm1088_vm3 = vcmp.eq.s32.totalorder %v3224_v24, %v3150_v55 }
 0x117   : > { %v700_v49 = vsub.f32 %v2076_v46, %v2108_v45 }
 0x119   : > { %2452 = vmatmul.mubr.msk.f32.gmra.mrb[30].mxu0 %vm701_vm4, %v700_v49  ;;  %vm1073_vm4 = vcmp.eq.s32.totalorder %v3143_v50, %v3154_v56  ;;  %v1124_v56 = vld [vmem:[#allocation2 + $0x18] sm:$0xff] }
 0x174   : > { %v2408_v53 = vpop.f32.mrb[0].mxu0 }
 0x175   : > { %v3163_v47 = vsel %vm1023_vm5, 1.0, %v2408_v53  ;;  %v864_v58 = vpop.f32.mrb[1].mxu0 }
 0x176   : > { %v3170_v60 = vsel %vm1023_vm5, 1.0, %v864_v58 }
 0x177   : > { %v2604_v61 = vpack.c.bf16 %v3163_v47, %v3170_v60 }
 0x17c   : > { %v2411_v63 = vpop.f32.mrb[2].mxu0 }
 0x17d   : > { %v1027_v0 = vsel %vm1023_vm5, 1.0, %v2411_v63  ;;  %v874_v1 = vpop.f32.mrb[3].mxu0 }
 0x17e   : > { %v1026_v3 = vsel %vm1023_vm5, 1.0, %v874_v1 }
 0x17f   : > { %v2608_v4 = vpack.c.bf16 %v1027_v0, %v1026_v3 }
 0x184   : > { %v2414_v8 = vpop.f32.mrb[4].mxu0 }
 0x185   : > { %v1029_v11 = vsel %vm1023_vm5, 1.0, %v2414_v8  ;;  %v884_v12 = vpop.f32.mrb[5].mxu0 }
 0x186   : > { %v1028_v16 = vsel %vm1023_vm5, 1.0, %v884_v12 }
 0x187   : > { %v2612_v19 = vpack.c.bf16 %v1029_v11, %v1028_v16 }
 0x18c   : > { %v2417_v21 = vpop.f32.mrb[6].mxu0 }
 0x18d   : > { %v1031_v22 = vsel %vm1023_vm5, 1.0, %v2417_v21  ;;  %v894_v23 = vpop.f32.mrb[7].mxu0 }
 0x18e   : > { %v1030_v25 = vsel %vm1023_vm5, 1.0, %v894_v23 }
 0x18f   : > { %v2616_v26 = vpack.c.bf16 %v1031_v22, %v1030_v25 }
 0x194   : > { %v2420_v27 = vpop.f32.mrb[8].mxu0 }
 0x195   : > { %v1033_v28 = vsel %vm1023_vm5, 1.0, %v2420_v27  ;;  %v904_v29 = vpop.f32.mrb[9].mxu0 }
 0x196   : > { %v1032_v30 = vsel %vm1023_vm5, 1.0, %v904_v29 }
 0x197   : > { %v2620_v31 = vpack.c.bf16 %v1033_v28, %v1032_v30 }
 0x19c   : > { %v2423_v32 = vpop.f32.mrb[10].mxu0 }
 0x19d   : > { %v1035_v33 = vsel %vm1023_vm5, 1.0, %v2423_v32  ;;  %v914_v34 = vpop.f32.mrb[11].mxu0 }
 0x19e   : > { %v1034_v35 = vsel %vm1023_vm5, 1.0, %v914_v34 }
 0x19f   : > { %v2624_v36 = vpack.c.bf16 %v1035_v33, %v1034_v35 }
 0x1a4   : > { %v2426_v37 = vpop.f32.mrb[12].mxu0 }
 0x1a5   : > { %v1037_v38 = vsel %vm1023_vm5, 1.0, %v2426_v37  ;;  %v924_v39 = vpop.f32.mrb[13].mxu0 }
 0x1a6   : > { %v1036_v40 = vsel %vm1023_vm5, 1.0, %v924_v39 }
 0x1a7   : > { %v2628_v41 = vpack.c.bf16 %v1037_v38, %v1036_v40 }
 0x1ac   : > { %v2429_v42 = vpop.f32.mrb[14].mxu0 }
 0x1ad   : > { %v1039_v43 = vsel %vm1023_vm5, 1.0, %v2429_v42  ;;  %v934_v44 = vpop.f32.mrb[15].mxu0 }
 0x1ae   : > { %v1038_v45 = vsel %vm1023_vm5, 1.0, %v934_v44 }
 0x1af   : > { %v2632_v46 = vpack.c.bf16 %v1039_v43, %v1038_v45 }
 0x1b4   : > { %v2432_v49 = vpop.f32.mrb[16].mxu0 }
 0x1b5   : > { %v1041_v51 = vsel %vm1023_vm5, 1.0, %v2432_v49  ;;  %v944_v52 = vpop.f32.mrb[17].mxu0 }
 0x1b6   : > { %v1040_v53 = vsel %vm1023_vm5, 1.0, %v944_v52 }
 0x1b7   : > { %v2602_v47 = vpack.c.bf16 %v1041_v51, %v1040_v53  ;;  %v1123_v51 = vld [vmem:[#allocation2 + $0x10] sm:$0xff] }
 0x1b9   : > { %2603 = vmatprep.subr.bf16.mxu1 %v2602_v47 }
 0x1ba   : > { %2605 = vmatpush3.bf16.msra.mxu1 %v2604_v61 }
 0x1bc   : > { %v2435_v58 = vpop.f32.mrb[18].mxu0 }
 0x1bd   : > { %v1043_v60 = vsel %vm1023_vm5, 1.0, %v2435_v58  ;;  %v954_v63 = vpop.f32.mrb[19].mxu0 }
 0x1be   : > { %v1042_v0 = vsel %vm1023_vm5, 1.0, %v954_v63  ;;  %v1125_v63 = vld [vmem:[#allocation2 + $0x20] sm:$0xff] }
 0x1bf   : > { %v2606_v1 = vpack.c.bf16 %v1043_v60, %v1042_v0 }
 0x1c1   : > { %2607 = vmatprep.subr.bf16.mxu1 %v2606_v1 }
 0x1c2   : > { %2609 = vmatpush3.bf16.msra.mxu1 %v2608_v4 }
 0x1c4   : > { %v2438_v3 = vpop.f32.mrb[20].mxu0 }
 0x1c5   : > { %v1045_v8 = vsel %vm1023_vm5, 1.0, %v2438_v3  ;;  %v964_v11 = vpop.f32.mrb[21].mxu0 }
 0x1c6   : > { %v1044_v12 = vsel %vm1023_vm5, 1.0, %v964_v11  ;;  %v1126_v11 = vld [vmem:[#allocation2 + $0x28] sm:$0xff] }
 0x1c7   : > { %v2610_v61 = vpack.c.bf16 %v1045_v8, %v1044_v12 }
 0x1c9   : > { %2611 = vmatprep.subr.bf16.mxu1 %v2610_v61 }
 0x1ca   : > { %2613 = vmatpush3.bf16.msra.mxu1 %v2612_v19 }
 0x1cc   : > { %v2441_v16 = vpop.f32.mrb[22].mxu0 }
 0x1cd   : > { %v1047_v21 = vsel %vm1023_vm5, 1.0, %v2441_v16  ;;  %v974_v22 = vpop.f32.mrb[23].mxu0 }
 0x1ce   : > { %v1046_v23 = vsel %vm1023_vm5, 1.0, %v974_v22  ;;  %v1127_v22 = vld [vmem:[#allocation2 + $0x30] sm:$0xff] }
 0x1cf   : > { %v2614_v4 = vpack.c.bf16 %v1047_v21, %v1046_v23 }
 0x1d1   : > { %2615 = vmatprep.subr.bf16.mxu1 %v2614_v4 }
 0x1d2   : > { %2617 = vmatpush3.bf16.msra.mxu1 %v2616_v26 }
 0x1d4   : > { %v2444_v25 = vpop.f32.mrb[24].mxu0 }
 0x1d5   : > { %v1049_v27 = vsel %vm1023_vm5, 1.0, %v2444_v25  ;;  %v984_v28 = vpop.f32.mrb[25].mxu0 }
 0x1d6   : > { %v1048_v29 = vsel %vm1023_vm5, 1.0, %v984_v28  ;;  %v1128_v28 = vld [vmem:[#allocation2 + $0x38] sm:$0xff] }
 0x1d7   : > { %v2618_v19 = vpack.c.bf16 %v1049_v27, %v1048_v29 }
 0x1d9   : > { %2619 = vmatprep.subr.bf16.mxu1 %v2618_v19 }
 0x1da   : > { %2621 = vmatpush3.bf16.msra.mxu1 %v2620_v31 }
 0x1dc   : > { %v2447_v30 = vpop.f32.mrb[26].mxu0 }
 0x1dd   : > { %v1051_v32 = vsel %vm1023_vm5, 1.0, %v2447_v30  ;;  %v994_v33 = vpop.f32.mrb[27].mxu0 }
 0x1de   : > { %v1050_v34 = vsel %vm1023_vm5, 1.0, %v994_v33 }
 0x1df   : > { %v2622_v26 = vpack.c.bf16 %v1051_v32, %v1050_v34 }
 0x1e1   : > { %2623 = vmatprep.subr.bf16.mxu1 %v2622_v26  ;;  %v2841_v26 = vmov (!%p2173_p6), 8  }
 0x1e2   : > { %2625 = vmatpush3.bf16.msra.mxu1 %v2624_v36  ;;  %2775 = vset.pattern.permute.xlu1 (!%p2173_p6), %v2841_v26 }
 0x1e3   : > { %2774 = vset.pattern.permute.xlu0 (!%p2173_p6), %v2841_v26 }
 0x1e4   : > { %v2450_v35 = vpop.f32.mrb[28].mxu0 }
 0x1e5   : > { %v1053_v37 = vsel %vm1023_vm5, 1.0, %v2450_v35  ;;  %v1004_v38 = vpop.f32.mrb[29].mxu0 }
 0x1e6   : > { %v1052_v39 = vsel %vm1023_vm5, 1.0, %v1004_v38 }
 0x1e7   : > { %v2626_v31 = vpack.c.bf16 %v1053_v37, %v1052_v39 }
 0x1e9   : > { %2627 = vmatprep.subr.bf16.mxu1 %v2626_v31 }
 0x1ea   : > { %2629 = vmatpush3.bf16.msra.mxu1 %v2628_v41  ;;  %v1122_v41 = vld [vmem:[#allocation2 + $0x8] sm:$0xff] }
 0x1ec   : > { %v2453_v40 = vpop.f32.mrb[30].mxu0 }
 0x1ed   : > { %v1055_v42 = vsel %vm1023_vm5, 1.0, %v2453_v40  ;;  %v1014_v43 = vpop.f32.mrb[31].mxu0 }
 0x1ee   : > { %v1054_v44 = vsel %vm1023_vm5, 1.0, %v1014_v43  ;;  %v1343_v43 = vld [vmem:[%s3601_s3] sm:$0xff] (!%p2173_p6)  ;;  %vm1334_vm5 = vcmp.lt.s32.totalorder (!%p2173_p6), %v2980_v48, 4 }
 0x1ef   : > { %v2630_v36 = vpack.c.bf16 %v1055_v42, %v1054_v44  ;;  %v1344_v44 = vld [vmem:[%s3601_s3 + $0x8] sm:$0xff] (!%p2173_p6) }
 0x1f1   : > { %2631 = vmatprep.subr.bf16.mxu1 %v2630_v36  ;;  %v1345_v36 = vld [vmem:[%s3601_s3 + $0x10] sm:$0xff] (!%p2173_p6) }
 0x1f2   : > { %2633 = vmatpush3.bf16.msra.mxu1 %v2632_v46 }
 0x1f5   : > { %2158 = vmatmul.mubr.msk.f32.vlgmr.msra.gmra.mrb[0].mxu1 %vm1073_vm4, %v2840_v57 }
 0x1f6   : > { %2159 = vmatprep.mubr.msk.f32.mxu1 %vm1076_vm7, %v2840_v57 }
 0x1f9   : > { %2160 = vmatmul.mubr.msk.f32.gmra.mrb[2].mxu1 %vm1075_vm8, %v2840_v57 }
 0x1fa   : > { %2161 = vmatprep.mubr.msk.f32.mxu1 %vm1078_vm9, %v2840_v57 }
 0x1fd   : > { %2162 = vmatmul.mubr.msk.f32.gmra.mrb[4].mxu1 %vm1077_vm10, %v2840_v57 }
 0x1fe   : > { %2163 = vmatprep.mubr.msk.f32.mxu1 %vm1080_vm11, %v2840_v57 }
 0x201   : > { %2164 = vmatmul.mubr.msk.f32.gmra.mrb[6].mxu1 %vm1079_vm12, %v2840_v57 }
 0x202   : > { %2165 = vmatprep.mubr.msk.f32.mxu1 %vm1082_vm13, %v2840_v57 }
 0x205   : > { %2166 = vmatmul.mubr.msk.f32.gmra.mrb[8].mxu1 %vm1081_vm14, %v2840_v57 }
 0x206   : > { %2167 = vmatprep.mubr.msk.f32.mxu1 %vm1084_vm15, %v2840_v57 }
 0x209   : > { %2168 = vmatmul.mubr.msk.f32.gmra.mrb[10].mxu1 %vm1083_vm0, %v2840_v57 }
 0x20a   : > { %2169 = vmatprep.mubr.msk.f32.mxu1 %vm1086_vm1, %v2840_v57 }
 0x20d   : > { %2170 = vmatmul.mubr.msk.f32.gmra.mrb[12].mxu1 %vm1085_vm2, %v2840_v57 }
 0x20e   : > { %2171 = vmatprep.mubr.msk.f32.mxu1 %vm1088_vm3, %v2840_v57 }
 0x211   : > { %2172 = vmatmul.mubr.msk.f32.gmra.mrb[14].mxu1 %vm1087_vm6, %v2840_v57 }
 0x2c8   : > { %v2294_v50 = vpop.f32.mrb[0].mxu1 }
 0x2c9   : > { %v2295_v62 = vpop.f32.mrb[1].mxu1 }
 0x2ca   : > { %v2296_v2 = vadd.f32 %v2295_v62, %v2294_v50  ;;  %v1346_v50 = vld [vmem:[%s3601_s3 + $0x18] sm:$0xff] (!%p2173_p6) }
 0x2cb   : > { %v2638_v62 = vpack.c.bf16 (!%p2173_p6), %v1346_v50, %v1345_v36 }
 0x2cc   : > { %v1234_v5 = vadd.f32 %v2296_v2, %v1121_v59  ;;  %v2297_v15 = vpop.f32.mrb[2].mxu1  ;;  %v2634_v59 = vpack.c.bf16 (!%p2173_p6), %v1344_v44, %v1343_v43 }
 0x2cd   : > { %v2298_v45 = vpop.f32.mrb[3].mxu1 }
 0x2ce   : > { %1242 = vst [vmem:[#allocation2] sm:$0xff] %v1234_v5  ;;  %v2299_v20 = vadd.f32 %v2298_v45, %v2297_v15  ;;  %v1347_v5 = vld [vmem:[%s3601_s3 + $0x20] sm:$0xff] (!%p2173_p6)  ;;  %v1348_v15 = vld [vmem:[%s3601_s3 + $0x28] sm:$0xff] (!%p2173_p6)  ;;  %2635 = vmatprep.subr.bf16.mxu0 (!%p2173_p6), %v2634_v59 }
 0x2cf   : > { %2637 = vmatpush3.bf16.msra.mxu0 (!%p2173_p6), %v2634_v59  ;;  %v2177_v59 = vld [vmem:[%s3601_s3 + $0x88] sm:$0xff] (!%p2173_p6) }
 0x2d0   : > { %v1235_v46 = vadd.f32 %v2299_v20, %v1122_v41  ;;  %v2300_v49 = vpop.f32.mrb[4].mxu1  ;;  %2639 = vmatprep.subr.bf16.mxu0 (!%p2173_p6), %v2638_v62 }
 0x2d1   : > { %v2301_v55 = vpop.f32.mrb[5].mxu1 }
 0x2d2   : > { %1243 = vst [vmem:[#allocation2 + $0x8] sm:$0xff] %v1235_v46  ;;  %v2302_v52 = vadd.f32 %v2301_v55, %v2300_v49  ;;  %v2642_v46 = vpack.c.bf16 (!%p2173_p6), %v1348_v15, %v1347_v5  ;;  %v1350_v55 = vld [vmem:[%s3601_s3 + $0x38] sm:$0xff] (!%p2173_p6)  ;;  %v2182_v15 = vld [vmem:[%s3601_s3 + $0xb0] sm:$0xff] (!%p2173_p6) }
 0x2d3   : > { %2641 = vmatpush3.bf16.msra.mxu0 (!%p2173_p6), %v2638_v62  ;;  %v2180_v62 = vld [vmem:[%s3601_s3 + $0xa0] sm:$0xff] (!%p2173_p6) }
 0x2d4   : > { %v1236_v53 = vadd.f32 %v2302_v52, %v1123_v51  ;;  %v2303_v47 = vpop.f32.mrb[6].mxu1  ;;  %v1349_v51 = vld [vmem:[%s3601_s3 + $0x30] sm:$0xff] (!%p2173_p6)  ;;  %2643 = vmatprep.subr.bf16.mxu0 (!%p2173_p6), %v2642_v46 }
 0x2d5   : > { %v2304_v57 = vpop.f32.mrb[7].mxu1  ;;  %v3343_v33 = vld [vmem:[#allocation2] sm:$0xff] (!%p2173_p6) }
 0x2d6   : > { %1244 = vst [vmem:[#allocation2 + $0x10] sm:$0xff] %v1236_v53  ;;  %v2305_v24 = vadd.f32 %v2304_v57, %v2303_v47  ;;  %v1262_v37 = vmax.f32 (!%p2173_p6), %v3343_v33, 1.0  ;;  %v2646_v53 = vpack.c.bf16 (!%p2173_p6), %v1350_v55, %v1349_v51  ;;  %v1352_v57 = vld [vmem:[%s3601_s3 + $0x48] sm:$0xff] (!%p2173_p6)  ;;  %v2186_v51 = vld [vmem:[%s3601_s3 + $0xd0] sm:$0xff] (!%p2173_p6)  ;;  %v2187_v55 = vld [vmem:[%s3601_s3 + $0xd8] sm:$0xff] (!%p2173_p6) }
 0x2d7   : > { %2645 = vmatpush3.bf16.msra.mxu0 (!%p2173_p6), %v2642_v46  ;;  %v2185_v46 = vld [vmem:[%s3601_s3 + $0xc8] sm:$0xff] (!%p2173_p6) }
 0x2d8   : > { %v1237_v58 = vadd.f32 %v2305_v24, %v1124_v56  ;;  %v2306_v60 = vpop.f32.mrb[8].mxu1  ;;  %v1351_v56 = vld [vmem:[%s3601_s3 + $0x40] sm:$0xff] (!%p2173_p6)  ;;  %2647 = vmatprep.subr.bf16.mxu0 (!%p2173_p6), %v2646_v53 }
 0x2d9   : > { %v2307_v0 = vpop.f32.mrb[9].mxu1  ;;  %v3350_v39 = vld [vmem:[#allocation2 + $0x8] sm:$0xff] (!%p2173_p6) }
 0x2da   : > { %1245 = vst [vmem:[#allocation2 + $0x18] sm:$0xff] %v1237_v58  ;;  %v2308_v1 = vadd.f32 %v2307_v0, %v2306_v60  ;;  %v1263_v31 = vmax.f32 (!%p2173_p6), %v3350_v39, 1.0  ;;  %v1353_v0 = vld [vmem:[%s3601_s3 + $0x50] sm:$0xff] (!%p2173_p6) }
 0x2db   : > { %2649 = vmatpush3.bf16.msra.mxu0 (!%p2173_p6), %v2646_v53  ;;  %v2188_v53 = vld [vmem:[%s3601_s3 + $0xe0] sm:$0xff] (!%p2173_p6) }
 0x2dc   : > { %v1238_v3 = vadd.f32 %v2308_v1, %v1125_v63  ;;  %v2309_v8 = vpop.f32.mrb[10].mxu1  ;;  %v2650_v63 = vpack.c.bf16 (!%p2173_p6), %v1352_v57, %v1351_v56  ;;  %v1354_v1 = vld [vmem:[%s3601_s3 + $0x58] sm:$0xff] (!%p2173_p6)  ;;  %v2190_v57 = vld [vmem:[%s3601_s3 + $0xf0] sm:$0xff] (!%p2173_p6) }
 0x2dd   : > { %v2310_v12 = vpop.f32.mrb[11].mxu1  ;;  %v3341_v32 = vld [vmem:[#allocation2 + $0x10] sm:$0xff] (!%p2173_p6) }
 0x2de   : > { %1246 = vst [vmem:[#allocation2 + $0x20] sm:$0xff] %v1238_v3  ;;  %v2311_v61 = vadd.f32 %v2310_v12, %v2309_v8  ;;  %v1264_v35 = vmax.f32 (!%p2173_p6), %v3341_v32, 1.0  ;;  %2651 = vmatprep.subr.bf16.mxu0 (!%p2173_p6), %v2650_v63  ;;  %v1355_v12 = vld [vmem:[%s3601_s3 + $0x60] sm:$0xff] (!%p2173_p6) }
 0x2df   : > { %2653 = vmatpush3.bf16.msra.mxu0 (!%p2173_p6), %v2650_v63 }
 0x2e0   : > { %v1239_v16 = vadd.f32 %v2311_v61, %v1126_v11  ;;  %v2312_v21 = vpop.f32.mrb[12].mxu1  ;;  %2776 = vrcp.f32 (!%p2173_p6), %v1264_v35  ;;  %v2654_v11 = vpack.c.bf16 (!%p2173_p6), %v1354_v1, %v1353_v0  ;;  %v1356_v61 = vld [vmem:[%s3601_s3 + $0x68] sm:$0xff] (!%p2173_p6) }
 0x2e1   : > { %v2313_v23 = vpop.f32.mrb[13].mxu1  ;;  %v3345_v34 = vld [vmem:[#allocation2 + $0x18] sm:$0xff] (!%p2173_p6)  ;;  %2778 = vrcp.f32 (!%p2173_p6), %v1262_v37 }
 0x2e2   : > { %1247 = vst [vmem:[#allocation2 + $0x28] sm:$0xff] %v1239_v16  ;;  %v2314_v4 = vadd.f32 %v2313_v23, %v2312_v21  ;;  %v1265_v38 = vmax.f32 (!%p2173_p6), %v3345_v34, 1.0  ;;  %2655 = vmatprep.subr.bf16.mxu0 (!%p2173_p6), %v2654_v11  ;;  %v1357_v23 = vld [vmem:[%s3601_s3 + $0x70] sm:$0xff] (!%p2173_p6) }
 0x2e3   : > { %2657 = vmatpush3.bf16.msra.mxu0 (!%p2173_p6), %v2654_v11 }
 0x2e4   : > { %v1240_v25 = vadd.f32 %v2314_v4, %v1127_v22  ;;  %v2315_v27 = vpop.f32.mrb[14].mxu1  ;;  %1253 = sbr.rel (%p2173_p6) target bundleno = 1794 (0x702), region = 48  ;;  %2780 = vrcp.f32 (!%p2173_p6), %v1265_v38  ;;  %v2658_v22 = vpack.c.bf16 (!%p2173_p6), %v1356_v61, %v1355_v12  ;;  %v1358_v4 = vld [vmem:[%s3601_s3 + $0x78] sm:$0xff] (!%p2173_p6) }
 0x2e5   : > { %v2316_v29 = vpop.f32.mrb[15].mxu1  ;;  %v3355_v42 = vld [vmem:[#allocation2 + $0x20] sm:$0xff] (!%p2173_p6)  ;;  %2782 = vrcp.f32 (!%p2173_p6), %v1263_v31 }
 0x2e6   : > { %1248 = vst [vmem:[#allocation2 + $0x30] sm:$0xff] %v1240_v25  ;;  %v2317_v19 = vadd.f32 %v2316_v29, %v2315_v27  ;;  %v1266_v41 = vmax.f32 (!%p2173_p6), %v3355_v42, 1.0  ;;  %2659 = vmatprep.subr.bf16.mxu0 (!%p2173_p6), %v2658_v22  ;;  %v2662_v25 = vpack.c.bf16 (!%p2173_p6), %v1358_v4, %v1357_v23 }
 0x2e7   : > { %2661 = vmatpush3.bf16.msra.mxu0 (!%p2173_p6), %v2658_v22 }
 0x2e8   : > { %v1241_v30 = vadd.f32 %v2317_v19, %v1128_v28  ;;  %2663 = vmatprep.subr.bf16.mxu0 (!%p2173_p6), %v2662_v25 }
 0x2e9   : > { %v3353_v40 = vld [vmem:[#allocation2 + $0x28] sm:$0xff] (!%p2173_p6) }
 0x2ea   : > { %1249 = vst [vmem:[#allocation2 + $0x38] sm:$0xff] %v1241_v30  ;;  %v1267_v2 = vmax.f32 (!%p2173_p6), %v3353_v40, 1.0  ;;  %v2777_v47 = vpop.eup (!%p2173_p6), %2776 }
 0x2eb   : > { %v2779_v24 = vpop.eup %2778  ;;  %1298 = vperm.xlu1 %2775, %v2777_v47   ;;  %2665 = vmatpush3.bf16.msra.mxu0 %v2662_v25  ;;  %v2189_v47 = vld [vmem:[%s3601_s3 + $0xe8] sm:$0xff] }
 0x2ec   : > { %2784 = vrcp.f32 %v1267_v2  ;;  %1288 = vperm.xlu0 %2774, %v2779_v24   ;;  %v2181_v2 = vld [vmem:[%s3601_s3 + $0xa8] sm:$0xff]  ;;  %v2690_v56 = vpack.c.bf16 %v2189_v47, %v2188_v53  ;;  %v2191_v24 = vld [vmem:[%s3601_s3 + $0xf8] sm:$0xff] }
 0x2ed   : > { %v3379_v20 = vld [vmem:[#allocation2 + $0x30] sm:$0xff]  ;;  %2786 = vrcp.f32 %v1266_v41  ;;  %v2674_v5 = vpack.c.bf16 %v2181_v2, %v2180_v62  ;;  %v2183_v41 = vld [vmem:[%s3601_s3 + $0xb8] sm:$0xff] }
 0x2ee   : > { %v1268_v52 = vmax.f32 %v3379_v20, 1.0  ;;  %v2781_v58 = vpop.eup %2780 }
 0x2ef   : > { %v2783_v60 = vpop.eup %2782  ;;  %1303 = vperm.xlu1 %2775, %v2781_v58   ;;  %v2694_v58 = vpack.c.bf16 %v2191_v24, %v2190_v57 }
 0x2f0   : > { %1293 = vperm.xlu0 %2774, %v2783_v60   ;;  %v2174_v60 = vld [vmem:[%s3602_s4] ss:$0 sm:$0xff] }
 0x2f1   : > { %v3377_v45 = vld [vmem:[#allocation2 + $0x38] sm:$0xff] }
 0x2f2   : > { %v1269_v49 = vmax.f32 %v3377_v45, 1.0 }
 0x2f4   : > { %2788 = vrcp.f32 %v1269_v49 }
 0x2f5   : > { %2790 = vrcp.f32 %v1268_v52  ;;  %v2686_v52 = vpack.c.bf16 %v2187_v55, %v2186_v51 }
 0x2f6   : > { %v2785_v3 = vpop.eup %2784 }
 0x2f7   : > { %v2787_v8 = vpop.eup %2786  ;;  %1313 = vperm.xlu1 %2775, %v2785_v3  }
 0x2f8   : > { %1308 = vperm.xlu0 %2774, %v2787_v8  }
 0x2fe   : > { %v2789_v16 = vpop.eup %2788 }
 0x2ff   : > { %v2791_v21 = vpop.eup %2790  ;;  %1323 = vperm.xlu1 %2775, %v2789_v16  }
 0x300   : > { %1318 = vperm.xlu0 %2774, %v2791_v21  }
 0x36a   : > { %v1299_v27 = vpop.permute.xlu1 %1298 }
 0x36b   : > { %v1289_v28 = vpop.permute.xlu0 %1288  ;;  %v1328_v19 = vmul.f32 %v1299_v27, %v3341_v32 }
 0x36c   : > { %v1326_v29 = vmul.f32 %v1289_v28, %v3343_v33 }
 0x36d   : > { %v1337_v38 = vsel %vm1334_vm5, %v2917_v9, %v1328_v19 }
 0x36e   : > { %v1304_v30 = vpop.permute.xlu1 %1303  ;;  %v1335_v26 = vsel %vm1334_vm5, %v2905_v6, %v1326_v29 }
 0x36f   : > { %2486 = vmatprep.mubr.f32.mxu0 %v1335_v26  ;;  %v1294_v35 = vpop.permute.xlu0 %1293  ;;  %v1329_v31 = vmul.f32 %v1304_v30, %v3345_v34 }
 0x370   : > { %v1327_v37 = vmul.f32 %v1294_v35, %v3350_v39 }
 0x371   : > { %v1338_v39 = vsel %vm1334_vm5, %v2922_v10, %v1329_v31 }
 0x372   : > { %v1336_v32 = vsel %vm1334_vm5, %v2910_v7, %v1327_v37 }
 0x373   : > { %2487 = vmatmul.mubr.f32.vlgmr.msra.gmra.mrb[0].mxu0 %v1336_v32 }
 0x374   : > { %2489 = vmatprep.mubr.f32.mxu0 %v1337_v38 }
 0x376   : > { %v1314_v43 = vpop.permute.xlu1 %1313 }
 0x377   : > { %v1309_v33 = vpop.permute.xlu0 %1308  ;;  %v1331_v6 = vmul.f32 %v1314_v43, %v3353_v40  ;;  %2490 = vmatmul.mubr.f32.gmra.mrb[2].mxu0 %v1338_v39 }
 0x378   : > { %v1330_v44 = vmul.f32 %v1309_v33, %v3355_v42  ;;  %v2176_v42 = vld [vmem:[%s3601_s3 + $0x80] sm:$0xff] }
 0x379   : > { %v1340_v40 = vsel %vm1334_vm5, %v2935_v14, %v1331_v6  ;;  %v2666_v14 = vpack.c.bf16 %v2177_v59, %v2176_v42 }
 0x37a   : > { %v1339_v9 = vsel %vm1334_vm5, %v2930_v13, %v1330_v44 }
 0x37b   : > { %2492 = vmatprep.mubr.f32.mxu0 %v1339_v9  ;;  %2667 = vmatprep.subr.bf16.mxu1 %v2666_v14 }
 0x37c   : > { %2493 = vmatmul.mubr.f32.gmra.mrb[4].mxu0 %v1340_v40  ;;  %2669 = vmatpush3.bf16.msra.mxu1 %v2666_v14 }
 0x37e   : > { %v1324_v34 = vpop.permute.xlu1 %1323 }
 0x37f   : > { %v1319_v36 = vpop.permute.xlu0 %1318  ;;  %v1333_v50 = vmul.f32 %v1324_v34, %v3377_v45  ;;  %v2678_v45 = vpack.c.bf16 %v2183_v41, %v2182_v15 }
 0x380   : > { %v1332_v7 = vmul.f32 %v1319_v36, %v3379_v20  ;;  %v2184_v20 = vld [vmem:[%s3601_s3 + $0xc0] sm:$0xff] }
 0x381   : > { %v1342_v13 = vsel %vm1334_vm5, %v2948_v18, %v1333_v50  ;;  %v2179_v18 = vld [vmem:[%s3601_s3 + $0x98] sm:$0xff]  ;;  %v2682_v49 = vpack.c.bf16 %v2185_v46, %v2184_v20 }
 0x382   : > { %v1341_v10 = vsel %vm1334_vm5, %v2943_v17, %v1332_v7  ;;  %v2178_v17 = vld [vmem:[%s3601_s3 + $0x90] sm:$0xff] }
 0x383   : > { %2495 = vmatprep.mubr.f32.mxu0 %v1341_v10  ;;  %v2670_v48 = vpack.c.bf16 %v2179_v18, %v2178_v17 }
 0x384   : > { %2496 = vmatmul.mubr.f32.gmra.mrb[6].mxu0 %v1342_v13 }
 0x385   : > { %2671 = vmatprep.subr.bf16.mxu1 %v2670_v48 }
 0x386   : > { %2673 = vmatpush3.bf16.msra.mxu1 %v2670_v48 }
 0x387   : > { %2675 = vmatprep.subr.bf16.mxu1 %v2674_v5 }
 0x38a   : > { %2677 = vmatpush3.bf16.msra.mxu1 %v2674_v5 }
 0x38b   : > { %2679 = vmatprep.subr.bf16.mxu1 %v2678_v45 }
 0x38e   : > { %2681 = vmatpush3.bf16.msra.mxu1 %v2678_v45 }
 0x38f   : > { %2683 = vmatprep.subr.bf16.mxu1 %v2682_v49 }
 0x392   : > { %2685 = vmatpush3.bf16.msra.mxu1 %v2682_v49 }
 0x393   : > { %2687 = vmatprep.subr.bf16.mxu1 %v2686_v52 }
 0x396   : > { %2689 = vmatpush3.bf16.msra.mxu1 %v2686_v52 }
 0x397   : > { %2691 = vmatprep.subr.bf16.mxu1 %v2690_v56 }
 0x39a   : > { %2693 = vmatpush3.bf16.msra.mxu1 %v2690_v56 }
 0x39b   : > { %2695 = vmatprep.subr.bf16.mxu1 %v2694_v58 }
 0x39e   : > { %2697 = vmatpush3.bf16.msra.mxu1 %v2694_v58  ;;  %v1514_v58 = vld [vmem:[%s3602_s4 + $0x1] sm:$0x1] }
 0x446   : > { %v2488_v63 = vpop.f32.mrb[0].mxu0 }
 0x447   : > { %v1436_v0 = vadd.f32 %v2488_v63, %v2174_v60  ;;  %v1430_v1 = vpop.f32.mrb[1].mxu0 }
 0x448   : > { %v1431_v3 = vadd.f32 %v2174_v60, %v1430_v1  ;;  %v2175_v1 = vld [vmem:[%s3602_s4 + $0x2] ss:$0 sm:$0xff] }
 0x44a   : > { %v1469_v8 = vadd.f32 %v1436_v0, %v1431_v3  ;;  %v2491_v11 = vpop.f32.mrb[2].mxu0 }
 0x44b   : > { %v1440_v12 = vpop.f32.mrb[3].mxu0  ;;  %v1446_v16 = vadd.f32 %v2491_v11, %v2174_v60 }
 0x44c   : > { %v1441_v61 = vadd.f32 %v2174_v60, %v1440_v12 }
 0x44e   : > { %v1470_v21 = vadd.f32 %v1469_v8, %v1441_v61 }
 0x44f   : > { %v2494_v22 = vpop.f32.mrb[4].mxu0 }
 0x450   : > { %v1450_v23 = vpop.f32.mrb[5].mxu0  ;;  %v1471_v25 = vadd.f32 %v1470_v21, %v1446_v16  ;;  %v1456_v27 = vadd.f32 %v2494_v22, %v2174_v60 }
 0x451   : > { %v1451_v4 = vadd.f32 %v2174_v60, %v1450_v23 }
 0x453   : > { %v1472_v28 = vadd.f32 %v1471_v25, %v1451_v4 }
 0x455   : > { %v1473_v26 = vadd.f32 %v1472_v28, %v1456_v27 }
 0x457   : > { %v2497_v29 = vpop.f32.mrb[6].mxu0 }
 0x458   : > { %v1460_v19 = vpop.f32.mrb[7].mxu0  ;;  %v1466_v35 = vadd.f32 %v2497_v29, %v2174_v60 }
 0x459   : > { %v1461_v30 = vadd.f32 %v2174_v60, %v1460_v19 }
 0x45b   : > { %v1474_v37 = vadd.f32 %v1473_v26, %v1461_v30 }
 0x45d   : > { %v1475_v38 = vadd.f32 %v1474_v37, %v1466_v35 }
 0x45f   : > { %v1476_v31 = vrot.slane %v1475_v38, 4 }
 0x461   : > { %v1477_v43 = vadd.f32 %v1476_v31, %v1475_v38 }
 0x463   : > { %v1478_v32 = vrot.slane %v1477_v43, 2 }
 0x465   : > { %v1479_v33 = vadd.f32 %v1478_v32, %v1477_v43 }
 0x467   : > { %v1480_v44 = vrot.slane %v1479_v33, 1 }
 0x469   : > { %v1481_v6 = vadd.f32 %v1480_v44, %v1479_v33  ;;  %v2197_v44 = vld [vmem:[%s3601_s3 + $0x100] sm:$0xff] }
 0x46b   : > { %v1483_v39 = vmul.f32 0.015625, %v1481_v6  ;;  %v2198_v6 = vld [vmem:[%s3601_s3 + $0x108] sm:$0xff] }
 0x46d   : > { %v1484_v9 = vsub.f32 %v1431_v3, %v1483_v39  ;;  %v1485_v34 = vsub.f32 %v1436_v0, %v1483_v39  ;;  %v1486_v36 = vsub.f32 %v1441_v61, %v1483_v39  ;;  %v1487_v7 = vsub.f32 %v1446_v16, %v1483_v39 }
 0x46e   : > { %v1488_v50 = vsub.f32 %v1451_v4, %v1483_v39  ;;  %v1489_v40 = vsub.f32 %v1456_v27, %v1483_v39  ;;  %v1490_v10 = vsub.f32 %v1461_v30, %v1483_v39  ;;  %v1491_v13 = vsub.f32 %v1466_v35, %v1483_v39 }
 0x46f   : > { %v1492_v42 = vmul.f32 %v1484_v9, %v1484_v9  ;;  %v1493_v59 = vmul.f32 %v1485_v34, %v1485_v34  ;;  %v1494_v14 = vmul.f32 %v1486_v36, %v1486_v36  ;;  %v1495_v18 = vmul.f32 %v1487_v7, %v1487_v7 }
 0x470   : > { %v1496_v62 = vmul.f32 %v1488_v50, %v1488_v50  ;;  %v1497_v5 = vmul.f32 %v1489_v40, %v1489_v40  ;;  %v1498_v41 = vmul.f32 %v1490_v10, %v1490_v10  ;;  %v1499_v20 = vmul.f32 %v1491_v13, %v1491_v13 }
 0x471   : > { %v1500_v17 = vadd.f32 %v1493_v59, %v1492_v42  ;;  %v2698_v39 = vpack.c.bf16 %v2198_v6, %v2197_v44  ;;  %v2205_v59 = vld [vmem:[%s3601_s3 + $0x140] sm:$0xff] }
 0x473   : > { %v1501_v48 = vadd.f32 %v1500_v17, %v1494_v14  ;;  %2699 = vmatprep.subr.bf16.mxu0 %v2698_v39  ;;  %2730 = vmatprep.subr.bf16.mxu1 %v2698_v39  ;;  %v2206_v14 = vld [vmem:[%s3601_s3 + $0x148] sm:$0xff] }
 0x474   : > { %2701 = vmatpush3.bf16.msra.mxu0 %v2698_v39  ;;  %v2714_v17 = vpack.c.bf16 %v2206_v14, %v2205_v59 }
 0x475   : > { %v1502_v2 = vadd.f32 %v1501_v48, %v1495_v18  ;;  %v2207_v18 = vld [vmem:[%s3601_s3 + $0x150] sm:$0xff]  ;;  %v2208_v48 = vld [vmem:[%s3601_s3 + $0x158] sm:$0xff] }
 0x477   : > { %v1503_v15 = vadd.f32 %v1502_v2, %v1496_v62  ;;  %v2718_v62 = vpack.c.bf16 %v2208_v48, %v2207_v18  ;;  %v2209_v2 = vld [vmem:[%s3601_s3 + $0x160] sm:$0xff] }
 0x479   : > { %v1504_v45 = vadd.f32 %v1503_v15, %v1497_v5  ;;  %v2210_v5 = vld [vmem:[%s3601_s3 + $0x168] sm:$0xff] }
 0x47a   : > { %v2722_v15 = vpack.c.bf16 %v2210_v5, %v2209_v2 }
 0x47b   : > { %v1505_v46 = vadd.f32 %v1504_v45, %v1498_v41  ;;  %v2211_v41 = vld [vmem:[%s3601_s3 + $0x170] sm:$0xff]  ;;  %v2212_v45 = vld [vmem:[%s3601_s3 + $0x178] sm:$0xff] }
 0x47d   : > { %v1506_v49 = vadd.f32 %v1505_v46, %v1499_v20  ;;  %v2726_v20 = vpack.c.bf16 %v2212_v45, %v2211_v41  ;;  %v2193_v46 = vld [vmem:[%s3602_s4 + $0x4] ss:$0 sm:$0xff] }
 0x47f   : > { %v1507_v51 = vrot.slane %v1506_v49, 4 }
 0x481   : > { %v1508_v55 = vadd.f32 %v1507_v51, %v1506_v49 }
 0x483   : > { %v1509_v52 = vrot.slane %v1508_v55, 2 }
 0x485   : > { %v1510_v53 = vadd.f32 %v1509_v52, %v1508_v55 }
 0x487   : > { %v1511_v47 = vrot.slane %v1510_v53, 1 }
 0x489   : > { %v1512_v56 = vadd.f32 %v1511_v47, %v1510_v53 }
 0x48b   : > { %v1513_v57 = vmul.f32 0.015625, %v1512_v56 }
 0x48d   : > { %v1515_v24 = vadd.f32 1e-05, %v1513_v57 }
 0x48f   : > { %2792 = vrsqrt.f32 %v1515_v24 }
 0x499   : > { %v2793_v60 = vpop.eup %2792 }
 0x49a   : > { %v1517_v63 = vmul.f32 %v2793_v60, %v1514_v58 }
 0x49c   : > { %v1521_v0 = vrot.slane %v1517_v63, %v3148_v54 }
 0x49e   : > { %v1528_v3 = vmul.f32 %v1521_v0, %v1490_v10  ;;  %v1522_v8 = vmul.f32 %v1521_v0, %v1484_v9  ;;  %v1523_v11 = vmul.f32 %v1521_v0, %v1485_v34  ;;  %v1524_v12 = vmul.f32 %v1521_v0, %v1486_v36  ;;  %v2199_v9 = vld [vmem:[%s3601_s3 + $0x110] sm:$0xff]  ;;  %v2200_v34 = vld [vmem:[%s3601_s3 + $0x118] sm:$0xff] }
 0x49f   : > { %v1525_v61 = vmul.f32 %v1521_v0, %v1487_v7  ;;  %v1526_v16 = vmul.f32 %v1521_v0, %v1488_v50  ;;  %v1527_v21 = vmul.f32 %v1521_v0, %v1489_v40  ;;  %v1529_v22 = vmul.f32 %v1521_v0, %v1491_v13  ;;  %v2201_v7 = vld [vmem:[%s3601_s3 + $0x120] sm:$0xff]  ;;  %v2202_v50 = vld [vmem:[%s3601_s3 + $0x128] sm:$0xff]  ;;  %v2203_v10 = vld [vmem:[%s3601_s3 + $0x130] sm:$0xff] }
 0x4a0   : > { %v1535_v23 = vadd.f32 %v2175_v1, %v1522_v8  ;;  %v1536_v4 = vadd.f32 %v2175_v1, %v1523_v11  ;;  %v1537_v25 = vadd.f32 %v2175_v1, %v1524_v12  ;;  %v1541_v38 = vadd.f32 %v2175_v1, %v1528_v3  ;;  %v2204_v13 = vld [vmem:[%s3601_s3 + $0x138] sm:$0xff] }
 0x4a1   : > { %v1538_v29 = vadd.f32 %v2175_v1, %v1525_v61  ;;  %v1539_v30 = vadd.f32 %v2175_v1, %v1526_v16  ;;  %v1540_v35 = vadd.f32 %v2175_v1, %v1527_v21  ;;  %v1542_v43 = vadd.f32 %v2175_v1, %v1529_v22 }
 0x4a2   : > { %v1543_v27 = vmax.f32 %v1535_v23, 0.0  ;;  %v1544_v28 = vmax.f32 %v1536_v4, 0.0  ;;  %v1545_v19 = vmax.f32 %v1537_v25, 0.0  ;;  %v1549_v32 = vmax.f32 %v1541_v38, 0.0 }
 0x4a3   : > { %v1546_v26 = vmax.f32 %v1538_v29, 0.0  ;;  %v1547_v37 = vmax.f32 %v1539_v30, 0.0  ;;  %v1548_v31 = vmax.f32 %v1540_v35, 0.0  ;;  %v1550_v33 = vmax.f32 %v1542_v43, 0.0 }
 0x4a4   : > { %2530 = vmatprep.mubr.f32.mxu1 %v1543_v27  ;;  %v2702_v36 = vpack.c.bf16 %v2200_v34, %v2199_v9  ;;  %v2706_v40 = vpack.c.bf16 %v2202_v50, %v2201_v7  ;;  %v2710_v42 = vpack.c.bf16 %v2204_v13, %v2203_v10 }
 0x4a5   : > { %2531 = vmatmul.mubr.f32.vlgmr.msra.gmra.mrb[0].mxu1 %v1544_v28 }
 0x4a6   : > { %2533 = vmatprep.mubr.f32.mxu1 %v1545_v19  ;;  %2738 = vmatpush3.bf16.msra.mxu1 %v2698_v39 }
 0x4a7   : > { %2703 = vmatprep.subr.bf16.mxu0 %v2702_v36  ;;  %2731 = vmatprep.subr.bf16.mxu1 %v2702_v36 }
 0x4a8   : > { %2705 = vmatpush3.bf16.msra.mxu0 %v2702_v36 }
 0x4a9   : > { %2534 = vmatmul.mubr.f32.gmra.mrb[2].mxu1 %v1546_v26  ;;  %2707 = vmatprep.subr.bf16.mxu0 %v2706_v40 }
 0x4aa   : > { %2536 = vmatprep.mubr.f32.mxu1 %v1547_v37  ;;  %2739 = vmatpush3.bf16.msra.mxu1 %v2702_v36 }
 0x4ab   : > { %2732 = vmatprep.subr.bf16.mxu1 %v2706_v40 }
 0x4ac   : > { %2709 = vmatpush3.bf16.msra.mxu0 %v2706_v40 }
 0x4ad   : > { %2537 = vmatmul.mubr.f32.gmra.mrb[4].mxu1 %v1548_v31  ;;  %2711 = vmatprep.subr.bf16.mxu0 %v2710_v42 }
 0x4ae   : > { %2539 = vmatprep.mubr.f32.mxu1 %v1549_v32  ;;  %2740 = vmatpush3.bf16.msra.mxu1 %v2706_v40 }
 0x4af   : > { %2733 = vmatprep.subr.bf16.mxu1 %v2710_v42 }
 0x4b0   : > { %2713 = vmatpush3.bf16.msra.mxu0 %v2710_v42 }
 0x4b1   : > { %2540 = vmatmul.mubr.f32.gmra.mrb[6].mxu1 %v1550_v33  ;;  %2715 = vmatprep.subr.bf16.mxu0 %v2714_v17 }
 0x4b2   : > { %2741 = vmatpush3.bf16.msra.mxu1 %v2710_v42 }
 0x4b3   : > { %2734 = vmatprep.subr.bf16.mxu1 %v2714_v17 }
 0x4b4   : > { %2717 = vmatpush3.bf16.msra.mxu0 %v2714_v17 }
 0x4b5   : > { %2719 = vmatprep.subr.bf16.mxu0 %v2718_v62 }
 0x4b6   : > { %2742 = vmatpush3.bf16.msra.mxu1 %v2714_v17 }
 0x4b7   : > { %2735 = vmatprep.subr.bf16.mxu1 %v2718_v62 }
 0x4b8   : > { %2721 = vmatpush3.bf16.msra.mxu0 %v2718_v62 }
 0x4b9   : > { %2723 = vmatprep.subr.bf16.mxu0 %v2722_v15 }
 0x4ba   : > { %2743 = vmatpush3.bf16.msra.mxu1 %v2718_v62 }
 0x4bb   : > { %2736 = vmatprep.subr.bf16.mxu1 %v2722_v15 }
 0x4bc   : > { %2725 = vmatpush3.bf16.msra.mxu0 %v2722_v15 }
 0x4bd   : > { %2727 = vmatprep.subr.bf16.mxu0 %v2726_v20 }
 0x4be   : > { %2744 = vmatpush3.bf16.msra.mxu1 %v2722_v15 }
 0x4bf   : > { %2737 = vmatprep.subr.bf16.mxu1 %v2726_v20 }
 0x4c0   : > { %2729 = vmatpush3.bf16.msra.mxu0 %v2726_v20 }
 0x4c2   : > { %2745 = vmatpush3.bf16.msra.mxu1 %v2726_v20  ;;  %v2194_v20 = vld [vmem:[%s3602_s4 + $0x5] sm:$0x1] }
 0x578   : > { %v2532_v49 = vpop.f32.mrb[0].mxu1 }
 0x579   : > { %v1646_v51 = vadd.f32 %v2532_v49, %v2193_v46  ;;  %v1640_v55 = vpop.f32.mrb[1].mxu1 }
 0x57a   : > { %v1641_v52 = vadd.f32 %v2193_v46, %v1640_v55  ;;  %v2196_v55 = vld [vmem:[%s3602_s4 + $0x6] ss:$0 sm:$0xff] }
 0x57c   : > { %v1679_v53 = vadd.f32 %v1646_v51, %v1641_v52  ;;  %v2535_v47 = vpop.f32.mrb[2].mxu1 }
 0x57d   : > { %v1650_v56 = vpop.f32.mrb[3].mxu1  ;;  %v1656_v24 = vadd.f32 %v2535_v47, %v2193_v46 }
 0x57e   : > { %v1651_v57 = vadd.f32 %v2193_v46, %v1650_v56 }
 0x580   : > { %v1680_v58 = vadd.f32 %v1679_v53, %v1651_v57  ;;  %v2538_v60 = vpop.f32.mrb[4].mxu1 }
 0x581   : > { %v1660_v63 = vpop.f32.mrb[5].mxu1  ;;  %v1666_v3 = vadd.f32 %v2538_v60, %v2193_v46 }
 0x582   : > { %v1661_v0 = vadd.f32 %v2193_v46, %v1660_v63  ;;  %v1681_v1 = vadd.f32 %v1680_v58, %v1656_v24 }
 0x584   : > { %v1682_v8 = vadd.f32 %v1681_v1, %v1661_v0  ;;  %v2541_v11 = vpop.f32.mrb[6].mxu1 }
 0x585   : > { %v1670_v12 = vpop.f32.mrb[7].mxu1  ;;  %v1676_v21 = vadd.f32 %v2541_v11, %v2193_v46 }
 0x586   : > { %v1671_v61 = vadd.f32 %v2193_v46, %v1670_v12  ;;  %v1683_v16 = vadd.f32 %v1682_v8, %v1666_v3 }
 0x588   : > { %v1684_v22 = vadd.f32 %v1683_v16, %v1671_v61 }
 0x58a   : > { %v1685_v23 = vadd.f32 %v1684_v22, %v1676_v21 }
 0x58c   : > { %v1686_v4 = vrot.slane %v1685_v23, 4 }
 0x58e   : > { %v1687_v25 = vadd.f32 %v1686_v4, %v1685_v23 }
 0x590   : > { %v1688_v27 = vrot.slane %v1687_v25, 2 }
 0x592   : > { %v1689_v28 = vadd.f32 %v1688_v27, %v1687_v25 }
 0x594   : > { %v1690_v29 = vrot.slane %v1689_v28, 1 }
 0x596   : > { %v1691_v19 = vadd.f32 %v1690_v29, %v1689_v28  ;;  %v2214_v29 = vld [vmem:[%s3602_s4 + $0x8] ss:$0 sm:$0xff] }
 0x598   : > { %v1692_v30 = vmul.f32 0.015625, %v1691_v19 }
 0x59a   : > { %v1693_v26 = vsub.f32 %v1641_v52, %v1692_v30  ;;  %v1694_v35 = vsub.f32 %v1646_v51, %v1692_v30  ;;  %v1695_v37 = vsub.f32 %v1651_v57, %v1692_v30  ;;  %v1696_v38 = vsub.f32 %v1656_v24, %v1692_v30 }
 0x59b   : > { %v1697_v31 = vsub.f32 %v1661_v0, %v1692_v30  ;;  %v1698_v43 = vsub.f32 %v1666_v3, %v1692_v30  ;;  %v1699_v32 = vsub.f32 %v1671_v61, %v1692_v30  ;;  %v1700_v33 = vsub.f32 %v1676_v21, %v1692_v30 }
 0x59c   : > { %v1701_v44 = vmul.f32 %v1693_v26, %v1693_v26  ;;  %v1702_v6 = vmul.f32 %v1694_v35, %v1694_v35  ;;  %v1703_v39 = vmul.f32 %v1695_v37, %v1695_v37  ;;  %v1704_v34 = vmul.f32 %v1696_v38, %v1696_v38 }
 0x59d   : > { %v1705_v7 = vmul.f32 %v1697_v31, %v1697_v31  ;;  %v1706_v40 = vmul.f32 %v1698_v43, %v1698_v43  ;;  %v1707_v13 = vmul.f32 %v1699_v32, %v1699_v32  ;;  %v1708_v59 = vmul.f32 %v1700_v33, %v1700_v33 }
 0x59e   : > { %v1709_v9 = vadd.f32 %v1702_v6, %v1701_v44 }
 0x5a0   : > { %v1710_v36 = vadd.f32 %v1709_v9, %v1703_v39 }
 0x5a2   : > { %v1711_v50 = vadd.f32 %v1710_v36, %v1704_v34 }
 0x5a4   : > { %v1712_v10 = vadd.f32 %v1711_v50, %v1705_v7 }
 0x5a6   : > { %v1713_v42 = vadd.f32 %v1712_v10, %v1706_v40 }
 0x5a8   : > { %v1714_v14 = vadd.f32 %v1713_v42, %v1707_v13 }
 0x5aa   : > { %v1715_v17 = vadd.f32 %v1714_v14, %v1708_v59 }
 0x5ac   : > { %v1716_v18 = vrot.slane %v1715_v17, 4 }
 0x5ae   : > { %v1717_v48 = vadd.f32 %v1716_v18, %v1715_v17 }
 0x5b0   : > { %v1718_v62 = vrot.slane %v1717_v48, 2 }
 0x5b2   : > { %v1719_v2 = vadd.f32 %v1718_v62, %v1717_v48 }
 0x5b4   : > { %v1720_v5 = vrot.slane %v1719_v2, 1 }
 0x5b6   : > { %v1721_v15 = vadd.f32 %v1720_v5, %v1719_v2 }
 0x5b8   : > { %v1722_v41 = vmul.f32 0.015625, %v1721_v15 }
 0x5ba   : > { %v1724_v45 = vadd.f32 1e-05, %v1722_v41 }
 0x5bc   : > { %2794 = vrsqrt.f32 %v1724_v45 }
 0x5c6   : > { %v2795_v46 = vpop.eup %2794 }
 0x5c7   : > { %v1726_v49 = vmul.f32 %v2795_v46, %v2194_v20 }
 0x5c9   : > { %v1730_v51 = vrot.slane %v1726_v49, %v3148_v54 }
 0x5cb   : > { %v1737_v52 = vmul.f32 %v1730_v51, %v1699_v32  ;;  %v1731_v53 = vmul.f32 %v1730_v51, %v1693_v26  ;;  %v1735_v47 = vmul.f32 %v1730_v51, %v1697_v31  ;;  %v1732_v56 = vmul.f32 %v1730_v51, %v1694_v35 }
 0x5cc   : > { %v1736_v57 = vmul.f32 %v1730_v51, %v1698_v43  ;;  %v1733_v24 = vmul.f32 %v1730_v51, %v1695_v37  ;;  %v1734_v58 = vmul.f32 %v1730_v51, %v1696_v38  ;;  %v1738_v60 = vmul.f32 %v1730_v51, %v1700_v33 }
 0x5cd   : > { %v1744_v63 = vadd.f32 %v2196_v55, %v1731_v53  ;;  %v1748_v0 = vadd.f32 %v2196_v55, %v1735_v47  ;;  %v1745_v1 = vadd.f32 %v2196_v55, %v1732_v56  ;;  %v1750_v3 = vadd.f32 %v2196_v55, %v1737_v52 }
 0x5ce   : > { %v1749_v8 = vadd.f32 %v2196_v55, %v1736_v57  ;;  %v1746_v11 = vadd.f32 %v2196_v55, %v1733_v24  ;;  %v1747_v22 = vadd.f32 %v2196_v55, %v1734_v58  ;;  %v1751_v23 = vadd.f32 %v2196_v55, %v1738_v60 }
 0x5cf   : > { %v1752_v12 = vmax.f32 %v1744_v63, 0.0  ;;  %v1756_v61 = vmax.f32 %v1748_v0, 0.0  ;;  %v1753_v16 = vmax.f32 %v1745_v1, 0.0  ;;  %v1758_v25 = vmax.f32 %v1750_v3, 0.0 }
 0x5d0   : > { %v1757_v21 = vmax.f32 %v1749_v8, 0.0  ;;  %v1754_v4 = vmax.f32 %v1746_v11, 0.0  ;;  %v1755_v27 = vmax.f32 %v1747_v22, 0.0  ;;  %v1759_v28 = vmax.f32 %v1751_v23, 0.0 }
 0x5d1   : > { %2574 = vmatprep.mubr.f32.mxu0 %v1752_v12  ;;  %2580 = vmatprep.mubr.f32.mxu1 %v1756_v61 }
 0x5d2   : > { %2575 = vmatmul.mubr.f32.vlgmr.msra.gmra.mrb[8].mxu0 %v1753_v16  ;;  %2581 = vmatmul.mubr.f32.vlgmr.msra.gmra.mrb[8].mxu1 %v1757_v21 }
 0x5d3   : > { %2577 = vmatprep.mubr.f32.mxu0 %v1754_v4  ;;  %2583 = vmatprep.mubr.f32.mxu1 %v1758_v25 }
 0x5d6   : > { %2578 = vmatmul.mubr.f32.gmra.mrb[10].mxu0 %v1755_v27  ;;  %2584 = vmatmul.mubr.f32.gmra.mrb[10].mxu1 %v1759_v28  ;;  %v2215_v28 = vld [vmem:[%s3602_s4 + $0x9] sm:$0x1] }
 0x6a5   : > { %v2576_v19 = vpop.f32.mrb[8].mxu0  ;;  %v2582_v30 = vpop.f32.mrb[8].mxu1 }
 0x6a6   : > { %v1855_v26 = vadd.f32 %v2576_v19, %v2214_v29  ;;  %v1849_v35 = vpop.f32.mrb[9].mxu0  ;;  %v1869_v37 = vpop.f32.mrb[9].mxu1  ;;  %v1875_v7 = vadd.f32 %v2582_v30, %v2214_v29 }
 0x6a7   : > { %v1850_v38 = vadd.f32 %v2214_v29, %v1849_v35  ;;  %v1870_v34 = vadd.f32 %v2214_v29, %v1869_v37 }
 0x6a9   : > { %v1888_v31 = vadd.f32 %v1855_v26, %v1850_v38  ;;  %v2579_v43 = vpop.f32.mrb[10].mxu0  ;;  %v2585_v32 = vpop.f32.mrb[10].mxu1 }
 0x6aa   : > { %v1859_v33 = vpop.f32.mrb[11].mxu0  ;;  %v1879_v44 = vpop.f32.mrb[11].mxu1  ;;  %v1865_v39 = vadd.f32 %v2579_v43, %v2214_v29  ;;  %v1885_v13 = vadd.f32 %v2585_v32, %v2214_v29 }
 0x6ab   : > { %v1860_v6 = vadd.f32 %v2214_v29, %v1859_v33  ;;  %v1880_v40 = vadd.f32 %v2214_v29, %v1879_v44 }
 0x6ad   : > { %v1889_v9 = vadd.f32 %v1888_v31, %v1860_v6 }
 0x6af   : > { %v1890_v36 = vadd.f32 %v1889_v9, %v1865_v39 }
 0x6b1   : > { %v1891_v50 = vadd.f32 %v1890_v36, %v1870_v34 }
 0x6b3   : > { %v1892_v10 = vadd.f32 %v1891_v50, %v1875_v7 }
 0x6b5   : > { %v1893_v42 = vadd.f32 %v1892_v10, %v1880_v40 }
 0x6b7   : > { %v1894_v59 = vadd.f32 %v1893_v42, %v1885_v13 }
 0x6b9   : > { %v1895_v14 = vrot.slane %v1894_v59, 4 }
 0x6bb   : > { %v1896_v17 = vadd.f32 %v1895_v14, %v1894_v59 }
 0x6bd   : > { %v1897_v18 = vrot.slane %v1896_v17, 2 }
 0x6bf   : > { %v1898_v48 = vadd.f32 %v1897_v18, %v1896_v17 }
 0x6c1   : > { %v1899_v62 = vrot.slane %v1898_v48, 1 }
 0x6c3   : > { %v1900_v2 = vadd.f32 %v1899_v62, %v1898_v48 }
 0x6c5   : > { %v1901_v5 = vmul.f32 0.015625, %v1900_v2 }
 0x6c7   : > { %v1902_v15 = vsub.f32 %v1850_v38, %v1901_v5  ;;  %v1903_v41 = vsub.f32 %v1855_v26, %v1901_v5  ;;  %v1904_v45 = vsub.f32 %v1860_v6, %v1901_v5  ;;  %v1905_v20 = vsub.f32 %v1865_v39, %v1901_v5  ;;  %v2217_v26 = vld [vmem:[%s3602_s4 + $0xa] ss:$0 sm:$0xff] }
 0x6c8   : > { %v1906_v46 = vsub.f32 %v1870_v34, %v1901_v5  ;;  %v1907_v49 = vsub.f32 %v1875_v7, %v1901_v5  ;;  %v1908_v51 = vsub.f32 %v1880_v40, %v1901_v5  ;;  %v1909_v55 = vsub.f32 %v1885_v13, %v1901_v5 }
 0x6c9   : > { %v1910_v52 = vmul.f32 %v1902_v15, %v1902_v15  ;;  %v1911_v53 = vmul.f32 %v1903_v41, %v1903_v41  ;;  %v1912_v47 = vmul.f32 %v1904_v45, %v1904_v45  ;;  %v1913_v57 = vmul.f32 %v1905_v20, %v1905_v20 }
 0x6ca   : > { %v1914_v58 = vmul.f32 %v1906_v46, %v1906_v46  ;;  %v1915_v63 = vmul.f32 %v1907_v49, %v1907_v49  ;;  %v1916_v1 = vmul.f32 %v1908_v51, %v1908_v51  ;;  %v1917_v8 = vmul.f32 %v1909_v55, %v1909_v55 }
 0x6cb   : > { %v1918_v56 = vadd.f32 %v1911_v53, %v1910_v52 }
 0x6cd   : > { %v1919_v24 = vadd.f32 %v1918_v56, %v1912_v47 }
 0x6cf   : > { %v1920_v60 = vadd.f32 %v1919_v24, %v1913_v57 }
 0x6d1   : > { %v1921_v0 = vadd.f32 %v1920_v60, %v1914_v58 }
 0x6d3   : > { %v1922_v3 = vadd.f32 %v1921_v0, %v1915_v63 }
 0x6d5   : > { %v1923_v11 = vadd.f32 %v1922_v3, %v1916_v1 }
 0x6d7   : > { %v1924_v12 = vadd.f32 %v1923_v11, %v1917_v8 }
 0x6d9   : > { %v1925_v61 = vrot.slane %v1924_v12, 4 }
 0x6db   : > { %v1926_v16 = vadd.f32 %v1925_v61, %v1924_v12 }
 0x6dd   : > { %v1927_v21 = vrot.slane %v1926_v16, 2 }
 0x6df   : > { %v1928_v22 = vadd.f32 %v1927_v21, %v1926_v16 }
 0x6e1   : > { %v1929_v23 = vrot.slane %v1928_v22, 1 }
 0x6e3   : > { %v1930_v4 = vadd.f32 %v1929_v23, %v1928_v22 }
 0x6e5   : > { %v1931_v25 = vmul.f32 0.015625, %v1930_v4 }
 0x6e7   : > { %v1933_v27 = vadd.f32 1e-05, %v1931_v25 }
 0x6e9   : > { %2796 = vrsqrt.f32 %v1933_v27 }
 0x6f3   : > { %v2797_v29 = vpop.eup %2796 }
 0x6f4   : > { %v1935_v19 = vmul.f32 %v2797_v29, %v2215_v28 }
 0x6f6   : > { %v1939_v30 = vrot.slane %v1935_v19, %v3148_v54 }
 0x6f8   : > { %v1940_v35 = vmul.f32 %v1939_v30, %v1902_v15  ;;  %v1941_v37 = vmul.f32 %v1939_v30, %v1903_v41  ;;  %v1942_v38 = vmul.f32 %v1939_v30, %v1904_v45  ;;  %v1943_v31 = vmul.f32 %v1939_v30, %v1905_v20 }
 0x6f9   : > { %v1944_v43 = vmul.f32 %v1939_v30, %v1906_v46  ;;  %v1945_v32 = vmul.f32 %v1939_v30, %v1907_v49  ;;  %v1946_v33 = vmul.f32 %v1939_v30, %v1908_v51  ;;  %v1947_v44 = vmul.f32 %v1939_v30, %v1909_v55 }
 0x6fa   : > { %v1953_v6 = vadd.f32 %v2217_v26, %v1940_v35  ;;  %v1954_v39 = vadd.f32 %v2217_v26, %v1941_v37  ;;  %v1955_v9 = vadd.f32 %v2217_v26, %v1942_v38  ;;  %v1956_v34 = vadd.f32 %v2217_v26, %v1943_v31 }
 0x6fb   : > { %v1957_v36 = vadd.f32 %v2217_v26, %v1944_v43  ;;  %v1958_v7 = vadd.f32 %v2217_v26, %v1945_v32  ;;  %v1959_v50 = vadd.f32 %v2217_v26, %v1946_v33  ;;  %v1960_v54 = vadd.f32 %v2217_v26, %v1947_v44 }
 0x6fc   : > { %v1961_v40 = vmax.f32 %v1953_v6, 0.0  ;;  %v1962_v10 = vmax.f32 %v1954_v39, 0.0  ;;  %v1963_v13 = vmax.f32 %v1955_v9, 0.0  ;;  %v1964_v42 = vmax.f32 %v1956_v34, 0.0 }
 0x6fd   : > { %v1965_v59 = vmax.f32 %v1957_v36, 0.0  ;;  %v1966_v14 = vmax.f32 %v1958_v7, 0.0  ;;  %v1967_v17 = vmax.f32 %v1959_v50, 0.0  ;;  %v1968_v18 = vmax.f32 %v1960_v54, 0.0 }
 0x6fe   : > { %1969 = vst [vmem:[#allocation3] sm:$0xff] %v1961_v40  ;;  %1970 = vst [vmem:[#allocation3 + $0x8] sm:$0xff] %v1962_v10 }
 0x6ff   : > { %1971 = vst [vmem:[#allocation3 + $0x10] sm:$0xff] %v1963_v13  ;;  %1972 = vst [vmem:[#allocation3 + $0x18] sm:$0xff] %v1964_v42 }
 0x700   : > { %1973 = vst [vmem:[#allocation3 + $0x20] sm:$0xff] %v1965_v59  ;;  %1974 = vst [vmem:[#allocation3 + $0x28] sm:$0xff] %v1966_v14 }
 0x701   : > { %1975 = vst [vmem:[#allocation3 + $0x30] sm:$0xff] %v1967_v17  ;;  %1976 = vst [vmem:[#allocation3 + $0x38] sm:$0xff] %v1968_v18 }
 0x702 PF: > { %p2750_p7 = scmp.eq.s32.totalorder %s2881_s19, 2  ;;  %s2842_s22 = smov [#allocation3]  }
 0x703   : > { %s1983_s23 = sshll.u32 %s2842_s22, 4  ;;  %s1984_s23 = int_to_ptr.vmem [resolvable:$true] %s1983_s23 }
 0x704   : > { %s2798_s24 = scalar_lea.vmem %s1984_s23, 1024  ;;  %p2805_p11 = scmp.lt.s32.totalorder %s1984_s23, %s1984_s23 }
 0x705   : > { %p2799_p8 = scmp.ne.s32.totalorder %s1984_s23, %s2798_s24  ;;  %p2806_p12 = scmp.lt.s32.totalorder %s2798_s24, %s2798_s24 }
 0x707   : > { %p2800_p9 = pnand %p2799_p8, %p2750_p7  ;;  %p2807_p13 = por %p2806_p12, %p2805_p11 }
 0x709   : > { %p2801_p10 = pneg %p2800_p9 }
 0x70b   : > { %p2808_p0 = pnand %p2807_p13, %p2801_p10 }
 0x70d   : > { %2811 = shalt.err (!%p2808_p0)
}
 0x70e   : > { %s2812_s27 = scalar_lea.hbm %s3603_s5, 1024 }
 0x70f   : > { %p2813_p1 = scmp.ne.s32.totalorder %s3603_s5, %s2812_s27  ;;  %p2818_p4 = scmp.lt.u32.totalorder %s2812_s27, %s3603_s5 }
 0x711   : > { %p2814_p2 = pnand %p2813_p1, %p2750_p7 }
 0x713   : > { %p2815_p3 = pneg %p2814_p2 }
 0x715   : > { %p2820_p5 = pnand %p2818_p4, %p2815_p3 }
 0x717   : > { %2823 = shalt.err (!%p2820_p5)
}
 0x718   : > { %s2843_s7 = smov 128   ;;  %s2844_s8 = smov 8  }
 0x719   : > { %2747 = dma.vmem_to_hbm [thread:$0]  (%p2750_p7), %s1984_s23, 1024, %s3603_s5, [#allocation4], %s2843_s7, %s2843_s7, %s2844_s8  }
 0x71a   : > { %2829 = dma.done.wait (%p2750_p7), [#allocation4], 1024  }
 0x71b   : > { %2831 = vsyncadd (%p2750_p7), [#allocation4], 4294966272 }
 0x71c PF: > { %s16_s18 = sadd.s32 1, %s2834_s18  }
 0x71d   : > { %p13_p6 = scmp.ge.s32.totalorder %s16_s18, 5  }
 0x71f   :  { %15 = sbr.rel (!%p13_p6) target bundleno = 1 (0x1), region = 82 }
 0x726   :  { %1999 = vsyncpa [#allocation4], 1 }
 0x727   :  { %2001 = vsyncpa [#allocation4 + $0x1], 1 }

</bundles_post_ra>
